<compile_context>
chip_gen: v7x
topology: tpu7x:2x2x1
jax: 0.10.0
libtpu: 0.0.40
codegen_flags: <defaults>
</compile_context>

<pallas_src>
import math

import jax
import jax.numpy as jnp
import numpy as np
from jax import lax
from jax.experimental import pallas as pl
from jax.experimental.pallas import tpu as pltpu

# ---- module hyperparameters (mirror the PyTorch defaults) ----
KERNEL_SIZE = (2, 2)
STRIDE = (1, 1)
PADDING = (0, 0)
DILATION = (1, 1)
GRID_SIZE = 5
SPLINE_ORDER = 3
SCALE_NOISE = 0.1
SCALE_BASE = 1.0
SCALE_SPLINE = 1.0
GRID_RANGE = (-1.0, 1.0)

KK = KERNEL_SIZE[0] * KERNEL_SIZE[1]           # KANLinear in_features = 4
N_COEF = GRID_SIZE + SPLINE_ORDER              # spline coefficients / feature = 8
N_GRID = GRID_SIZE + 2 * SPLINE_ORDER + 1      # knots / feature = 12
GRID_H = (GRID_RANGE[1] - GRID_RANGE[0]) / GRID_SIZE   # uniform knot spacing

# Default KANLinear grid is uniform; bake the knots as trace-time constants (computed in
# float32 so they are bit-identical to the module's registered grid buffer).
_GRID_1D_F32 = (np.arange(-SPLINE_ORDER, GRID_SIZE + SPLINE_ORDER + 1, dtype=np.float32)
                * np.float32(GRID_H) + np.float32(GRID_RANGE[0]))
KNOTS = tuple(float(v) for v in _GRID_1D_F32)
# TODO(synk): after KANLinear.update_grid the knots become non-uniform; that variant needs
# the knots (and per-level reciprocal denominators) passed in instead of baked constants.

SUBLANES = 8
LANE_CHUNK = 256              # lanes per in-kernel sub-chunk (2 vregs per (8, LC) plane)
MAX_LANES_PER_STEP = 4096     # lanes per grid step (power-of-two multiple of LANE_CHUNK)


def kan_conv_kernel(bw_ref, sw_ref, x_ref, o_ref):
    """KANLinear(in=KK, out=1) applied to a (KK*8, TL) tile of flattened patches.

    bw_ref: (KK,) SMEM         base-activation weights
    sw_ref: (KK*N_COEF,) SMEM  scaled spline weights (row-major over (feature, coef))
    x_ref : (KK*8, TL) VMEM    patches, feature-major, dense (sublane, lane) layout
    o_ref : (8, TL) VMEM       output
    """
    tl = x_ref.shape[1]
    n_chunks = tl // LANE_CHUNK

    # Hoist the SMEM scalar loads out of the lane-chunk loop (splats at use-sites are cheap;
    # pre-broadcasting 36 (8,LC) planes would blow the register file).
    bw = [bw_ref[f] for f in range(KK)]
    sw = [[sw_ref[f * N_COEF + j] for j in range(N_COEF)] for f in range(KK)]

    def chunk_body(c, carry):
        off = pl.multiple_of(c * LANE_CHUNK, LANE_CHUNK)
        acc = jnp.zeros((SUBLANES, LANE_CHUNK), jnp.float32)

        for f in range(KK):                                   # KK = 4 features
            xf = x_ref[pl.ds(f * SUBLANES, SUBLANES), pl.ds(off, LANE_CHUNK)]   # (8, LC)

            # --- base branch: SiLU via tanh (exp/tanh -> EUP slot, no VALU divide) ---
            silu = xf * (0.5 * jnp.tanh(0.5 * xf) + 0.5)
            acc = acc + bw[f] * silu

            # --- order-0 bases: indicator of the knot interval containing x ---
            ge = [xf >= KNOTS[j] for j in range(N_GRID)]
            bases = [jnp.logical_and(ge[j], jnp.logical_not(ge[j + 1])).astype(jnp.float32)
                     for j in range(N_GRID - 1)]

            # --- Cox-de Boor levels 1 .. SPLINE_ORDER-1 ---
            # Uniform knots -> both denominators at level k equal k*GRID_H, so divisions
            # become trace-time reciprocal-constant multiplies; planes are built one at a
            # time so only ~12 (8, LC) planes are ever live.
            for k in range(1, SPLINE_ORDER):
                inv = 1.0 / (k * GRID_H)
                u = xf * inv
                bases = [(u - KNOTS[j] * inv) * bases[j]
                         + (KNOTS[j + k + 1] * inv - u) * bases[j + 1]
                         for j in range(N_GRID - 1 - k)]

            # --- final level fused with the scaled spline coefficients (out_features = 1) ---
            inv = 1.0 / (SPLINE_ORDER * GRID_H)
            u = xf * inv
            for j in range(N_COEF):
                b = ((u - KNOTS[j] * inv) * bases[j]
                     + (KNOTS[j + SPLINE_ORDER + 1] * inv - u) * bases[j + 1])
                acc = acc + sw[f][j] * b

        o_ref[:, pl.ds(off, LANE_CHUNK)] = acc
        return carry

    lax.fori_loop(0, n_chunks, chunk_body, None)


def extract_patches_nchw(x, kernel_size, stride, dilation, padding):
    """torch.nn.Unfold equivalent, built feature-major: (kh*kw, B, C, H_out, W_out)."""
    kh, kw = kernel_size
    x = jnp.pad(x, ((0, 0), (0, 0), (padding[0], padding[0]), (padding[1], padding[1])))
    _, _, H, W = x.shape
    h_out = (H - dilation[0] * (kh - 1) - 1) // stride[0] + 1
    w_out = (W - dilation[1] * (kw - 1) - 1) // stride[1] + 1
    cols = []
    for i in range(kh):
        for j in range(kw):
            hi = i * dilation[0]
            wj = j * dilation[1]
            cols.append(
                x[:, :, hi: hi + (h_out - 1) * stride[0] + 1: stride[0],
                        wj: wj + (w_out - 1) * stride[1] + 1: stride[1]]
            )
    # axis=0 keeps the big flattened-patch axis contiguous -> no (N, KK) -> (KK, N)
    # transpose (extra HBM round trip) downstream.
    return jnp.stack(cols, axis=0), h_out, w_out


def _tensorcores_per_chip():
    """Best-effort TensorCore count (v7x/megacore = 2); falls back to 1 if unknown."""
    try:
        info = pltpu.get_tpu_info()
        for name in ("num_cores", "core_count", "tensorcores_per_chip", "num_tensorcores"):
            v = getattr(info, name, None)
            if isinstance(v, (int, np.integer)) and int(v) > 0:
                return int(v)
    except Exception:
        pass
    return 1


def _plan_tiling(n, cores):
    """Pick (lanes-per-step, grid steps). Big tiles on single-TC chips; even work on multi-TC."""
    tl = MAX_LANES_PER_STEP
    # Don't let a single step be more than ~2x the whole problem (bounds pad waste).
    while tl > LANE_CHUNK and SUBLANES * tl >= 2 * n:
        tl //= 2
    # Multi-TensorCore (v7x): shrink the step tile until every core has a step to work on.
    while cores > 1 and tl > LANE_CHUNK and -(-n // (SUBLANES * tl)) < cores:
        tl //= 2
    steps = -(-n // (SUBLANES * tl))
    if cores > 1:
        steps = -(-steps // cores) * cores     # even step count across the cores
    return tl, max(steps, 1)


def kan_convolution_forward(x, base_w, scaled_sw):
    B, C, _, _ = x.shape
    patches, h_out, w_out = extract_patches_nchw(x, KERNEL_SIZE, STRIDE, DILATION, PADDING)
    n = B * C * h_out * w_out
    xt = patches.reshape(KK, n)                       # feature-major, no transpose

    cores = _tensorcores_per_chip()
    tl, steps = _plan_tiling(n, cores)
    n_pad = steps * SUBLANES * tl
    xt = jnp.pad(xt, ((0, 0), (0, n_pad - n)))
    n8 = n_pad // SUBLANES
    x2 = xt.reshape(KK * SUBLANES, n8)                # dense (sublane, lane) tiling of N

    bw_flat = base_w.reshape(KK).astype(jnp.float32)
    sw_flat = scaled_sw.reshape(KK * N_COEF).astype(jnp.float32)

    out = pl.pallas_call(
        kan_conv_kernel,
        out_shape=jax.ShapeDtypeStruct((SUBLANES, n8), jnp.float32),
        grid_spec=pltpu.PrefetchScalarGridSpec(
            num_scalar_prefetch=2,                    # bw_flat, sw_flat -> SMEM scalars
            grid=(steps,),
            in_specs=[pl.BlockSpec((KK * SUBLANES, tl), lambda i, bw, sw: (0, i))],
            out_specs=pl.BlockSpec((SUBLANES, tl), lambda i, bw, sw: (0, i)),
        ),
        compiler_params=pltpu.CompilerParams(dimension_semantics=("parallel",)),
    )(bw_flat, sw_flat, x2)

    # out_features == 1, n_convs == 1  ->  output is (B, C, H_out, W_out), same as PyTorch.
    # Padded tail elements are trimmed here (they hold garbage spline values of x=0).
    return out.reshape(-1)[:n].reshape(B, C, h_out, w_out)


def init_params(key):
    """Deterministic synthetic initialization of the KANLinear parameters."""
    grid_knots = jnp.asarray(np.broadcast_to(_GRID_1D_F32, (KK, N_GRID)).copy())

    k1, k2, k3 = jax.random.split(key, 3)
    bound_base = SCALE_BASE * math.sqrt(3.0 / KK)        # kaiming-uniform-style bound
    base_w = jax.random.uniform(k1, (KK, 1), jnp.float32, -bound_base, bound_base)
    spline_w = SCALE_NOISE * jax.random.normal(k2, (1, KK, N_COEF), jnp.float32)
    bound_sp = SCALE_SPLINE * math.sqrt(3.0 / KK)
    spline_scaler = jax.random.uniform(k3, (1, KK), jnp.float32, -bound_sp, bound_sp)
    # scaled_spline_weight = spline_weight * spline_scaler[..., None]  (out_features = 1)
    scaled_sw = (spline_w * spline_scaler[..., None]).reshape(KK, N_COEF)
    return grid_knots, base_w, scaled_sw


def kan_linear_ref(xp, grid_knots, base_w, scaled_sw):
    """Pure-JAX reference of KANLinear forward (real divisions, for correctness check)."""
    xe = xp[:, :, None]
    g = grid_knots[None]
    bases = ((xe >= g[:, :, :-1]) & (xe < g[:, :, 1:])).astype(xp.dtype)
    for k in range(1, SPLINE_ORDER + 1):
        bases = ((xe - g[:, :, : -(k + 1)]) / (g[:, :, k:-1] - g[:, :, : -(k + 1)]) * bases[:, :, :-1]
                 + (g[:, :, k + 1:] - xe) / (g[:, :, k + 1:] - g[:, :, 1:-k]) * bases[:, :, 1:])
    base_out = (xp * jax.nn.sigmoid(xp)) @ base_w                        # (N, 1)
    spline_out = jnp.sum(bases * scaled_sw[None], axis=(1, 2))[:, None]  # (N, 1)
    return base_out + spline_out


if __name__ == "__main__":
    key = jax.random.PRNGKey(0)
    kx, kp = jax.random.split(key)

    B, C, H, W = 2, 4, 16, 16
    x = jax.random.uniform(kx, (B, C, H, W), jnp.float32, -1.0, 1.0)
    grid_knots, base_w, scaled_sw = init_params(kp)

    # Enforce the uniform-knot assumption baked into the kernel (default KANLinear grid).
    np.testing.assert_allclose(np.asarray(grid_knots),
                               np.broadcast_to(_GRID_1D_F32, (KK, N_GRID)),
                               rtol=0.0, atol=1e-6)

    fwd = jax.jit(kan_convolution_forward)
    out = jax.block_until_ready(fwd(x, base_w, scaled_sw))

    # Sanity check against a pure-JAX reference of the same forward (f32 reassociation in
    # the kernel — reciprocal-constant denominators, fused coefficient sum — gives ~1e-6
    # level differences, hence the slightly loosened 2e-5 tolerance).
    patches, h_out, w_out = extract_patches_nchw(x, KERNEL_SIZE, STRIDE, DILATION, PADDING)
    xp = patches.reshape(KK, -1).T
    ref = kan_linear_ref(xp, grid_knots, base_w, scaled_sw).reshape(B, C, h_out, w_out)
    assert out.shape == (B, C, h_out, w_out)
    np.testing.assert_allclose(np.asarray(out), np.asarray(ref), rtol=2e-5, atol=2e-5)

    print("KERNEL_OK")
</pallas_src>

<mosaic_0001>
module attributes {stable_mosaic.version = 11 : i64} {
  func.func @kan_conv_kernel(%arg0: i32, %arg1: memref<4xf32, #tpu.memory_space<smem>>, %arg2: memref<32xf32, #tpu.memory_space<smem>>, %arg3: memref<32x256xf32, #tpu.memory_space<vmem>>, %arg4: memref<8x256xf32, #tpu.memory_space<vmem>>) attributes {dimension_semantics = [#tpu.dimension_semantics<parallel>], iteration_bounds = array<i64: 1>, scalar_prefetch = 2 : i64, scratch_operands = 0 : i64, tpu.core_type = #tpu.core_type<tc>, window_params = [{transform_indices = @transform_0, window_bounds = array<i64: 32, 256>}, {transform_indices = @transform_1, window_bounds = array<i64: 8, 256>}]} {
    %c0 = arith.constant 0 : index
    %0 = memref.load %arg1[%c0] : memref<4xf32, #tpu.memory_space<smem>>
    %c1 = arith.constant 1 : index
    %1 = memref.load %arg1[%c1] : memref<4xf32, #tpu.memory_space<smem>>
    %c2 = arith.constant 2 : index
    %2 = memref.load %arg1[%c2] : memref<4xf32, #tpu.memory_space<smem>>
    %c3 = arith.constant 3 : index
    %3 = memref.load %arg1[%c3] : memref<4xf32, #tpu.memory_space<smem>>
    %c0_0 = arith.constant 0 : index
    %4 = memref.load %arg2[%c0_0] : memref<32xf32, #tpu.memory_space<smem>>
    %c1_1 = arith.constant 1 : index
    %5 = memref.load %arg2[%c1_1] : memref<32xf32, #tpu.memory_space<smem>>
    %c2_2 = arith.constant 2 : index
    %6 = memref.load %arg2[%c2_2] : memref<32xf32, #tpu.memory_space<smem>>
    %c3_3 = arith.constant 3 : index
    %7 = memref.load %arg2[%c3_3] : memref<32xf32, #tpu.memory_space<smem>>
    %c4 = arith.constant 4 : index
    %8 = memref.load %arg2[%c4] : memref<32xf32, #tpu.memory_space<smem>>
    %c5 = arith.constant 5 : index
    %9 = memref.load %arg2[%c5] : memref<32xf32, #tpu.memory_space<smem>>
    %c6 = arith.constant 6 : index
    %10 = memref.load %arg2[%c6] : memref<32xf32, #tpu.memory_space<smem>>
    %c7 = arith.constant 7 : index
    %11 = memref.load %arg2[%c7] : memref<32xf32, #tpu.memory_space<smem>>
    %c8 = arith.constant 8 : index
    %12 = memref.load %arg2[%c8] : memref<32xf32, #tpu.memory_space<smem>>
    %c9 = arith.constant 9 : index
    %13 = memref.load %arg2[%c9] : memref<32xf32, #tpu.memory_space<smem>>
    %c10 = arith.constant 10 : index
    %14 = memref.load %arg2[%c10] : memref<32xf32, #tpu.memory_space<smem>>
    %c11 = arith.constant 11 : index
    %15 = memref.load %arg2[%c11] : memref<32xf32, #tpu.memory_space<smem>>
    %c12 = arith.constant 12 : index
    %16 = memref.load %arg2[%c12] : memref<32xf32, #tpu.memory_space<smem>>
    %c13 = arith.constant 13 : index
    %17 = memref.load %arg2[%c13] : memref<32xf32, #tpu.memory_space<smem>>
    %c14 = arith.constant 14 : index
    %18 = memref.load %arg2[%c14] : memref<32xf32, #tpu.memory_space<smem>>
    %c15 = arith.constant 15 : index
    %19 = memref.load %arg2[%c15] : memref<32xf32, #tpu.memory_space<smem>>
    %c16 = arith.constant 16 : index
    %20 = memref.load %arg2[%c16] : memref<32xf32, #tpu.memory_space<smem>>
    %c17 = arith.constant 17 : index
    %21 = memref.load %arg2[%c17] : memref<32xf32, #tpu.memory_space<smem>>
    %c18 = arith.constant 18 : index
    %22 = memref.load %arg2[%c18] : memref<32xf32, #tpu.memory_space<smem>>
    %c19 = arith.constant 19 : index
    %23 = memref.load %arg2[%c19] : memref<32xf32, #tpu.memory_space<smem>>
    %c20 = arith.constant 20 : index
    %24 = memref.load %arg2[%c20] : memref<32xf32, #tpu.memory_space<smem>>
    %c21 = arith.constant 21 : index
    %25 = memref.load %arg2[%c21] : memref<32xf32, #tpu.memory_space<smem>>
    %c22 = arith.constant 22 : index
    %26 = memref.load %arg2[%c22] : memref<32xf32, #tpu.memory_space<smem>>
    %c23 = arith.constant 23 : index
    %27 = memref.load %arg2[%c23] : memref<32xf32, #tpu.memory_space<smem>>
    %c24 = arith.constant 24 : index
    %28 = memref.load %arg2[%c24] : memref<32xf32, #tpu.memory_space<smem>>
    %c25 = arith.constant 25 : index
    %29 = memref.load %arg2[%c25] : memref<32xf32, #tpu.memory_space<smem>>
    %c26 = arith.constant 26 : index
    %30 = memref.load %arg2[%c26] : memref<32xf32, #tpu.memory_space<smem>>
    %c27 = arith.constant 27 : index
    %31 = memref.load %arg2[%c27] : memref<32xf32, #tpu.memory_space<smem>>
    %c28 = arith.constant 28 : index
    %32 = memref.load %arg2[%c28] : memref<32xf32, #tpu.memory_space<smem>>
    %c29 = arith.constant 29 : index
    %33 = memref.load %arg2[%c29] : memref<32xf32, #tpu.memory_space<smem>>
    %c30 = arith.constant 30 : index
    %34 = memref.load %arg2[%c30] : memref<32xf32, #tpu.memory_space<smem>>
    %c31 = arith.constant 31 : index
    %35 = memref.load %arg2[%c31] : memref<32xf32, #tpu.memory_space<smem>>
    %c0_i32 = arith.constant 0 : i32
    %c256_i32 = arith.constant 256 : i32
    %36 = arith.muli %c0_i32, %c256_i32 : i32
    %37 = tpu.assume_multiple %36, 256 : i32
    %cst = arith.constant 0.000000e+00 : f32
    %38 = vector.broadcast %cst : f32 to vector<8x256xf32>
    %c0_4 = arith.constant 0 : index
    %39 = arith.index_cast %37 : i32 to index
    %40 = vector.load %arg3[%c0_4, %39] : memref<32x256xf32, #tpu.memory_space<vmem>>, vector<8x256xf32>
    %cst_5 = arith.constant 5.000000e-01 : f32
    %41 = vector.broadcast %cst_5 : f32 to vector<8x256xf32>
    %42 = arith.mulf %41, %40 : vector<8x256xf32>
    %43 = math.tanh %42 : vector<8x256xf32>
    %cst_6 = arith.constant 5.000000e-01 : f32
    %44 = vector.broadcast %cst_6 : f32 to vector<8x256xf32>
    %45 = arith.mulf %44, %43 : vector<8x256xf32>
    %cst_7 = arith.constant 5.000000e-01 : f32
    %46 = vector.broadcast %cst_7 : f32 to vector<8x256xf32>
    %47 = arith.addf %45, %46 : vector<8x256xf32>
    %48 = arith.mulf %40, %47 : vector<8x256xf32>
    %49 = vector.broadcast %0 : f32 to vector<8x256xf32>
    %50 = arith.mulf %49, %48 : vector<8x256xf32>
    %51 = arith.addf %38, %50 : vector<8x256xf32>
    %cst_8 = arith.constant -2.200000e+00 : f32
    %52 = vector.broadcast %cst_8 : f32 to vector<8x256xf32>
    %53 = arith.cmpf oge, %40, %52 : vector<8x256xf32>
    %cst_9 = arith.constant -1.800000e+00 : f32
    %54 = vector.broadcast %cst_9 : f32 to vector<8x256xf32>
    %55 = arith.cmpf oge, %40, %54 : vector<8x256xf32>
    %cst_10 = arith.constant -1.400000e+00 : f32
    %56 = vector.broadcast %cst_10 : f32 to vector<8x256xf32>
    %57 = arith.cmpf oge, %40, %56 : vector<8x256xf32>
    %cst_11 = arith.constant -1.000000e+00 : f32
    %58 = vector.broadcast %cst_11 : f32 to vector<8x256xf32>
    %59 = arith.cmpf oge, %40, %58 : vector<8x256xf32>
    %cst_12 = arith.constant -6.000000e-01 : f32
    %60 = vector.broadcast %cst_12 : f32 to vector<8x256xf32>
    %61 = arith.cmpf oge, %40, %60 : vector<8x256xf32>
    %cst_13 = arith.constant -0.199999988 : f32
    %62 = vector.broadcast %cst_13 : f32 to vector<8x256xf32>
    %63 = arith.cmpf oge, %40, %62 : vector<8x256xf32>
    %cst_14 = arith.constant 0.200000048 : f32
    %64 = vector.broadcast %cst_14 : f32 to vector<8x256xf32>
    %65 = arith.cmpf oge, %40, %64 : vector<8x256xf32>
    %cst_15 = arith.constant 6.000000e-01 : f32
    %66 = vector.broadcast %cst_15 : f32 to vector<8x256xf32>
    %67 = arith.cmpf oge, %40, %66 : vector<8x256xf32>
    %cst_16 = arith.constant 1.000000e+00 : f32
    %68 = vector.broadcast %cst_16 : f32 to vector<8x256xf32>
    %69 = arith.cmpf oge, %40, %68 : vector<8x256xf32>
    %cst_17 = arith.constant 1.4000001 : f32
    %70 = vector.broadcast %cst_17 : f32 to vector<8x256xf32>
    %71 = arith.cmpf oge, %40, %70 : vector<8x256xf32>
    %cst_18 = arith.constant 1.800000e+00 : f32
    %72 = vector.broadcast %cst_18 : f32 to vector<8x256xf32>
    %73 = arith.cmpf oge, %40, %72 : vector<8x256xf32>
    %cst_19 = arith.constant 2.200000e+00 : f32
    %74 = vector.broadcast %cst_19 : f32 to vector<8x256xf32>
    %75 = arith.cmpf oge, %40, %74 : vector<8x256xf32>
    %cst_20 = arith.constant dense<true> : vector<8x256xi1>
    %76 = arith.xori %55, %cst_20 : vector<8x256xi1>
    %77 = arith.andi %53, %76 : vector<8x256xi1>
    %78 = arith.extui %77 : vector<8x256xi1> to vector<8x256xi32>
    %79 = arith.sitofp %78 : vector<8x256xi32> to vector<8x256xf32>
    %cst_21 = arith.constant dense<true> : vector<8x256xi1>
    %80 = arith.xori %57, %cst_21 : vector<8x256xi1>
    %81 = arith.andi %55, %80 : vector<8x256xi1>
    %82 = arith.extui %81 : vector<8x256xi1> to vector<8x256xi32>
    %83 = arith.sitofp %82 : vector<8x256xi32> to vector<8x256xf32>
    %cst_22 = arith.constant dense<true> : vector<8x256xi1>
    %84 = arith.xori %59, %cst_22 : vector<8x256xi1>
    %85 = arith.andi %57, %84 : vector<8x256xi1>
    %86 = arith.extui %85 : vector<8x256xi1> to vector<8x256xi32>
    %87 = arith.sitofp %86 : vector<8x256xi32> to vector<8x256xf32>
    %cst_23 = arith.constant dense<true> : vector<8x256xi1>
    %88 = arith.xori %61, %cst_23 : vector<8x256xi1>
    %89 = arith.andi %59, %88 : vector<8x256xi1>
    %90 = arith.extui %89 : vector<8x256xi1> to vector<8x256xi32>
    %91 = arith.sitofp %90 : vector<8x256xi32> to vector<8x256xf32>
    %cst_24 = arith.constant dense<true> : vector<8x256xi1>
    %92 = arith.xori %63, %cst_24 : vector<8x256xi1>
    %93 = arith.andi %61, %92 : vector<8x256xi1>
    %94 = arith.extui %93 : vector<8x256xi1> to vector<8x256xi32>
    %95 = arith.sitofp %94 : vector<8x256xi32> to vector<8x256xf32>
    %cst_25 = arith.constant dense<true> : vector<8x256xi1>
    %96 = arith.xori %65, %cst_25 : vector<8x256xi1>
    %97 = arith.andi %63, %96 : vector<8x256xi1>
    %98 = arith.extui %97 : vector<8x256xi1> to vector<8x256xi32>
    %99 = arith.sitofp %98 : vector<8x256xi32> to vector<8x256xf32>
    %cst_26 = arith.constant dense<true> : vector<8x256xi1>
    %100 = arith.xori %67, %cst_26 : vector<8x256xi1>
    %101 = arith.andi %65, %100 : vector<8x256xi1>
    %102 = arith.extui %101 : vector<8x256xi1> to vector<8x256xi32>
    %103 = arith.sitofp %102 : vector<8x256xi32> to vector<8x256xf32>
    %cst_27 = arith.constant dense<true> : vector<8x256xi1>
    %104 = arith.xori %69, %cst_27 : vector<8x256xi1>
    %105 = arith.andi %67, %104 : vector<8x256xi1>
    %106 = arith.extui %105 : vector<8x256xi1> to vector<8x256xi32>
    %107 = arith.sitofp %106 : vector<8x256xi32> to vector<8x256xf32>
    %cst_28 = arith.constant dense<true> : vector<8x256xi1>
    %108 = arith.xori %71, %cst_28 : vector<8x256xi1>
    %109 = arith.andi %69, %108 : vector<8x256xi1>
    %110 = arith.extui %109 : vector<8x256xi1> to vector<8x256xi32>
    %111 = arith.sitofp %110 : vector<8x256xi32> to vector<8x256xf32>
    %cst_29 = arith.constant dense<true> : vector<8x256xi1>
    %112 = arith.xori %73, %cst_29 : vector<8x256xi1>
    %113 = arith.andi %71, %112 : vector<8x256xi1>
    %114 = arith.extui %113 : vector<8x256xi1> to vector<8x256xi32>
    %115 = arith.sitofp %114 : vector<8x256xi32> to vector<8x256xf32>
    %cst_30 = arith.constant dense<true> : vector<8x256xi1>
    %116 = arith.xori %75, %cst_30 : vector<8x256xi1>
    %117 = arith.andi %73, %116 : vector<8x256xi1>
    %118 = arith.extui %117 : vector<8x256xi1> to vector<8x256xi32>
    %119 = arith.sitofp %118 : vector<8x256xi32> to vector<8x256xf32>
    %cst_31 = arith.constant 2.500000e+00 : f32
    %120 = vector.broadcast %cst_31 : f32 to vector<8x256xf32>
    %121 = arith.mulf %40, %120 : vector<8x256xf32>
    %cst_32 = arith.constant -5.500000e+00 : f32
    %122 = vector.broadcast %cst_32 : f32 to vector<8x256xf32>
    %123 = arith.subf %121, %122 : vector<8x256xf32>
    %124 = arith.mulf %123, %79 : vector<8x256xf32>
    %cst_33 = arith.constant -3.500000e+00 : f32
    %125 = vector.broadcast %cst_33 : f32 to vector<8x256xf32>
    %126 = arith.subf %125, %121 : vector<8x256xf32>
    %127 = arith.mulf %126, %83 : vector<8x256xf32>
    %128 = arith.addf %124, %127 : vector<8x256xf32>
    %cst_34 = arith.constant -4.500000e+00 : f32
    %129 = vector.broadcast %cst_34 : f32 to vector<8x256xf32>
    %130 = arith.subf %121, %129 : vector<8x256xf32>
    %131 = arith.mulf %130, %83 : vector<8x256xf32>
    %cst_35 = arith.constant -2.500000e+00 : f32
    %132 = vector.broadcast %cst_35 : f32 to vector<8x256xf32>
    %133 = arith.subf %132, %121 : vector<8x256xf32>
    %134 = arith.mulf %133, %87 : vector<8x256xf32>
    %135 = arith.addf %131, %134 : vector<8x256xf32>
    %cst_36 = arith.constant -3.500000e+00 : f32
    %136 = vector.broadcast %cst_36 : f32 to vector<8x256xf32>
    %137 = arith.subf %121, %136 : vector<8x256xf32>
    %138 = arith.mulf %137, %87 : vector<8x256xf32>
    %cst_37 = arith.constant -1.500000e+00 : f32
    %139 = vector.broadcast %cst_37 : f32 to vector<8x256xf32>
    %140 = arith.subf %139, %121 : vector<8x256xf32>
    %141 = arith.mulf %140, %91 : vector<8x256xf32>
    %142 = arith.addf %138, %141 : vector<8x256xf32>
    %cst_38 = arith.constant -2.500000e+00 : f32
    %143 = vector.broadcast %cst_38 : f32 to vector<8x256xf32>
    %144 = arith.subf %121, %143 : vector<8x256xf32>
    %145 = arith.mulf %144, %91 : vector<8x256xf32>
    %cst_39 = arith.constant -0.49999997 : f32
    %146 = vector.broadcast %cst_39 : f32 to vector<8x256xf32>
    %147 = arith.subf %146, %121 : vector<8x256xf32>
    %148 = arith.mulf %147, %95 : vector<8x256xf32>
    %149 = arith.addf %145, %148 : vector<8x256xf32>
    %cst_40 = arith.constant -1.500000e+00 : f32
    %150 = vector.broadcast %cst_40 : f32 to vector<8x256xf32>
    %151 = arith.subf %121, %150 : vector<8x256xf32>
    %152 = arith.mulf %151, %95 : vector<8x256xf32>
    %cst_41 = arith.constant 0.500000119 : f32
    %153 = vector.broadcast %cst_41 : f32 to vector<8x256xf32>
    %154 = arith.subf %153, %121 : vector<8x256xf32>
    %155 = arith.mulf %154, %99 : vector<8x256xf32>
    %156 = arith.addf %152, %155 : vector<8x256xf32>
    %cst_42 = arith.constant -0.49999997 : f32
    %157 = vector.broadcast %cst_42 : f32 to vector<8x256xf32>
    %158 = arith.subf %121, %157 : vector<8x256xf32>
    %159 = arith.mulf %158, %99 : vector<8x256xf32>
    %cst_43 = arith.constant 1.500000e+00 : f32
    %160 = vector.broadcast %cst_43 : f32 to vector<8x256xf32>
    %161 = arith.subf %160, %121 : vector<8x256xf32>
    %162 = arith.mulf %161, %103 : vector<8x256xf32>
    %163 = arith.addf %159, %162 : vector<8x256xf32>
    %cst_44 = arith.constant 0.500000119 : f32
    %164 = vector.broadcast %cst_44 : f32 to vector<8x256xf32>
    %165 = arith.subf %121, %164 : vector<8x256xf32>
    %166 = arith.mulf %165, %103 : vector<8x256xf32>
    %cst_45 = arith.constant 2.500000e+00 : f32
    %167 = vector.broadcast %cst_45 : f32 to vector<8x256xf32>
    %168 = arith.subf %167, %121 : vector<8x256xf32>
    %169 = arith.mulf %168, %107 : vector<8x256xf32>
    %170 = arith.addf %166, %169 : vector<8x256xf32>
    %cst_46 = arith.constant 1.500000e+00 : f32
    %171 = vector.broadcast %cst_46 : f32 to vector<8x256xf32>
    %172 = arith.subf %121, %171 : vector<8x256xf32>
    %173 = arith.mulf %172, %107 : vector<8x256xf32>
    %cst_47 = arith.constant 3.50000024 : f32
    %174 = vector.broadcast %cst_47 : f32 to vector<8x256xf32>
    %175 = arith.subf %174, %121 : vector<8x256xf32>
    %176 = arith.mulf %175, %111 : vector<8x256xf32>
    %177 = arith.addf %173, %176 : vector<8x256xf32>
    %cst_48 = arith.constant 2.500000e+00 : f32
    %178 = vector.broadcast %cst_48 : f32 to vector<8x256xf32>
    %179 = arith.subf %121, %178 : vector<8x256xf32>
    %180 = arith.mulf %179, %111 : vector<8x256xf32>
    %cst_49 = arith.constant 4.500000e+00 : f32
    %181 = vector.broadcast %cst_49 : f32 to vector<8x256xf32>
    %182 = arith.subf %181, %121 : vector<8x256xf32>
    %183 = arith.mulf %182, %115 : vector<8x256xf32>
    %184 = arith.addf %180, %183 : vector<8x256xf32>
    %cst_50 = arith.constant 3.50000024 : f32
    %185 = vector.broadcast %cst_50 : f32 to vector<8x256xf32>
    %186 = arith.subf %121, %185 : vector<8x256xf32>
    %187 = arith.mulf %186, %115 : vector<8x256xf32>
    %cst_51 = arith.constant 5.500000e+00 : f32
    %188 = vector.broadcast %cst_51 : f32 to vector<8x256xf32>
    %189 = arith.subf %188, %121 : vector<8x256xf32>
    %190 = arith.mulf %189, %119 : vector<8x256xf32>
    %191 = arith.addf %187, %190 : vector<8x256xf32>
    %cst_52 = arith.constant 1.250000e+00 : f32
    %192 = vector.broadcast %cst_52 : f32 to vector<8x256xf32>
    %193 = arith.mulf %40, %192 : vector<8x256xf32>
    %cst_53 = arith.constant -2.750000e+00 : f32
    %194 = vector.broadcast %cst_53 : f32 to vector<8x256xf32>
    %195 = arith.subf %193, %194 : vector<8x256xf32>
    %196 = arith.mulf %195, %128 : vector<8x256xf32>
    %cst_54 = arith.constant -1.250000e+00 : f32
    %197 = vector.broadcast %cst_54 : f32 to vector<8x256xf32>
    %198 = arith.subf %197, %193 : vector<8x256xf32>
    %199 = arith.mulf %198, %135 : vector<8x256xf32>
    %200 = arith.addf %196, %199 : vector<8x256xf32>
    %cst_55 = arith.constant -2.250000e+00 : f32
    %201 = vector.broadcast %cst_55 : f32 to vector<8x256xf32>
    %202 = arith.subf %193, %201 : vector<8x256xf32>
    %203 = arith.mulf %202, %135 : vector<8x256xf32>
    %cst_56 = arith.constant -7.500000e-01 : f32
    %204 = vector.broadcast %cst_56 : f32 to vector<8x256xf32>
    %205 = arith.subf %204, %193 : vector<8x256xf32>
    %206 = arith.mulf %205, %142 : vector<8x256xf32>
    %207 = arith.addf %203, %206 : vector<8x256xf32>
    %cst_57 = arith.constant -1.750000e+00 : f32
    %208 = vector.broadcast %cst_57 : f32 to vector<8x256xf32>
    %209 = arith.subf %193, %208 : vector<8x256xf32>
    %210 = arith.mulf %209, %142 : vector<8x256xf32>
    %cst_58 = arith.constant -0.249999985 : f32
    %211 = vector.broadcast %cst_58 : f32 to vector<8x256xf32>
    %212 = arith.subf %211, %193 : vector<8x256xf32>
    %213 = arith.mulf %212, %149 : vector<8x256xf32>
    %214 = arith.addf %210, %213 : vector<8x256xf32>
    %cst_59 = arith.constant -1.250000e+00 : f32
    %215 = vector.broadcast %cst_59 : f32 to vector<8x256xf32>
    %216 = arith.subf %193, %215 : vector<8x256xf32>
    %217 = arith.mulf %216, %149 : vector<8x256xf32>
    %cst_60 = arith.constant 0.25000006 : f32
    %218 = vector.broadcast %cst_60 : f32 to vector<8x256xf32>
    %219 = arith.subf %218, %193 : vector<8x256xf32>
    %220 = arith.mulf %219, %156 : vector<8x256xf32>
    %221 = arith.addf %217, %220 : vector<8x256xf32>
    %cst_61 = arith.constant -7.500000e-01 : f32
    %222 = vector.broadcast %cst_61 : f32 to vector<8x256xf32>
    %223 = arith.subf %193, %222 : vector<8x256xf32>
    %224 = arith.mulf %223, %156 : vector<8x256xf32>
    %cst_62 = arith.constant 7.500000e-01 : f32
    %225 = vector.broadcast %cst_62 : f32 to vector<8x256xf32>
    %226 = arith.subf %225, %193 : vector<8x256xf32>
    %227 = arith.mulf %226, %163 : vector<8x256xf32>
    %228 = arith.addf %224, %227 : vector<8x256xf32>
    %cst_63 = arith.constant -0.249999985 : f32
    %229 = vector.broadcast %cst_63 : f32 to vector<8x256xf32>
    %230 = arith.subf %193, %229 : vector<8x256xf32>
    %231 = arith.mulf %230, %163 : vector<8x256xf32>
    %cst_64 = arith.constant 1.250000e+00 : f32
    %232 = vector.broadcast %cst_64 : f32 to vector<8x256xf32>
    %233 = arith.subf %232, %193 : vector<8x256xf32>
    %234 = arith.mulf %233, %170 : vector<8x256xf32>
    %235 = arith.addf %231, %234 : vector<8x256xf32>
    %cst_65 = arith.constant 0.25000006 : f32
    %236 = vector.broadcast %cst_65 : f32 to vector<8x256xf32>
    %237 = arith.subf %193, %236 : vector<8x256xf32>
    %238 = arith.mulf %237, %170 : vector<8x256xf32>
    %cst_66 = arith.constant 1.75000012 : f32
    %239 = vector.broadcast %cst_66 : f32 to vector<8x256xf32>
    %240 = arith.subf %239, %193 : vector<8x256xf32>
    %241 = arith.mulf %240, %177 : vector<8x256xf32>
    %242 = arith.addf %238, %241 : vector<8x256xf32>
    %cst_67 = arith.constant 7.500000e-01 : f32
    %243 = vector.broadcast %cst_67 : f32 to vector<8x256xf32>
    %244 = arith.subf %193, %243 : vector<8x256xf32>
    %245 = arith.mulf %244, %177 : vector<8x256xf32>
    %cst_68 = arith.constant 2.250000e+00 : f32
    %246 = vector.broadcast %cst_68 : f32 to vector<8x256xf32>
    %247 = arith.subf %246, %193 : vector<8x256xf32>
    %248 = arith.mulf %247, %184 : vector<8x256xf32>
    %249 = arith.addf %245, %248 : vector<8x256xf32>
    %cst_69 = arith.constant 1.250000e+00 : f32
    %250 = vector.broadcast %cst_69 : f32 to vector<8x256xf32>
    %251 = arith.subf %193, %250 : vector<8x256xf32>
    %252 = arith.mulf %251, %184 : vector<8x256xf32>
    %cst_70 = arith.constant 2.750000e+00 : f32
    %253 = vector.broadcast %cst_70 : f32 to vector<8x256xf32>
    %254 = arith.subf %253, %193 : vector<8x256xf32>
    %255 = arith.mulf %254, %191 : vector<8x256xf32>
    %256 = arith.addf %252, %255 : vector<8x256xf32>
    %cst_71 = arith.constant 0.833333313 : f32
    %257 = vector.broadcast %cst_71 : f32 to vector<8x256xf32>
    %258 = arith.mulf %40, %257 : vector<8x256xf32>
    %cst_72 = arith.constant -1.83333337 : f32
    %259 = vector.broadcast %cst_72 : f32 to vector<8x256xf32>
    %260 = arith.subf %258, %259 : vector<8x256xf32>
    %261 = arith.mulf %260, %200 : vector<8x256xf32>
    %cst_73 = arith.constant -5.000000e-01 : f32
    %262 = vector.broadcast %cst_73 : f32 to vector<8x256xf32>
    %263 = arith.subf %262, %258 : vector<8x256xf32>
    %264 = arith.mulf %263, %207 : vector<8x256xf32>
    %265 = arith.addf %261, %264 : vector<8x256xf32>
    %266 = vector.broadcast %4 : f32 to vector<8x256xf32>
    %267 = arith.mulf %266, %265 : vector<8x256xf32>
    %268 = arith.addf %51, %267 : vector<8x256xf32>
    %cst_74 = arith.constant -1.500000e+00 : f32
    %269 = vector.broadcast %cst_74 : f32 to vector<8x256xf32>
    %270 = arith.subf %258, %269 : vector<8x256xf32>
    %271 = arith.mulf %270, %207 : vector<8x256xf32>
    %cst_75 = arith.constant -0.166666657 : f32
    %272 = vector.broadcast %cst_75 : f32 to vector<8x256xf32>
    %273 = arith.subf %272, %258 : vector<8x256xf32>
    %274 = arith.mulf %273, %214 : vector<8x256xf32>
    %275 = arith.addf %271, %274 : vector<8x256xf32>
    %276 = vector.broadcast %5 : f32 to vector<8x256xf32>
    %277 = arith.mulf %276, %275 : vector<8x256xf32>
    %278 = arith.addf %268, %277 : vector<8x256xf32>
    %cst_76 = arith.constant -1.16666663 : f32
    %279 = vector.broadcast %cst_76 : f32 to vector<8x256xf32>
    %280 = arith.subf %258, %279 : vector<8x256xf32>
    %281 = arith.mulf %280, %214 : vector<8x256xf32>
    %cst_77 = arith.constant 0.166666701 : f32
    %282 = vector.broadcast %cst_77 : f32 to vector<8x256xf32>
    %283 = arith.subf %282, %258 : vector<8x256xf32>
    %284 = arith.mulf %283, %221 : vector<8x256xf32>
    %285 = arith.addf %281, %284 : vector<8x256xf32>
    %286 = vector.broadcast %6 : f32 to vector<8x256xf32>
    %287 = arith.mulf %286, %285 : vector<8x256xf32>
    %288 = arith.addf %278, %287 : vector<8x256xf32>
    %cst_78 = arith.constant -0.833333313 : f32
    %289 = vector.broadcast %cst_78 : f32 to vector<8x256xf32>
    %290 = arith.subf %258, %289 : vector<8x256xf32>
    %291 = arith.mulf %290, %221 : vector<8x256xf32>
    %cst_79 = arith.constant 5.000000e-01 : f32
    %292 = vector.broadcast %cst_79 : f32 to vector<8x256xf32>
    %293 = arith.subf %292, %258 : vector<8x256xf32>
    %294 = arith.mulf %293, %228 : vector<8x256xf32>
    %295 = arith.addf %291, %294 : vector<8x256xf32>
    %296 = vector.broadcast %7 : f32 to vector<8x256xf32>
    %297 = arith.mulf %296, %295 : vector<8x256xf32>
    %298 = arith.addf %288, %297 : vector<8x256xf32>
    %cst_80 = arith.constant -5.000000e-01 : f32
    %299 = vector.broadcast %cst_80 : f32 to vector<8x256xf32>
    %300 = arith.subf %258, %299 : vector<8x256xf32>
    %301 = arith.mulf %300, %228 : vector<8x256xf32>
    %cst_81 = arith.constant 0.833333313 : f32
    %302 = vector.broadcast %cst_81 : f32 to vector<8x256xf32>
    %303 = arith.subf %302, %258 : vector<8x256xf32>
    %304 = arith.mulf %303, %235 : vector<8x256xf32>
    %305 = arith.addf %301, %304 : vector<8x256xf32>
    %306 = vector.broadcast %8 : f32 to vector<8x256xf32>
    %307 = arith.mulf %306, %305 : vector<8x256xf32>
    %308 = arith.addf %298, %307 : vector<8x256xf32>
    %cst_82 = arith.constant -0.166666657 : f32
    %309 = vector.broadcast %cst_82 : f32 to vector<8x256xf32>
    %310 = arith.subf %258, %309 : vector<8x256xf32>
    %311 = arith.mulf %310, %235 : vector<8x256xf32>
    %cst_83 = arith.constant 1.16666675 : f32
    %312 = vector.broadcast %cst_83 : f32 to vector<8x256xf32>
    %313 = arith.subf %312, %258 : vector<8x256xf32>
    %314 = arith.mulf %313, %242 : vector<8x256xf32>
    %315 = arith.addf %311, %314 : vector<8x256xf32>
    %316 = vector.broadcast %9 : f32 to vector<8x256xf32>
    %317 = arith.mulf %316, %315 : vector<8x256xf32>
    %318 = arith.addf %308, %317 : vector<8x256xf32>
    %cst_84 = arith.constant 0.166666701 : f32
    %319 = vector.broadcast %cst_84 : f32 to vector<8x256xf32>
    %320 = arith.subf %258, %319 : vector<8x256xf32>
    %321 = arith.mulf %320, %242 : vector<8x256xf32>
    %cst_85 = arith.constant 1.500000e+00 : f32
    %322 = vector.broadcast %cst_85 : f32 to vector<8x256xf32>
    %323 = arith.subf %322, %258 : vector<8x256xf32>
    %324 = arith.mulf %323, %249 : vector<8x256xf32>
    %325 = arith.addf %321, %324 : vector<8x256xf32>
    %326 = vector.broadcast %10 : f32 to vector<8x256xf32>
    %327 = arith.mulf %326, %325 : vector<8x256xf32>
    %328 = arith.addf %318, %327 : vector<8x256xf32>
    %cst_86 = arith.constant 5.000000e-01 : f32
    %329 = vector.broadcast %cst_86 : f32 to vector<8x256xf32>
    %330 = arith.subf %258, %329 : vector<8x256xf32>
    %331 = arith.mulf %330, %249 : vector<8x256xf32>
    %cst_87 = arith.constant 1.83333337 : f32
    %332 = vector.broadcast %cst_87 : f32 to vector<8x256xf32>
    %333 = arith.subf %332, %258 : vector<8x256xf32>
    %334 = arith.mulf %333, %256 : vector<8x256xf32>
    %335 = arith.addf %331, %334 : vector<8x256xf32>
    %336 = vector.broadcast %11 : f32 to vector<8x256xf32>
    %337 = arith.mulf %336, %335 : vector<8x256xf32>
    %338 = arith.addf %328, %337 : vector<8x256xf32>
    %c8_88 = arith.constant 8 : index
    %339 = arith.index_cast %37 : i32 to index
    %340 = vector.load %arg3[%c8_88, %339] : memref<32x256xf32, #tpu.memory_space<vmem>>, vector<8x256xf32>
    %cst_89 = arith.constant 5.000000e-01 : f32
    %341 = vector.broadcast %cst_89 : f32 to vector<8x256xf32>
    %342 = arith.mulf %341, %340 : vector<8x256xf32>
    %343 = math.tanh %342 : vector<8x256xf32>
    %cst_90 = arith.constant 5.000000e-01 : f32
    %344 = vector.broadcast %cst_90 : f32 to vector<8x256xf32>
    %345 = arith.mulf %344, %343 : vector<8x256xf32>
    %cst_91 = arith.constant 5.000000e-01 : f32
    %346 = vector.broadcast %cst_91 : f32 to vector<8x256xf32>
    %347 = arith.addf %345, %346 : vector<8x256xf32>
    %348 = arith.mulf %340, %347 : vector<8x256xf32>
    %349 = vector.broadcast %1 : f32 to vector<8x256xf32>
    %350 = arith.mulf %349, %348 : vector<8x256xf32>
    %351 = arith.addf %338, %350 : vector<8x256xf32>
    %cst_92 = arith.constant -2.200000e+00 : f32
    %352 = vector.broadcast %cst_92 : f32 to vector<8x256xf32>
    %353 = arith.cmpf oge, %340, %352 : vector<8x256xf32>
    %cst_93 = arith.constant -1.800000e+00 : f32
    %354 = vector.broadcast %cst_93 : f32 to vector<8x256xf32>
    %355 = arith.cmpf oge, %340, %354 : vector<8x256xf32>
    %cst_94 = arith.constant -1.400000e+00 : f32
    %356 = vector.broadcast %cst_94 : f32 to vector<8x256xf32>
    %357 = arith.cmpf oge, %340, %356 : vector<8x256xf32>
    %cst_95 = arith.constant -1.000000e+00 : f32
    %358 = vector.broadcast %cst_95 : f32 to vector<8x256xf32>
    %359 = arith.cmpf oge, %340, %358 : vector<8x256xf32>
    %cst_96 = arith.constant -6.000000e-01 : f32
    %360 = vector.broadcast %cst_96 : f32 to vector<8x256xf32>
    %361 = arith.cmpf oge, %340, %360 : vector<8x256xf32>
    %cst_97 = arith.constant -0.199999988 : f32
    %362 = vector.broadcast %cst_97 : f32 to vector<8x256xf32>
    %363 = arith.cmpf oge, %340, %362 : vector<8x256xf32>
    %cst_98 = arith.constant 0.200000048 : f32
    %364 = vector.broadcast %cst_98 : f32 to vector<8x256xf32>
    %365 = arith.cmpf oge, %340, %364 : vector<8x256xf32>
    %cst_99 = arith.constant 6.000000e-01 : f32
    %366 = vector.broadcast %cst_99 : f32 to vector<8x256xf32>
    %367 = arith.cmpf oge, %340, %366 : vector<8x256xf32>
    %cst_100 = arith.constant 1.000000e+00 : f32
    %368 = vector.broadcast %cst_100 : f32 to vector<8x256xf32>
    %369 = arith.cmpf oge, %340, %368 : vector<8x256xf32>
    %cst_101 = arith.constant 1.4000001 : f32
    %370 = vector.broadcast %cst_101 : f32 to vector<8x256xf32>
    %371 = arith.cmpf oge, %340, %370 : vector<8x256xf32>
    %cst_102 = arith.constant 1.800000e+00 : f32
    %372 = vector.broadcast %cst_102 : f32 to vector<8x256xf32>
    %373 = arith.cmpf oge, %340, %372 : vector<8x256xf32>
    %cst_103 = arith.constant 2.200000e+00 : f32
    %374 = vector.broadcast %cst_103 : f32 to vector<8x256xf32>
    %375 = arith.cmpf oge, %340, %374 : vector<8x256xf32>
    %cst_104 = arith.constant dense<true> : vector<8x256xi1>
    %376 = arith.xori %355, %cst_104 : vector<8x256xi1>
    %377 = arith.andi %353, %376 : vector<8x256xi1>
    %378 = arith.extui %377 : vector<8x256xi1> to vector<8x256xi32>
    %379 = arith.sitofp %378 : vector<8x256xi32> to vector<8x256xf32>
    %cst_105 = arith.constant dense<true> : vector<8x256xi1>
    %380 = arith.xori %357, %cst_105 : vector<8x256xi1>
    %381 = arith.andi %355, %380 : vector<8x256xi1>
    %382 = arith.extui %381 : vector<8x256xi1> to vector<8x256xi32>
    %383 = arith.sitofp %382 : vector<8x256xi32> to vector<8x256xf32>
    %cst_106 = arith.constant dense<true> : vector<8x256xi1>
    %384 = arith.xori %359, %cst_106 : vector<8x256xi1>
    %385 = arith.andi %357, %384 : vector<8x256xi1>
    %386 = arith.extui %385 : vector<8x256xi1> to vector<8x256xi32>
    %387 = arith.sitofp %386 : vector<8x256xi32> to vector<8x256xf32>
    %cst_107 = arith.constant dense<true> : vector<8x256xi1>
    %388 = arith.xori %361, %cst_107 : vector<8x256xi1>
    %389 = arith.andi %359, %388 : vector<8x256xi1>
    %390 = arith.extui %389 : vector<8x256xi1> to vector<8x256xi32>
    %391 = arith.sitofp %390 : vector<8x256xi32> to vector<8x256xf32>
    %cst_108 = arith.constant dense<true> : vector<8x256xi1>
    %392 = arith.xori %363, %cst_108 : vector<8x256xi1>
    %393 = arith.andi %361, %392 : vector<8x256xi1>
    %394 = arith.extui %393 : vector<8x256xi1> to vector<8x256xi32>
    %395 = arith.sitofp %394 : vector<8x256xi32> to vector<8x256xf32>
    %cst_109 = arith.constant dense<true> : vector<8x256xi1>
    %396 = arith.xori %365, %cst_109 : vector<8x256xi1>
    %397 = arith.andi %363, %396 : vector<8x256xi1>
    %398 = arith.extui %397 : vector<8x256xi1> to vector<8x256xi32>
    %399 = arith.sitofp %398 : vector<8x256xi32> to vector<8x256xf32>
    %cst_110 = arith.constant dense<true> : vector<8x256xi1>
    %400 = arith.xori %367, %cst_110 : vector<8x256xi1>
    %401 = arith.andi %365, %400 : vector<8x256xi1>
    %402 = arith.extui %401 : vector<8x256xi1> to vector<8x256xi32>
    %403 = arith.sitofp %402 : vector<8x256xi32> to vector<8x256xf32>
    %cst_111 = arith.constant dense<true> : vector<8x256xi1>
    %404 = arith.xori %369, %cst_111 : vector<8x256xi1>
    %405 = arith.andi %367, %404 : vector<8x256xi1>
    %406 = arith.extui %405 : vector<8x256xi1> to vector<8x256xi32>
    %407 = arith.sitofp %406 : vector<8x256xi32> to vector<8x256xf32>
    %cst_112 = arith.constant dense<true> : vector<8x256xi1>
    %408 = arith.xori %371, %cst_112 : vector<8x256xi1>
    %409 = arith.andi %369, %408 : vector<8x256xi1>
    %410 = arith.extui %409 : vector<8x256xi1> to vector<8x256xi32>
    %411 = arith.sitofp %410 : vector<8x256xi32> to vector<8x256xf32>
    %cst_113 = arith.constant dense<true> : vector<8x256xi1>
    %412 = arith.xori %373, %cst_113 : vector<8x256xi1>
    %413 = arith.andi %371, %412 : vector<8x256xi1>
    %414 = arith.extui %413 : vector<8x256xi1> to vector<8x256xi32>
    %415 = arith.sitofp %414 : vector<8x256xi32> to vector<8x256xf32>
    %cst_114 = arith.constant dense<true> : vector<8x256xi1>
    %416 = arith.xori %375, %cst_114 : vector<8x256xi1>
    %417 = arith.andi %373, %416 : vector<8x256xi1>
    %418 = arith.extui %417 : vector<8x256xi1> to vector<8x256xi32>
    %419 = arith.sitofp %418 : vector<8x256xi32> to vector<8x256xf32>
    %cst_115 = arith.constant 2.500000e+00 : f32
    %420 = vector.broadcast %cst_115 : f32 to vector<8x256xf32>
    %421 = arith.mulf %340, %420 : vector<8x256xf32>
    %cst_116 = arith.constant -5.500000e+00 : f32
    %422 = vector.broadcast %cst_116 : f32 to vector<8x256xf32>
    %423 = arith.subf %421, %422 : vector<8x256xf32>
    %424 = arith.mulf %423, %379 : vector<8x256xf32>
    %cst_117 = arith.constant -3.500000e+00 : f32
    %425 = vector.broadcast %cst_117 : f32 to vector<8x256xf32>
    %426 = arith.subf %425, %421 : vector<8x256xf32>
    %427 = arith.mulf %426, %383 : vector<8x256xf32>
    %428 = arith.addf %424, %427 : vector<8x256xf32>
    %cst_118 = arith.constant -4.500000e+00 : f32
    %429 = vector.broadcast %cst_118 : f32 to vector<8x256xf32>
    %430 = arith.subf %421, %429 : vector<8x256xf32>
    %431 = arith.mulf %430, %383 : vector<8x256xf32>
    %cst_119 = arith.constant -2.500000e+00 : f32
    %432 = vector.broadcast %cst_119 : f32 to vector<8x256xf32>
    %433 = arith.subf %432, %421 : vector<8x256xf32>
    %434 = arith.mulf %433, %387 : vector<8x256xf32>
    %435 = arith.addf %431, %434 : vector<8x256xf32>
    %cst_120 = arith.constant -3.500000e+00 : f32
    %436 = vector.broadcast %cst_120 : f32 to vector<8x256xf32>
    %437 = arith.subf %421, %436 : vector<8x256xf32>
    %438 = arith.mulf %437, %387 : vector<8x256xf32>
    %cst_121 = arith.constant -1.500000e+00 : f32
    %439 = vector.broadcast %cst_121 : f32 to vector<8x256xf32>
    %440 = arith.subf %439, %421 : vector<8x256xf32>
    %441 = arith.mulf %440, %391 : vector<8x256xf32>
    %442 = arith.addf %438, %441 : vector<8x256xf32>
    %cst_122 = arith.constant -2.500000e+00 : f32
    %443 = vector.broadcast %cst_122 : f32 to vector<8x256xf32>
    %444 = arith.subf %421, %443 : vector<8x256xf32>
    %445 = arith.mulf %444, %391 : vector<8x256xf32>
    %cst_123 = arith.constant -0.49999997 : f32
    %446 = vector.broadcast %cst_123 : f32 to vector<8x256xf32>
    %447 = arith.subf %446, %421 : vector<8x256xf32>
    %448 = arith.mulf %447, %395 : vector<8x256xf32>
    %449 = arith.addf %445, %448 : vector<8x256xf32>
    %cst_124 = arith.constant -1.500000e+00 : f32
    %450 = vector.broadcast %cst_124 : f32 to vector<8x256xf32>
    %451 = arith.subf %421, %450 : vector<8x256xf32>
    %452 = arith.mulf %451, %395 : vector<8x256xf32>
    %cst_125 = arith.constant 0.500000119 : f32
    %453 = vector.broadcast %cst_125 : f32 to vector<8x256xf32>
    %454 = arith.subf %453, %421 : vector<8x256xf32>
    %455 = arith.mulf %454, %399 : vector<8x256xf32>
    %456 = arith.addf %452, %455 : vector<8x256xf32>
    %cst_126 = arith.constant -0.49999997 : f32
    %457 = vector.broadcast %cst_126 : f32 to vector<8x256xf32>
    %458 = arith.subf %421, %457 : vector<8x256xf32>
    %459 = arith.mulf %458, %399 : vector<8x256xf32>
    %cst_127 = arith.constant 1.500000e+00 : f32
    %460 = vector.broadcast %cst_127 : f32 to vector<8x256xf32>
    %461 = arith.subf %460, %421 : vector<8x256xf32>
    %462 = arith.mulf %461, %403 : vector<8x256xf32>
    %463 = arith.addf %459, %462 : vector<8x256xf32>
    %cst_128 = arith.constant 0.500000119 : f32
    %464 = vector.broadcast %cst_128 : f32 to vector<8x256xf32>
    %465 = arith.subf %421, %464 : vector<8x256xf32>
    %466 = arith.mulf %465, %403 : vector<8x256xf32>
    %cst_129 = arith.constant 2.500000e+00 : f32
    %467 = vector.broadcast %cst_129 : f32 to vector<8x256xf32>
    %468 = arith.subf %467, %421 : vector<8x256xf32>
    %469 = arith.mulf %468, %407 : vector<8x256xf32>
    %470 = arith.addf %466, %469 : vector<8x256xf32>
    %cst_130 = arith.constant 1.500000e+00 : f32
    %471 = vector.broadcast %cst_130 : f32 to vector<8x256xf32>
    %472 = arith.subf %421, %471 : vector<8x256xf32>
    %473 = arith.mulf %472, %407 : vector<8x256xf32>
    %cst_131 = arith.constant 3.50000024 : f32
    %474 = vector.broadcast %cst_131 : f32 to vector<8x256xf32>
    %475 = arith.subf %474, %421 : vector<8x256xf32>
    %476 = arith.mulf %475, %411 : vector<8x256xf32>
    %477 = arith.addf %473, %476 : vector<8x256xf32>
    %cst_132 = arith.constant 2.500000e+00 : f32
    %478 = vector.broadcast %cst_132 : f32 to vector<8x256xf32>
    %479 = arith.subf %421, %478 : vector<8x256xf32>
    %480 = arith.mulf %479, %411 : vector<8x256xf32>
    %cst_133 = arith.constant 4.500000e+00 : f32
    %481 = vector.broadcast %cst_133 : f32 to vector<8x256xf32>
    %482 = arith.subf %481, %421 : vector<8x256xf32>
    %483 = arith.mulf %482, %415 : vector<8x256xf32>
    %484 = arith.addf %480, %483 : vector<8x256xf32>
    %cst_134 = arith.constant 3.50000024 : f32
    %485 = vector.broadcast %cst_134 : f32 to vector<8x256xf32>
    %486 = arith.subf %421, %485 : vector<8x256xf32>
    %487 = arith.mulf %486, %415 : vector<8x256xf32>
    %cst_135 = arith.constant 5.500000e+00 : f32
    %488 = vector.broadcast %cst_135 : f32 to vector<8x256xf32>
    %489 = arith.subf %488, %421 : vector<8x256xf32>
    %490 = arith.mulf %489, %419 : vector<8x256xf32>
    %491 = arith.addf %487, %490 : vector<8x256xf32>
    %cst_136 = arith.constant 1.250000e+00 : f32
    %492 = vector.broadcast %cst_136 : f32 to vector<8x256xf32>
    %493 = arith.mulf %340, %492 : vector<8x256xf32>
    %cst_137 = arith.constant -2.750000e+00 : f32
    %494 = vector.broadcast %cst_137 : f32 to vector<8x256xf32>
    %495 = arith.subf %493, %494 : vector<8x256xf32>
    %496 = arith.mulf %495, %428 : vector<8x256xf32>
    %cst_138 = arith.constant -1.250000e+00 : f32
    %497 = vector.broadcast %cst_138 : f32 to vector<8x256xf32>
    %498 = arith.subf %497, %493 : vector<8x256xf32>
    %499 = arith.mulf %498, %435 : vector<8x256xf32>
    %500 = arith.addf %496, %499 : vector<8x256xf32>
    %cst_139 = arith.constant -2.250000e+00 : f32
    %501 = vector.broadcast %cst_139 : f32 to vector<8x256xf32>
    %502 = arith.subf %493, %501 : vector<8x256xf32>
    %503 = arith.mulf %502, %435 : vector<8x256xf32>
    %cst_140 = arith.constant -7.500000e-01 : f32
    %504 = vector.broadcast %cst_140 : f32 to vector<8x256xf32>
    %505 = arith.subf %504, %493 : vector<8x256xf32>
    %506 = arith.mulf %505, %442 : vector<8x256xf32>
    %507 = arith.addf %503, %506 : vector<8x256xf32>
    %cst_141 = arith.constant -1.750000e+00 : f32
    %508 = vector.broadcast %cst_141 : f32 to vector<8x256xf32>
    %509 = arith.subf %493, %508 : vector<8x256xf32>
    %510 = arith.mulf %509, %442 : vector<8x256xf32>
    %cst_142 = arith.constant -0.249999985 : f32
    %511 = vector.broadcast %cst_142 : f32 to vector<8x256xf32>
    %512 = arith.subf %511, %493 : vector<8x256xf32>
    %513 = arith.mulf %512, %449 : vector<8x256xf32>
    %514 = arith.addf %510, %513 : vector<8x256xf32>
    %cst_143 = arith.constant -1.250000e+00 : f32
    %515 = vector.broadcast %cst_143 : f32 to vector<8x256xf32>
    %516 = arith.subf %493, %515 : vector<8x256xf32>
    %517 = arith.mulf %516, %449 : vector<8x256xf32>
    %cst_144 = arith.constant 0.25000006 : f32
    %518 = vector.broadcast %cst_144 : f32 to vector<8x256xf32>
    %519 = arith.subf %518, %493 : vector<8x256xf32>
    %520 = arith.mulf %519, %456 : vector<8x256xf32>
    %521 = arith.addf %517, %520 : vector<8x256xf32>
    %cst_145 = arith.constant -7.500000e-01 : f32
    %522 = vector.broadcast %cst_145 : f32 to vector<8x256xf32>
    %523 = arith.subf %493, %522 : vector<8x256xf32>
    %524 = arith.mulf %523, %456 : vector<8x256xf32>
    %cst_146 = arith.constant 7.500000e-01 : f32
    %525 = vector.broadcast %cst_146 : f32 to vector<8x256xf32>
    %526 = arith.subf %525, %493 : vector<8x256xf32>
    %527 = arith.mulf %526, %463 : vector<8x256xf32>
    %528 = arith.addf %524, %527 : vector<8x256xf32>
    %cst_147 = arith.constant -0.249999985 : f32
    %529 = vector.broadcast %cst_147 : f32 to vector<8x256xf32>
    %530 = arith.subf %493, %529 : vector<8x256xf32>
    %531 = arith.mulf %530, %463 : vector<8x256xf32>
    %cst_148 = arith.constant 1.250000e+00 : f32
    %532 = vector.broadcast %cst_148 : f32 to vector<8x256xf32>
    %533 = arith.subf %532, %493 : vector<8x256xf32>
    %534 = arith.mulf %533, %470 : vector<8x256xf32>
    %535 = arith.addf %531, %534 : vector<8x256xf32>
    %cst_149 = arith.constant 0.25000006 : f32
    %536 = vector.broadcast %cst_149 : f32 to vector<8x256xf32>
    %537 = arith.subf %493, %536 : vector<8x256xf32>
    %538 = arith.mulf %537, %470 : vector<8x256xf32>
    %cst_150 = arith.constant 1.75000012 : f32
    %539 = vector.broadcast %cst_150 : f32 to vector<8x256xf32>
    %540 = arith.subf %539, %493 : vector<8x256xf32>
    %541 = arith.mulf %540, %477 : vector<8x256xf32>
    %542 = arith.addf %538, %541 : vector<8x256xf32>
    %cst_151 = arith.constant 7.500000e-01 : f32
    %543 = vector.broadcast %cst_151 : f32 to vector<8x256xf32>
    %544 = arith.subf %493, %543 : vector<8x256xf32>
    %545 = arith.mulf %544, %477 : vector<8x256xf32>
    %cst_152 = arith.constant 2.250000e+00 : f32
    %546 = vector.broadcast %cst_152 : f32 to vector<8x256xf32>
    %547 = arith.subf %546, %493 : vector<8x256xf32>
    %548 = arith.mulf %547, %484 : vector<8x256xf32>
    %549 = arith.addf %545, %548 : vector<8x256xf32>
    %cst_153 = arith.constant 1.250000e+00 : f32
    %550 = vector.broadcast %cst_153 : f32 to vector<8x256xf32>
    %551 = arith.subf %493, %550 : vector<8x256xf32>
    %552 = arith.mulf %551, %484 : vector<8x256xf32>
    %cst_154 = arith.constant 2.750000e+00 : f32
    %553 = vector.broadcast %cst_154 : f32 to vector<8x256xf32>
    %554 = arith.subf %553, %493 : vector<8x256xf32>
    %555 = arith.mulf %554, %491 : vector<8x256xf32>
    %556 = arith.addf %552, %555 : vector<8x256xf32>
    %cst_155 = arith.constant 0.833333313 : f32
    %557 = vector.broadcast %cst_155 : f32 to vector<8x256xf32>
    %558 = arith.mulf %340, %557 : vector<8x256xf32>
    %cst_156 = arith.constant -1.83333337 : f32
    %559 = vector.broadcast %cst_156 : f32 to vector<8x256xf32>
    %560 = arith.subf %558, %559 : vector<8x256xf32>
    %561 = arith.mulf %560, %500 : vector<8x256xf32>
    %cst_157 = arith.constant -5.000000e-01 : f32
    %562 = vector.broadcast %cst_157 : f32 to vector<8x256xf32>
    %563 = arith.subf %562, %558 : vector<8x256xf32>
    %564 = arith.mulf %563, %507 : vector<8x256xf32>
    %565 = arith.addf %561, %564 : vector<8x256xf32>
    %566 = vector.broadcast %12 : f32 to vector<8x256xf32>
    %567 = arith.mulf %566, %565 : vector<8x256xf32>
    %568 = arith.addf %351, %567 : vector<8x256xf32>
    %cst_158 = arith.constant -1.500000e+00 : f32
    %569 = vector.broadcast %cst_158 : f32 to vector<8x256xf32>
    %570 = arith.subf %558, %569 : vector<8x256xf32>
    %571 = arith.mulf %570, %507 : vector<8x256xf32>
    %cst_159 = arith.constant -0.166666657 : f32
    %572 = vector.broadcast %cst_159 : f32 to vector<8x256xf32>
    %573 = arith.subf %572, %558 : vector<8x256xf32>
    %574 = arith.mulf %573, %514 : vector<8x256xf32>
    %575 = arith.addf %571, %574 : vector<8x256xf32>
    %576 = vector.broadcast %13 : f32 to vector<8x256xf32>
    %577 = arith.mulf %576, %575 : vector<8x256xf32>
    %578 = arith.addf %568, %577 : vector<8x256xf32>
    %cst_160 = arith.constant -1.16666663 : f32
    %579 = vector.broadcast %cst_160 : f32 to vector<8x256xf32>
    %580 = arith.subf %558, %579 : vector<8x256xf32>
    %581 = arith.mulf %580, %514 : vector<8x256xf32>
    %cst_161 = arith.constant 0.166666701 : f32
    %582 = vector.broadcast %cst_161 : f32 to vector<8x256xf32>
    %583 = arith.subf %582, %558 : vector<8x256xf32>
    %584 = arith.mulf %583, %521 : vector<8x256xf32>
    %585 = arith.addf %581, %584 : vector<8x256xf32>
    %586 = vector.broadcast %14 : f32 to vector<8x256xf32>
    %587 = arith.mulf %586, %585 : vector<8x256xf32>
    %588 = arith.addf %578, %587 : vector<8x256xf32>
    %cst_162 = arith.constant -0.833333313 : f32
    %589 = vector.broadcast %cst_162 : f32 to vector<8x256xf32>
    %590 = arith.subf %558, %589 : vector<8x256xf32>
    %591 = arith.mulf %590, %521 : vector<8x256xf32>
    %cst_163 = arith.constant 5.000000e-01 : f32
    %592 = vector.broadcast %cst_163 : f32 to vector<8x256xf32>
    %593 = arith.subf %592, %558 : vector<8x256xf32>
    %594 = arith.mulf %593, %528 : vector<8x256xf32>
    %595 = arith.addf %591, %594 : vector<8x256xf32>
    %596 = vector.broadcast %15 : f32 to vector<8x256xf32>
    %597 = arith.mulf %596, %595 : vector<8x256xf32>
    %598 = arith.addf %588, %597 : vector<8x256xf32>
    %cst_164 = arith.constant -5.000000e-01 : f32
    %599 = vector.broadcast %cst_164 : f32 to vector<8x256xf32>
    %600 = arith.subf %558, %599 : vector<8x256xf32>
    %601 = arith.mulf %600, %528 : vector<8x256xf32>
    %cst_165 = arith.constant 0.833333313 : f32
    %602 = vector.broadcast %cst_165 : f32 to vector<8x256xf32>
    %603 = arith.subf %602, %558 : vector<8x256xf32>
    %604 = arith.mulf %603, %535 : vector<8x256xf32>
    %605 = arith.addf %601, %604 : vector<8x256xf32>
    %606 = vector.broadcast %16 : f32 to vector<8x256xf32>
    %607 = arith.mulf %606, %605 : vector<8x256xf32>
    %608 = arith.addf %598, %607 : vector<8x256xf32>
    %cst_166 = arith.constant -0.166666657 : f32
    %609 = vector.broadcast %cst_166 : f32 to vector<8x256xf32>
    %610 = arith.subf %558, %609 : vector<8x256xf32>
    %611 = arith.mulf %610, %535 : vector<8x256xf32>
    %cst_167 = arith.constant 1.16666675 : f32
    %612 = vector.broadcast %cst_167 : f32 to vector<8x256xf32>
    %613 = arith.subf %612, %558 : vector<8x256xf32>
    %614 = arith.mulf %613, %542 : vector<8x256xf32>
    %615 = arith.addf %611, %614 : vector<8x256xf32>
    %616 = vector.broadcast %17 : f32 to vector<8x256xf32>
    %617 = arith.mulf %616, %615 : vector<8x256xf32>
    %618 = arith.addf %608, %617 : vector<8x256xf32>
    %cst_168 = arith.constant 0.166666701 : f32
    %619 = vector.broadcast %cst_168 : f32 to vector<8x256xf32>
    %620 = arith.subf %558, %619 : vector<8x256xf32>
    %621 = arith.mulf %620, %542 : vector<8x256xf32>
    %cst_169 = arith.constant 1.500000e+00 : f32
    %622 = vector.broadcast %cst_169 : f32 to vector<8x256xf32>
    %623 = arith.subf %622, %558 : vector<8x256xf32>
    %624 = arith.mulf %623, %549 : vector<8x256xf32>
    %625 = arith.addf %621, %624 : vector<8x256xf32>
    %626 = vector.broadcast %18 : f32 to vector<8x256xf32>
    %627 = arith.mulf %626, %625 : vector<8x256xf32>
    %628 = arith.addf %618, %627 : vector<8x256xf32>
    %cst_170 = arith.constant 5.000000e-01 : f32
    %629 = vector.broadcast %cst_170 : f32 to vector<8x256xf32>
    %630 = arith.subf %558, %629 : vector<8x256xf32>
    %631 = arith.mulf %630, %549 : vector<8x256xf32>
    %cst_171 = arith.constant 1.83333337 : f32
    %632 = vector.broadcast %cst_171 : f32 to vector<8x256xf32>
    %633 = arith.subf %632, %558 : vector<8x256xf32>
    %634 = arith.mulf %633, %556 : vector<8x256xf32>
    %635 = arith.addf %631, %634 : vector<8x256xf32>
    %636 = vector.broadcast %19 : f32 to vector<8x256xf32>
    %637 = arith.mulf %636, %635 : vector<8x256xf32>
    %638 = arith.addf %628, %637 : vector<8x256xf32>
    %c16_172 = arith.constant 16 : index
    %639 = arith.index_cast %37 : i32 to index
    %640 = vector.load %arg3[%c16_172, %639] : memref<32x256xf32, #tpu.memory_space<vmem>>, vector<8x256xf32>
    %cst_173 = arith.constant 5.000000e-01 : f32
    %641 = vector.broadcast %cst_173 : f32 to vector<8x256xf32>
    %642 = arith.mulf %641, %640 : vector<8x256xf32>
    %643 = math.tanh %642 : vector<8x256xf32>
    %cst_174 = arith.constant 5.000000e-01 : f32
    %644 = vector.broadcast %cst_174 : f32 to vector<8x256xf32>
    %645 = arith.mulf %644, %643 : vector<8x256xf32>
    %cst_175 = arith.constant 5.000000e-01 : f32
    %646 = vector.broadcast %cst_175 : f32 to vector<8x256xf32>
    %647 = arith.addf %645, %646 : vector<8x256xf32>
    %648 = arith.mulf %640, %647 : vector<8x256xf32>
    %649 = vector.broadcast %2 : f32 to vector<8x256xf32>
    %650 = arith.mulf %649, %648 : vector<8x256xf32>
    %651 = arith.addf %638, %650 : vector<8x256xf32>
    %cst_176 = arith.constant -2.200000e+00 : f32
    %652 = vector.broadcast %cst_176 : f32 to vector<8x256xf32>
    %653 = arith.cmpf oge, %640, %652 : vector<8x256xf32>
    %cst_177 = arith.constant -1.800000e+00 : f32
    %654 = vector.broadcast %cst_177 : f32 to vector<8x256xf32>
    %655 = arith.cmpf oge, %640, %654 : vector<8x256xf32>
    %cst_178 = arith.constant -1.400000e+00 : f32
    %656 = vector.broadcast %cst_178 : f32 to vector<8x256xf32>
    %657 = arith.cmpf oge, %640, %656 : vector<8x256xf32>
    %cst_179 = arith.constant -1.000000e+00 : f32
    %658 = vector.broadcast %cst_179 : f32 to vector<8x256xf32>
    %659 = arith.cmpf oge, %640, %658 : vector<8x256xf32>
    %cst_180 = arith.constant -6.000000e-01 : f32
    %660 = vector.broadcast %cst_180 : f32 to vector<8x256xf32>
    %661 = arith.cmpf oge, %640, %660 : vector<8x256xf32>
    %cst_181 = arith.constant -0.199999988 : f32
    %662 = vector.broadcast %cst_181 : f32 to vector<8x256xf32>
    %663 = arith.cmpf oge, %640, %662 : vector<8x256xf32>
    %cst_182 = arith.constant 0.200000048 : f32
    %664 = vector.broadcast %cst_182 : f32 to vector<8x256xf32>
    %665 = arith.cmpf oge, %640, %664 : vector<8x256xf32>
    %cst_183 = arith.constant 6.000000e-01 : f32
    %666 = vector.broadcast %cst_183 : f32 to vector<8x256xf32>
    %667 = arith.cmpf oge, %640, %666 : vector<8x256xf32>
    %cst_184 = arith.constant 1.000000e+00 : f32
    %668 = vector.broadcast %cst_184 : f32 to vector<8x256xf32>
    %669 = arith.cmpf oge, %640, %668 : vector<8x256xf32>
    %cst_185 = arith.constant 1.4000001 : f32
    %670 = vector.broadcast %cst_185 : f32 to vector<8x256xf32>
    %671 = arith.cmpf oge, %640, %670 : vector<8x256xf32>
    %cst_186 = arith.constant 1.800000e+00 : f32
    %672 = vector.broadcast %cst_186 : f32 to vector<8x256xf32>
    %673 = arith.cmpf oge, %640, %672 : vector<8x256xf32>
    %cst_187 = arith.constant 2.200000e+00 : f32
    %674 = vector.broadcast %cst_187 : f32 to vector<8x256xf32>
    %675 = arith.cmpf oge, %640, %674 : vector<8x256xf32>
    %cst_188 = arith.constant dense<true> : vector<8x256xi1>
    %676 = arith.xori %655, %cst_188 : vector<8x256xi1>
    %677 = arith.andi %653, %676 : vector<8x256xi1>
    %678 = arith.extui %677 : vector<8x256xi1> to vector<8x256xi32>
    %679 = arith.sitofp %678 : vector<8x256xi32> to vector<8x256xf32>
    %cst_189 = arith.constant dense<true> : vector<8x256xi1>
    %680 = arith.xori %657, %cst_189 : vector<8x256xi1>
    %681 = arith.andi %655, %680 : vector<8x256xi1>
    %682 = arith.extui %681 : vector<8x256xi1> to vector<8x256xi32>
    %683 = arith.sitofp %682 : vector<8x256xi32> to vector<8x256xf32>
    %cst_190 = arith.constant dense<true> : vector<8x256xi1>
    %684 = arith.xori %659, %cst_190 : vector<8x256xi1>
    %685 = arith.andi %657, %684 : vector<8x256xi1>
    %686 = arith.extui %685 : vector<8x256xi1> to vector<8x256xi32>
    %687 = arith.sitofp %686 : vector<8x256xi32> to vector<8x256xf32>
    %cst_191 = arith.constant dense<true> : vector<8x256xi1>
    %688 = arith.xori %661, %cst_191 : vector<8x256xi1>
    %689 = arith.andi %659, %688 : vector<8x256xi1>
    %690 = arith.extui %689 : vector<8x256xi1> to vector<8x256xi32>
    %691 = arith.sitofp %690 : vector<8x256xi32> to vector<8x256xf32>
    %cst_192 = arith.constant dense<true> : vector<8x256xi1>
    %692 = arith.xori %663, %cst_192 : vector<8x256xi1>
    %693 = arith.andi %661, %692 : vector<8x256xi1>
    %694 = arith.extui %693 : vector<8x256xi1> to vector<8x256xi32>
    %695 = arith.sitofp %694 : vector<8x256xi32> to vector<8x256xf32>
    %cst_193 = arith.constant dense<true> : vector<8x256xi1>
    %696 = arith.xori %665, %cst_193 : vector<8x256xi1>
    %697 = arith.andi %663, %696 : vector<8x256xi1>
    %698 = arith.extui %697 : vector<8x256xi1> to vector<8x256xi32>
    %699 = arith.sitofp %698 : vector<8x256xi32> to vector<8x256xf32>
    %cst_194 = arith.constant dense<true> : vector<8x256xi1>
    %700 = arith.xori %667, %cst_194 : vector<8x256xi1>
    %701 = arith.andi %665, %700 : vector<8x256xi1>
    %702 = arith.extui %701 : vector<8x256xi1> to vector<8x256xi32>
    %703 = arith.sitofp %702 : vector<8x256xi32> to vector<8x256xf32>
    %cst_195 = arith.constant dense<true> : vector<8x256xi1>
    %704 = arith.xori %669, %cst_195 : vector<8x256xi1>
    %705 = arith.andi %667, %704 : vector<8x256xi1>
    %706 = arith.extui %705 : vector<8x256xi1> to vector<8x256xi32>
    %707 = arith.sitofp %706 : vector<8x256xi32> to vector<8x256xf32>
    %cst_196 = arith.constant dense<true> : vector<8x256xi1>
    %708 = arith.xori %671, %cst_196 : vector<8x256xi1>
    %709 = arith.andi %669, %708 : vector<8x256xi1>
    %710 = arith.extui %709 : vector<8x256xi1> to vector<8x256xi32>
    %711 = arith.sitofp %710 : vector<8x256xi32> to vector<8x256xf32>
    %cst_197 = arith.constant dense<true> : vector<8x256xi1>
    %712 = arith.xori %673, %cst_197 : vector<8x256xi1>
    %713 = arith.andi %671, %712 : vector<8x256xi1>
    %714 = arith.extui %713 : vector<8x256xi1> to vector<8x256xi32>
    %715 = arith.sitofp %714 : vector<8x256xi32> to vector<8x256xf32>
    %cst_198 = arith.constant dense<true> : vector<8x256xi1>
    %716 = arith.xori %675, %cst_198 : vector<8x256xi1>
    %717 = arith.andi %673, %716 : vector<8x256xi1>
    %718 = arith.extui %717 : vector<8x256xi1> to vector<8x256xi32>
    %719 = arith.sitofp %718 : vector<8x256xi32> to vector<8x256xf32>
    %cst_199 = arith.constant 2.500000e+00 : f32
    %720 = vector.broadcast %cst_199 : f32 to vector<8x256xf32>
    %721 = arith.mulf %640, %720 : vector<8x256xf32>
    %cst_200 = arith.constant -5.500000e+00 : f32
    %722 = vector.broadcast %cst_200 : f32 to vector<8x256xf32>
    %723 = arith.subf %721, %722 : vector<8x256xf32>
    %724 = arith.mulf %723, %679 : vector<8x256xf32>
    %cst_201 = arith.constant -3.500000e+00 : f32
    %725 = vector.broadcast %cst_201 : f32 to vector<8x256xf32>
    %726 = arith.subf %725, %721 : vector<8x256xf32>
    %727 = arith.mulf %726, %683 : vector<8x256xf32>
    %728 = arith.addf %724, %727 : vector<8x256xf32>
    %cst_202 = arith.constant -4.500000e+00 : f32
    %729 = vector.broadcast %cst_202 : f32 to vector<8x256xf32>
    %730 = arith.subf %721, %729 : vector<8x256xf32>
    %731 = arith.mulf %730, %683 : vector<8x256xf32>
    %cst_203 = arith.constant -2.500000e+00 : f32
    %732 = vector.broadcast %cst_203 : f32 to vector<8x256xf32>
    %733 = arith.subf %732, %721 : vector<8x256xf32>
    %734 = arith.mulf %733, %687 : vector<8x256xf32>
    %735 = arith.addf %731, %734 : vector<8x256xf32>
    %cst_204 = arith.constant -3.500000e+00 : f32
    %736 = vector.broadcast %cst_204 : f32 to vector<8x256xf32>
    %737 = arith.subf %721, %736 : vector<8x256xf32>
    %738 = arith.mulf %737, %687 : vector<8x256xf32>
    %cst_205 = arith.constant -1.500000e+00 : f32
    %739 = vector.broadcast %cst_205 : f32 to vector<8x256xf32>
    %740 = arith.subf %739, %721 : vector<8x256xf32>
    %741 = arith.mulf %740, %691 : vector<8x256xf32>
    %742 = arith.addf %738, %741 : vector<8x256xf32>
    %cst_206 = arith.constant -2.500000e+00 : f32
    %743 = vector.broadcast %cst_206 : f32 to vector<8x256xf32>
    %744 = arith.subf %721, %743 : vector<8x256xf32>
    %745 = arith.mulf %744, %691 : vector<8x256xf32>
    %cst_207 = arith.constant -0.49999997 : f32
    %746 = vector.broadcast %cst_207 : f32 to vector<8x256xf32>
    %747 = arith.subf %746, %721 : vector<8x256xf32>
    %748 = arith.mulf %747, %695 : vector<8x256xf32>
    %749 = arith.addf %745, %748 : vector<8x256xf32>
    %cst_208 = arith.constant -1.500000e+00 : f32
    %750 = vector.broadcast %cst_208 : f32 to vector<8x256xf32>
    %751 = arith.subf %721, %750 : vector<8x256xf32>
    %752 = arith.mulf %751, %695 : vector<8x256xf32>
    %cst_209 = arith.constant 0.500000119 : f32
    %753 = vector.broadcast %cst_209 : f32 to vector<8x256xf32>
    %754 = arith.subf %753, %721 : vector<8x256xf32>
    %755 = arith.mulf %754, %699 : vector<8x256xf32>
    %756 = arith.addf %752, %755 : vector<8x256xf32>
    %cst_210 = arith.constant -0.49999997 : f32
    %757 = vector.broadcast %cst_210 : f32 to vector<8x256xf32>
    %758 = arith.subf %721, %757 : vector<8x256xf32>
    %759 = arith.mulf %758, %699 : vector<8x256xf32>
    %cst_211 = arith.constant 1.500000e+00 : f32
    %760 = vector.broadcast %cst_211 : f32 to vector<8x256xf32>
    %761 = arith.subf %760, %721 : vector<8x256xf32>
    %762 = arith.mulf %761, %703 : vector<8x256xf32>
    %763 = arith.addf %759, %762 : vector<8x256xf32>
    %cst_212 = arith.constant 0.500000119 : f32
    %764 = vector.broadcast %cst_212 : f32 to vector<8x256xf32>
    %765 = arith.subf %721, %764 : vector<8x256xf32>
    %766 = arith.mulf %765, %703 : vector<8x256xf32>
    %cst_213 = arith.constant 2.500000e+00 : f32
    %767 = vector.broadcast %cst_213 : f32 to vector<8x256xf32>
    %768 = arith.subf %767, %721 : vector<8x256xf32>
    %769 = arith.mulf %768, %707 : vector<8x256xf32>
    %770 = arith.addf %766, %769 : vector<8x256xf32>
    %cst_214 = arith.constant 1.500000e+00 : f32
    %771 = vector.broadcast %cst_214 : f32 to vector<8x256xf32>
    %772 = arith.subf %721, %771 : vector<8x256xf32>
    %773 = arith.mulf %772, %707 : vector<8x256xf32>
    %cst_215 = arith.constant 3.50000024 : f32
    %774 = vector.broadcast %cst_215 : f32 to vector<8x256xf32>
    %775 = arith.subf %774, %721 : vector<8x256xf32>
    %776 = arith.mulf %775, %711 : vector<8x256xf32>
    %777 = arith.addf %773, %776 : vector<8x256xf32>
    %cst_216 = arith.constant 2.500000e+00 : f32
    %778 = vector.broadcast %cst_216 : f32 to vector<8x256xf32>
    %779 = arith.subf %721, %778 : vector<8x256xf32>
    %780 = arith.mulf %779, %711 : vector<8x256xf32>
    %cst_217 = arith.constant 4.500000e+00 : f32
    %781 = vector.broadcast %cst_217 : f32 to vector<8x256xf32>
    %782 = arith.subf %781, %721 : vector<8x256xf32>
    %783 = arith.mulf %782, %715 : vector<8x256xf32>
    %784 = arith.addf %780, %783 : vector<8x256xf32>
    %cst_218 = arith.constant 3.50000024 : f32
    %785 = vector.broadcast %cst_218 : f32 to vector<8x256xf32>
    %786 = arith.subf %721, %785 : vector<8x256xf32>
    %787 = arith.mulf %786, %715 : vector<8x256xf32>
    %cst_219 = arith.constant 5.500000e+00 : f32
    %788 = vector.broadcast %cst_219 : f32 to vector<8x256xf32>
    %789 = arith.subf %788, %721 : vector<8x256xf32>
    %790 = arith.mulf %789, %719 : vector<8x256xf32>
    %791 = arith.addf %787, %790 : vector<8x256xf32>
    %cst_220 = arith.constant 1.250000e+00 : f32
    %792 = vector.broadcast %cst_220 : f32 to vector<8x256xf32>
    %793 = arith.mulf %640, %792 : vector<8x256xf32>
    %cst_221 = arith.constant -2.750000e+00 : f32
    %794 = vector.broadcast %cst_221 : f32 to vector<8x256xf32>
    %795 = arith.subf %793, %794 : vector<8x256xf32>
    %796 = arith.mulf %795, %728 : vector<8x256xf32>
    %cst_222 = arith.constant -1.250000e+00 : f32
    %797 = vector.broadcast %cst_222 : f32 to vector<8x256xf32>
    %798 = arith.subf %797, %793 : vector<8x256xf32>
    %799 = arith.mulf %798, %735 : vector<8x256xf32>
    %800 = arith.addf %796, %799 : vector<8x256xf32>
    %cst_223 = arith.constant -2.250000e+00 : f32
    %801 = vector.broadcast %cst_223 : f32 to vector<8x256xf32>
    %802 = arith.subf %793, %801 : vector<8x256xf32>
    %803 = arith.mulf %802, %735 : vector<8x256xf32>
    %cst_224 = arith.constant -7.500000e-01 : f32
    %804 = vector.broadcast %cst_224 : f32 to vector<8x256xf32>
    %805 = arith.subf %804, %793 : vector<8x256xf32>
    %806 = arith.mulf %805, %742 : vector<8x256xf32>
    %807 = arith.addf %803, %806 : vector<8x256xf32>
    %cst_225 = arith.constant -1.750000e+00 : f32
    %808 = vector.broadcast %cst_225 : f32 to vector<8x256xf32>
    %809 = arith.subf %793, %808 : vector<8x256xf32>
    %810 = arith.mulf %809, %742 : vector<8x256xf32>
    %cst_226 = arith.constant -0.249999985 : f32
    %811 = vector.broadcast %cst_226 : f32 to vector<8x256xf32>
    %812 = arith.subf %811, %793 : vector<8x256xf32>
    %813 = arith.mulf %812, %749 : vector<8x256xf32>
    %814 = arith.addf %810, %813 : vector<8x256xf32>
    %cst_227 = arith.constant -1.250000e+00 : f32
    %815 = vector.broadcast %cst_227 : f32 to vector<8x256xf32>
    %816 = arith.subf %793, %815 : vector<8x256xf32>
    %817 = arith.mulf %816, %749 : vector<8x256xf32>
    %cst_228 = arith.constant 0.25000006 : f32
    %818 = vector.broadcast %cst_228 : f32 to vector<8x256xf32>
    %819 = arith.subf %818, %793 : vector<8x256xf32>
    %820 = arith.mulf %819, %756 : vector<8x256xf32>
    %821 = arith.addf %817, %820 : vector<8x256xf32>
    %cst_229 = arith.constant -7.500000e-01 : f32
    %822 = vector.broadcast %cst_229 : f32 to vector<8x256xf32>
    %823 = arith.subf %793, %822 : vector<8x256xf32>
    %824 = arith.mulf %823, %756 : vector<8x256xf32>
    %cst_230 = arith.constant 7.500000e-01 : f32
    %825 = vector.broadcast %cst_230 : f32 to vector<8x256xf32>
    %826 = arith.subf %825, %793 : vector<8x256xf32>
    %827 = arith.mulf %826, %763 : vector<8x256xf32>
    %828 = arith.addf %824, %827 : vector<8x256xf32>
    %cst_231 = arith.constant -0.249999985 : f32
    %829 = vector.broadcast %cst_231 : f32 to vector<8x256xf32>
    %830 = arith.subf %793, %829 : vector<8x256xf32>
    %831 = arith.mulf %830, %763 : vector<8x256xf32>
    %cst_232 = arith.constant 1.250000e+00 : f32
    %832 = vector.broadcast %cst_232 : f32 to vector<8x256xf32>
    %833 = arith.subf %832, %793 : vector<8x256xf32>
    %834 = arith.mulf %833, %770 : vector<8x256xf32>
    %835 = arith.addf %831, %834 : vector<8x256xf32>
    %cst_233 = arith.constant 0.25000006 : f32
    %836 = vector.broadcast %cst_233 : f32 to vector<8x256xf32>
    %837 = arith.subf %793, %836 : vector<8x256xf32>
    %838 = arith.mulf %837, %770 : vector<8x256xf32>
    %cst_234 = arith.constant 1.75000012 : f32
    %839 = vector.broadcast %cst_234 : f32 to vector<8x256xf32>
    %840 = arith.subf %839, %793 : vector<8x256xf32>
    %841 = arith.mulf %840, %777 : vector<8x256xf32>
    %842 = arith.addf %838, %841 : vector<8x256xf32>
    %cst_235 = arith.constant 7.500000e-01 : f32
    %843 = vector.broadcast %cst_235 : f32 to vector<8x256xf32>
    %844 = arith.subf %793, %843 : vector<8x256xf32>
    %845 = arith.mulf %844, %777 : vector<8x256xf32>
    %cst_236 = arith.constant 2.250000e+00 : f32
    %846 = vector.broadcast %cst_236 : f32 to vector<8x256xf32>
    %847 = arith.subf %846, %793 : vector<8x256xf32>
    %848 = arith.mulf %847, %784 : vector<8x256xf32>
    %849 = arith.addf %845, %848 : vector<8x256xf32>
    %cst_237 = arith.constant 1.250000e+00 : f32
    %850 = vector.broadcast %cst_237 : f32 to vector<8x256xf32>
    %851 = arith.subf %793, %850 : vector<8x256xf32>
    %852 = arith.mulf %851, %784 : vector<8x256xf32>
    %cst_238 = arith.constant 2.750000e+00 : f32
    %853 = vector.broadcast %cst_238 : f32 to vector<8x256xf32>
    %854 = arith.subf %853, %793 : vector<8x256xf32>
    %855 = arith.mulf %854, %791 : vector<8x256xf32>
    %856 = arith.addf %852, %855 : vector<8x256xf32>
    %cst_239 = arith.constant 0.833333313 : f32
    %857 = vector.broadcast %cst_239 : f32 to vector<8x256xf32>
    %858 = arith.mulf %640, %857 : vector<8x256xf32>
    %cst_240 = arith.constant -1.83333337 : f32
    %859 = vector.broadcast %cst_240 : f32 to vector<8x256xf32>
    %860 = arith.subf %858, %859 : vector<8x256xf32>
    %861 = arith.mulf %860, %800 : vector<8x256xf32>
    %cst_241 = arith.constant -5.000000e-01 : f32
    %862 = vector.broadcast %cst_241 : f32 to vector<8x256xf32>
    %863 = arith.subf %862, %858 : vector<8x256xf32>
    %864 = arith.mulf %863, %807 : vector<8x256xf32>
    %865 = arith.addf %861, %864 : vector<8x256xf32>
    %866 = vector.broadcast %20 : f32 to vector<8x256xf32>
    %867 = arith.mulf %866, %865 : vector<8x256xf32>
    %868 = arith.addf %651, %867 : vector<8x256xf32>
    %cst_242 = arith.constant -1.500000e+00 : f32
    %869 = vector.broadcast %cst_242 : f32 to vector<8x256xf32>
    %870 = arith.subf %858, %869 : vector<8x256xf32>
    %871 = arith.mulf %870, %807 : vector<8x256xf32>
    %cst_243 = arith.constant -0.166666657 : f32
    %872 = vector.broadcast %cst_243 : f32 to vector<8x256xf32>
    %873 = arith.subf %872, %858 : vector<8x256xf32>
    %874 = arith.mulf %873, %814 : vector<8x256xf32>
    %875 = arith.addf %871, %874 : vector<8x256xf32>
    %876 = vector.broadcast %21 : f32 to vector<8x256xf32>
    %877 = arith.mulf %876, %875 : vector<8x256xf32>
    %878 = arith.addf %868, %877 : vector<8x256xf32>
    %cst_244 = arith.constant -1.16666663 : f32
    %879 = vector.broadcast %cst_244 : f32 to vector<8x256xf32>
    %880 = arith.subf %858, %879 : vector<8x256xf32>
    %881 = arith.mulf %880, %814 : vector<8x256xf32>
    %cst_245 = arith.constant 0.166666701 : f32
    %882 = vector.broadcast %cst_245 : f32 to vector<8x256xf32>
    %883 = arith.subf %882, %858 : vector<8x256xf32>
    %884 = arith.mulf %883, %821 : vector<8x256xf32>
    %885 = arith.addf %881, %884 : vector<8x256xf32>
    %886 = vector.broadcast %22 : f32 to vector<8x256xf32>
    %887 = arith.mulf %886, %885 : vector<8x256xf32>
    %888 = arith.addf %878, %887 : vector<8x256xf32>
    %cst_246 = arith.constant -0.833333313 : f32
    %889 = vector.broadcast %cst_246 : f32 to vector<8x256xf32>
    %890 = arith.subf %858, %889 : vector<8x256xf32>
    %891 = arith.mulf %890, %821 : vector<8x256xf32>
    %cst_247 = arith.constant 5.000000e-01 : f32
    %892 = vector.broadcast %cst_247 : f32 to vector<8x256xf32>
    %893 = arith.subf %892, %858 : vector<8x256xf32>
    %894 = arith.mulf %893, %828 : vector<8x256xf32>
    %895 = arith.addf %891, %894 : vector<8x256xf32>
    %896 = vector.broadcast %23 : f32 to vector<8x256xf32>
    %897 = arith.mulf %896, %895 : vector<8x256xf32>
    %898 = arith.addf %888, %897 : vector<8x256xf32>
    %cst_248 = arith.constant -5.000000e-01 : f32
    %899 = vector.broadcast %cst_248 : f32 to vector<8x256xf32>
    %900 = arith.subf %858, %899 : vector<8x256xf32>
    %901 = arith.mulf %900, %828 : vector<8x256xf32>
    %cst_249 = arith.constant 0.833333313 : f32
    %902 = vector.broadcast %cst_249 : f32 to vector<8x256xf32>
    %903 = arith.subf %902, %858 : vector<8x256xf32>
    %904 = arith.mulf %903, %835 : vector<8x256xf32>
    %905 = arith.addf %901, %904 : vector<8x256xf32>
    %906 = vector.broadcast %24 : f32 to vector<8x256xf32>
    %907 = arith.mulf %906, %905 : vector<8x256xf32>
    %908 = arith.addf %898, %907 : vector<8x256xf32>
    %cst_250 = arith.constant -0.166666657 : f32
    %909 = vector.broadcast %cst_250 : f32 to vector<8x256xf32>
    %910 = arith.subf %858, %909 : vector<8x256xf32>
    %911 = arith.mulf %910, %835 : vector<8x256xf32>
    %cst_251 = arith.constant 1.16666675 : f32
    %912 = vector.broadcast %cst_251 : f32 to vector<8x256xf32>
    %913 = arith.subf %912, %858 : vector<8x256xf32>
    %914 = arith.mulf %913, %842 : vector<8x256xf32>
    %915 = arith.addf %911, %914 : vector<8x256xf32>
    %916 = vector.broadcast %25 : f32 to vector<8x256xf32>
    %917 = arith.mulf %916, %915 : vector<8x256xf32>
    %918 = arith.addf %908, %917 : vector<8x256xf32>
    %cst_252 = arith.constant 0.166666701 : f32
    %919 = vector.broadcast %cst_252 : f32 to vector<8x256xf32>
    %920 = arith.subf %858, %919 : vector<8x256xf32>
    %921 = arith.mulf %920, %842 : vector<8x256xf32>
    %cst_253 = arith.constant 1.500000e+00 : f32
    %922 = vector.broadcast %cst_253 : f32 to vector<8x256xf32>
    %923 = arith.subf %922, %858 : vector<8x256xf32>
    %924 = arith.mulf %923, %849 : vector<8x256xf32>
    %925 = arith.addf %921, %924 : vector<8x256xf32>
    %926 = vector.broadcast %26 : f32 to vector<8x256xf32>
    %927 = arith.mulf %926, %925 : vector<8x256xf32>
    %928 = arith.addf %918, %927 : vector<8x256xf32>
    %cst_254 = arith.constant 5.000000e-01 : f32
    %929 = vector.broadcast %cst_254 : f32 to vector<8x256xf32>
    %930 = arith.subf %858, %929 : vector<8x256xf32>
    %931 = arith.mulf %930, %849 : vector<8x256xf32>
    %cst_255 = arith.constant 1.83333337 : f32
    %932 = vector.broadcast %cst_255 : f32 to vector<8x256xf32>
    %933 = arith.subf %932, %858 : vector<8x256xf32>
    %934 = arith.mulf %933, %856 : vector<8x256xf32>
    %935 = arith.addf %931, %934 : vector<8x256xf32>
    %936 = vector.broadcast %27 : f32 to vector<8x256xf32>
    %937 = arith.mulf %936, %935 : vector<8x256xf32>
    %938 = arith.addf %928, %937 : vector<8x256xf32>
    %c24_256 = arith.constant 24 : index
    %939 = arith.index_cast %37 : i32 to index
    %940 = vector.load %arg3[%c24_256, %939] : memref<32x256xf32, #tpu.memory_space<vmem>>, vector<8x256xf32>
    %cst_257 = arith.constant 5.000000e-01 : f32
    %941 = vector.broadcast %cst_257 : f32 to vector<8x256xf32>
    %942 = arith.mulf %941, %940 : vector<8x256xf32>
    %943 = math.tanh %942 : vector<8x256xf32>
    %cst_258 = arith.constant 5.000000e-01 : f32
    %944 = vector.broadcast %cst_258 : f32 to vector<8x256xf32>
    %945 = arith.mulf %944, %943 : vector<8x256xf32>
    %cst_259 = arith.constant 5.000000e-01 : f32
    %946 = vector.broadcast %cst_259 : f32 to vector<8x256xf32>
    %947 = arith.addf %945, %946 : vector<8x256xf32>
    %948 = arith.mulf %940, %947 : vector<8x256xf32>
    %949 = vector.broadcast %3 : f32 to vector<8x256xf32>
    %950 = arith.mulf %949, %948 : vector<8x256xf32>
    %951 = arith.addf %938, %950 : vector<8x256xf32>
    %cst_260 = arith.constant -2.200000e+00 : f32
    %952 = vector.broadcast %cst_260 : f32 to vector<8x256xf32>
    %953 = arith.cmpf oge, %940, %952 : vector<8x256xf32>
    %cst_261 = arith.constant -1.800000e+00 : f32
    %954 = vector.broadcast %cst_261 : f32 to vector<8x256xf32>
    %955 = arith.cmpf oge, %940, %954 : vector<8x256xf32>
    %cst_262 = arith.constant -1.400000e+00 : f32
    %956 = vector.broadcast %cst_262 : f32 to vector<8x256xf32>
    %957 = arith.cmpf oge, %940, %956 : vector<8x256xf32>
    %cst_263 = arith.constant -1.000000e+00 : f32
    %958 = vector.broadcast %cst_263 : f32 to vector<8x256xf32>
    %959 = arith.cmpf oge, %940, %958 : vector<8x256xf32>
    %cst_264 = arith.constant -6.000000e-01 : f32
    %960 = vector.broadcast %cst_264 : f32 to vector<8x256xf32>
    %961 = arith.cmpf oge, %940, %960 : vector<8x256xf32>
    %cst_265 = arith.constant -0.199999988 : f32
    %962 = vector.broadcast %cst_265 : f32 to vector<8x256xf32>
    %963 = arith.cmpf oge, %940, %962 : vector<8x256xf32>
    %cst_266 = arith.constant 0.200000048 : f32
    %964 = vector.broadcast %cst_266 : f32 to vector<8x256xf32>
    %965 = arith.cmpf oge, %940, %964 : vector<8x256xf32>
    %cst_267 = arith.constant 6.000000e-01 : f32
    %966 = vector.broadcast %cst_267 : f32 to vector<8x256xf32>
    %967 = arith.cmpf oge, %940, %966 : vector<8x256xf32>
    %cst_268 = arith.constant 1.000000e+00 : f32
    %968 = vector.broadcast %cst_268 : f32 to vector<8x256xf32>
    %969 = arith.cmpf oge, %940, %968 : vector<8x256xf32>
    %cst_269 = arith.constant 1.4000001 : f32
    %970 = vector.broadcast %cst_269 : f32 to vector<8x256xf32>
    %971 = arith.cmpf oge, %940, %970 : vector<8x256xf32>
    %cst_270 = arith.constant 1.800000e+00 : f32
    %972 = vector.broadcast %cst_270 : f32 to vector<8x256xf32>
    %973 = arith.cmpf oge, %940, %972 : vector<8x256xf32>
    %cst_271 = arith.constant 2.200000e+00 : f32
    %974 = vector.broadcast %cst_271 : f32 to vector<8x256xf32>
    %975 = arith.cmpf oge, %940, %974 : vector<8x256xf32>
    %cst_272 = arith.constant dense<true> : vector<8x256xi1>
    %976 = arith.xori %955, %cst_272 : vector<8x256xi1>
    %977 = arith.andi %953, %976 : vector<8x256xi1>
    %978 = arith.extui %977 : vector<8x256xi1> to vector<8x256xi32>
    %979 = arith.sitofp %978 : vector<8x256xi32> to vector<8x256xf32>
    %cst_273 = arith.constant dense<true> : vector<8x256xi1>
    %980 = arith.xori %957, %cst_273 : vector<8x256xi1>
    %981 = arith.andi %955, %980 : vector<8x256xi1>
    %982 = arith.extui %981 : vector<8x256xi1> to vector<8x256xi32>
    %983 = arith.sitofp %982 : vector<8x256xi32> to vector<8x256xf32>
    %cst_274 = arith.constant dense<true> : vector<8x256xi1>
    %984 = arith.xori %959, %cst_274 : vector<8x256xi1>
    %985 = arith.andi %957, %984 : vector<8x256xi1>
    %986 = arith.extui %985 : vector<8x256xi1> to vector<8x256xi32>
    %987 = arith.sitofp %986 : vector<8x256xi32> to vector<8x256xf32>
    %cst_275 = arith.constant dense<true> : vector<8x256xi1>
    %988 = arith.xori %961, %cst_275 : vector<8x256xi1>
    %989 = arith.andi %959, %988 : vector<8x256xi1>
    %990 = arith.extui %989 : vector<8x256xi1> to vector<8x256xi32>
    %991 = arith.sitofp %990 : vector<8x256xi32> to vector<8x256xf32>
    %cst_276 = arith.constant dense<true> : vector<8x256xi1>
    %992 = arith.xori %963, %cst_276 : vector<8x256xi1>
    %993 = arith.andi %961, %992 : vector<8x256xi1>
    %994 = arith.extui %993 : vector<8x256xi1> to vector<8x256xi32>
    %995 = arith.sitofp %994 : vector<8x256xi32> to vector<8x256xf32>
    %cst_277 = arith.constant dense<true> : vector<8x256xi1>
    %996 = arith.xori %965, %cst_277 : vector<8x256xi1>
    %997 = arith.andi %963, %996 : vector<8x256xi1>
    %998 = arith.extui %997 : vector<8x256xi1> to vector<8x256xi32>
    %999 = arith.sitofp %998 : vector<8x256xi32> to vector<8x256xf32>
    %cst_278 = arith.constant dense<true> : vector<8x256xi1>
    %1000 = arith.xori %967, %cst_278 : vector<8x256xi1>
    %1001 = arith.andi %965, %1000 : vector<8x256xi1>
    %1002 = arith.extui %1001 : vector<8x256xi1> to vector<8x256xi32>
    %1003 = arith.sitofp %1002 : vector<8x256xi32> to vector<8x256xf32>
    %cst_279 = arith.constant dense<true> : vector<8x256xi1>
    %1004 = arith.xori %969, %cst_279 : vector<8x256xi1>
    %1005 = arith.andi %967, %1004 : vector<8x256xi1>
    %1006 = arith.extui %1005 : vector<8x256xi1> to vector<8x256xi32>
    %1007 = arith.sitofp %1006 : vector<8x256xi32> to vector<8x256xf32>
    %cst_280 = arith.constant dense<true> : vector<8x256xi1>
    %1008 = arith.xori %971, %cst_280 : vector<8x256xi1>
    %1009 = arith.andi %969, %1008 : vector<8x256xi1>
    %1010 = arith.extui %1009 : vector<8x256xi1> to vector<8x256xi32>
    %1011 = arith.sitofp %1010 : vector<8x256xi32> to vector<8x256xf32>
    %cst_281 = arith.constant dense<true> : vector<8x256xi1>
    %1012 = arith.xori %973, %cst_281 : vector<8x256xi1>
    %1013 = arith.andi %971, %1012 : vector<8x256xi1>
    %1014 = arith.extui %1013 : vector<8x256xi1> to vector<8x256xi32>
    %1015 = arith.sitofp %1014 : vector<8x256xi32> to vector<8x256xf32>
    %cst_282 = arith.constant dense<true> : vector<8x256xi1>
    %1016 = arith.xori %975, %cst_282 : vector<8x256xi1>
    %1017 = arith.andi %973, %1016 : vector<8x256xi1>
    %1018 = arith.extui %1017 : vector<8x256xi1> to vector<8x256xi32>
    %1019 = arith.sitofp %1018 : vector<8x256xi32> to vector<8x256xf32>
    %cst_283 = arith.constant 2.500000e+00 : f32
    %1020 = vector.broadcast %cst_283 : f32 to vector<8x256xf32>
    %1021 = arith.mulf %940, %1020 : vector<8x256xf32>
    %cst_284 = arith.constant -5.500000e+00 : f32
    %1022 = vector.broadcast %cst_284 : f32 to vector<8x256xf32>
    %1023 = arith.subf %1021, %1022 : vector<8x256xf32>
    %1024 = arith.mulf %1023, %979 : vector<8x256xf32>
    %cst_285 = arith.constant -3.500000e+00 : f32
    %1025 = vector.broadcast %cst_285 : f32 to vector<8x256xf32>
    %1026 = arith.subf %1025, %1021 : vector<8x256xf32>
    %1027 = arith.mulf %1026, %983 : vector<8x256xf32>
    %1028 = arith.addf %1024, %1027 : vector<8x256xf32>
    %cst_286 = arith.constant -4.500000e+00 : f32
    %1029 = vector.broadcast %cst_286 : f32 to vector<8x256xf32>
    %1030 = arith.subf %1021, %1029 : vector<8x256xf32>
    %1031 = arith.mulf %1030, %983 : vector<8x256xf32>
    %cst_287 = arith.constant -2.500000e+00 : f32
    %1032 = vector.broadcast %cst_287 : f32 to vector<8x256xf32>
    %1033 = arith.subf %1032, %1021 : vector<8x256xf32>
    %1034 = arith.mulf %1033, %987 : vector<8x256xf32>
    %1035 = arith.addf %1031, %1034 : vector<8x256xf32>
    %cst_288 = arith.constant -3.500000e+00 : f32
    %1036 = vector.broadcast %cst_288 : f32 to vector<8x256xf32>
    %1037 = arith.subf %1021, %1036 : vector<8x256xf32>
    %1038 = arith.mulf %1037, %987 : vector<8x256xf32>
    %cst_289 = arith.constant -1.500000e+00 : f32
    %1039 = vector.broadcast %cst_289 : f32 to vector<8x256xf32>
    %1040 = arith.subf %1039, %1021 : vector<8x256xf32>
    %1041 = arith.mulf %1040, %991 : vector<8x256xf32>
    %1042 = arith.addf %1038, %1041 : vector<8x256xf32>
    %cst_290 = arith.constant -2.500000e+00 : f32
    %1043 = vector.broadcast %cst_290 : f32 to vector<8x256xf32>
    %1044 = arith.subf %1021, %1043 : vector<8x256xf32>
    %1045 = arith.mulf %1044, %991 : vector<8x256xf32>
    %cst_291 = arith.constant -0.49999997 : f32
    %1046 = vector.broadcast %cst_291 : f32 to vector<8x256xf32>
    %1047 = arith.subf %1046, %1021 : vector<8x256xf32>
    %1048 = arith.mulf %1047, %995 : vector<8x256xf32>
    %1049 = arith.addf %1045, %1048 : vector<8x256xf32>
    %cst_292 = arith.constant -1.500000e+00 : f32
    %1050 = vector.broadcast %cst_292 : f32 to vector<8x256xf32>
    %1051 = arith.subf %1021, %1050 : vector<8x256xf32>
    %1052 = arith.mulf %1051, %995 : vector<8x256xf32>
    %cst_293 = arith.constant 0.500000119 : f32
    %1053 = vector.broadcast %cst_293 : f32 to vector<8x256xf32>
    %1054 = arith.subf %1053, %1021 : vector<8x256xf32>
    %1055 = arith.mulf %1054, %999 : vector<8x256xf32>
    %1056 = arith.addf %1052, %1055 : vector<8x256xf32>
    %cst_294 = arith.constant -0.49999997 : f32
    %1057 = vector.broadcast %cst_294 : f32 to vector<8x256xf32>
    %1058 = arith.subf %1021, %1057 : vector<8x256xf32>
    %1059 = arith.mulf %1058, %999 : vector<8x256xf32>
    %cst_295 = arith.constant 1.500000e+00 : f32
    %1060 = vector.broadcast %cst_295 : f32 to vector<8x256xf32>
    %1061 = arith.subf %1060, %1021 : vector<8x256xf32>
    %1062 = arith.mulf %1061, %1003 : vector<8x256xf32>
    %1063 = arith.addf %1059, %1062 : vector<8x256xf32>
    %cst_296 = arith.constant 0.500000119 : f32
    %1064 = vector.broadcast %cst_296 : f32 to vector<8x256xf32>
    %1065 = arith.subf %1021, %1064 : vector<8x256xf32>
    %1066 = arith.mulf %1065, %1003 : vector<8x256xf32>
    %cst_297 = arith.constant 2.500000e+00 : f32
    %1067 = vector.broadcast %cst_297 : f32 to vector<8x256xf32>
    %1068 = arith.subf %1067, %1021 : vector<8x256xf32>
    %1069 = arith.mulf %1068, %1007 : vector<8x256xf32>
    %1070 = arith.addf %1066, %1069 : vector<8x256xf32>
    %cst_298 = arith.constant 1.500000e+00 : f32
    %1071 = vector.broadcast %cst_298 : f32 to vector<8x256xf32>
    %1072 = arith.subf %1021, %1071 : vector<8x256xf32>
    %1073 = arith.mulf %1072, %1007 : vector<8x256xf32>
    %cst_299 = arith.constant 3.50000024 : f32
    %1074 = vector.broadcast %cst_299 : f32 to vector<8x256xf32>
    %1075 = arith.subf %1074, %1021 : vector<8x256xf32>
    %1076 = arith.mulf %1075, %1011 : vector<8x256xf32>
    %1077 = arith.addf %1073, %1076 : vector<8x256xf32>
    %cst_300 = arith.constant 2.500000e+00 : f32
    %1078 = vector.broadcast %cst_300 : f32 to vector<8x256xf32>
    %1079 = arith.subf %1021, %1078 : vector<8x256xf32>
    %1080 = arith.mulf %1079, %1011 : vector<8x256xf32>
    %cst_301 = arith.constant 4.500000e+00 : f32
    %1081 = vector.broadcast %cst_301 : f32 to vector<8x256xf32>
    %1082 = arith.subf %1081, %1021 : vector<8x256xf32>
    %1083 = arith.mulf %1082, %1015 : vector<8x256xf32>
    %1084 = arith.addf %1080, %1083 : vector<8x256xf32>
    %cst_302 = arith.constant 3.50000024 : f32
    %1085 = vector.broadcast %cst_302 : f32 to vector<8x256xf32>
    %1086 = arith.subf %1021, %1085 : vector<8x256xf32>
    %1087 = arith.mulf %1086, %1015 : vector<8x256xf32>
    %cst_303 = arith.constant 5.500000e+00 : f32
    %1088 = vector.broadcast %cst_303 : f32 to vector<8x256xf32>
    %1089 = arith.subf %1088, %1021 : vector<8x256xf32>
    %1090 = arith.mulf %1089, %1019 : vector<8x256xf32>
    %1091 = arith.addf %1087, %1090 : vector<8x256xf32>
    %cst_304 = arith.constant 1.250000e+00 : f32
    %1092 = vector.broadcast %cst_304 : f32 to vector<8x256xf32>
    %1093 = arith.mulf %940, %1092 : vector<8x256xf32>
    %cst_305 = arith.constant -2.750000e+00 : f32
    %1094 = vector.broadcast %cst_305 : f32 to vector<8x256xf32>
    %1095 = arith.subf %1093, %1094 : vector<8x256xf32>
    %1096 = arith.mulf %1095, %1028 : vector<8x256xf32>
    %cst_306 = arith.constant -1.250000e+00 : f32
    %1097 = vector.broadcast %cst_306 : f32 to vector<8x256xf32>
    %1098 = arith.subf %1097, %1093 : vector<8x256xf32>
    %1099 = arith.mulf %1098, %1035 : vector<8x256xf32>
    %1100 = arith.addf %1096, %1099 : vector<8x256xf32>
    %cst_307 = arith.constant -2.250000e+00 : f32
    %1101 = vector.broadcast %cst_307 : f32 to vector<8x256xf32>
    %1102 = arith.subf %1093, %1101 : vector<8x256xf32>
    %1103 = arith.mulf %1102, %1035 : vector<8x256xf32>
    %cst_308 = arith.constant -7.500000e-01 : f32
    %1104 = vector.broadcast %cst_308 : f32 to vector<8x256xf32>
    %1105 = arith.subf %1104, %1093 : vector<8x256xf32>
    %1106 = arith.mulf %1105, %1042 : vector<8x256xf32>
    %1107 = arith.addf %1103, %1106 : vector<8x256xf32>
    %cst_309 = arith.constant -1.750000e+00 : f32
    %1108 = vector.broadcast %cst_309 : f32 to vector<8x256xf32>
    %1109 = arith.subf %1093, %1108 : vector<8x256xf32>
    %1110 = arith.mulf %1109, %1042 : vector<8x256xf32>
    %cst_310 = arith.constant -0.249999985 : f32
    %1111 = vector.broadcast %cst_310 : f32 to vector<8x256xf32>
    %1112 = arith.subf %1111, %1093 : vector<8x256xf32>
    %1113 = arith.mulf %1112, %1049 : vector<8x256xf32>
    %1114 = arith.addf %1110, %1113 : vector<8x256xf32>
    %cst_311 = arith.constant -1.250000e+00 : f32
    %1115 = vector.broadcast %cst_311 : f32 to vector<8x256xf32>
    %1116 = arith.subf %1093, %1115 : vector<8x256xf32>
    %1117 = arith.mulf %1116, %1049 : vector<8x256xf32>
    %cst_312 = arith.constant 0.25000006 : f32
    %1118 = vector.broadcast %cst_312 : f32 to vector<8x256xf32>
    %1119 = arith.subf %1118, %1093 : vector<8x256xf32>
    %1120 = arith.mulf %1119, %1056 : vector<8x256xf32>
    %1121 = arith.addf %1117, %1120 : vector<8x256xf32>
    %cst_313 = arith.constant -7.500000e-01 : f32
    %1122 = vector.broadcast %cst_313 : f32 to vector<8x256xf32>
    %1123 = arith.subf %1093, %1122 : vector<8x256xf32>
    %1124 = arith.mulf %1123, %1056 : vector<8x256xf32>
    %cst_314 = arith.constant 7.500000e-01 : f32
    %1125 = vector.broadcast %cst_314 : f32 to vector<8x256xf32>
    %1126 = arith.subf %1125, %1093 : vector<8x256xf32>
    %1127 = arith.mulf %1126, %1063 : vector<8x256xf32>
    %1128 = arith.addf %1124, %1127 : vector<8x256xf32>
    %cst_315 = arith.constant -0.249999985 : f32
    %1129 = vector.broadcast %cst_315 : f32 to vector<8x256xf32>
    %1130 = arith.subf %1093, %1129 : vector<8x256xf32>
    %1131 = arith.mulf %1130, %1063 : vector<8x256xf32>
    %cst_316 = arith.constant 1.250000e+00 : f32
    %1132 = vector.broadcast %cst_316 : f32 to vector<8x256xf32>
    %1133 = arith.subf %1132, %1093 : vector<8x256xf32>
    %1134 = arith.mulf %1133, %1070 : vector<8x256xf32>
    %1135 = arith.addf %1131, %1134 : vector<8x256xf32>
    %cst_317 = arith.constant 0.25000006 : f32
    %1136 = vector.broadcast %cst_317 : f32 to vector<8x256xf32>
    %1137 = arith.subf %1093, %1136 : vector<8x256xf32>
    %1138 = arith.mulf %1137, %1070 : vector<8x256xf32>
    %cst_318 = arith.constant 1.75000012 : f32
    %1139 = vector.broadcast %cst_318 : f32 to vector<8x256xf32>
    %1140 = arith.subf %1139, %1093 : vector<8x256xf32>
    %1141 = arith.mulf %1140, %1077 : vector<8x256xf32>
    %1142 = arith.addf %1138, %1141 : vector<8x256xf32>
    %cst_319 = arith.constant 7.500000e-01 : f32
    %1143 = vector.broadcast %cst_319 : f32 to vector<8x256xf32>
    %1144 = arith.subf %1093, %1143 : vector<8x256xf32>
    %1145 = arith.mulf %1144, %1077 : vector<8x256xf32>
    %cst_320 = arith.constant 2.250000e+00 : f32
    %1146 = vector.broadcast %cst_320 : f32 to vector<8x256xf32>
    %1147 = arith.subf %1146, %1093 : vector<8x256xf32>
    %1148 = arith.mulf %1147, %1084 : vector<8x256xf32>
    %1149 = arith.addf %1145, %1148 : vector<8x256xf32>
    %cst_321 = arith.constant 1.250000e+00 : f32
    %1150 = vector.broadcast %cst_321 : f32 to vector<8x256xf32>
    %1151 = arith.subf %1093, %1150 : vector<8x256xf32>
    %1152 = arith.mulf %1151, %1084 : vector<8x256xf32>
    %cst_322 = arith.constant 2.750000e+00 : f32
    %1153 = vector.broadcast %cst_322 : f32 to vector<8x256xf32>
    %1154 = arith.subf %1153, %1093 : vector<8x256xf32>
    %1155 = arith.mulf %1154, %1091 : vector<8x256xf32>
    %1156 = arith.addf %1152, %1155 : vector<8x256xf32>
    %cst_323 = arith.constant 0.833333313 : f32
    %1157 = vector.broadcast %cst_323 : f32 to vector<8x256xf32>
    %1158 = arith.mulf %940, %1157 : vector<8x256xf32>
    %cst_324 = arith.constant -1.83333337 : f32
    %1159 = vector.broadcast %cst_324 : f32 to vector<8x256xf32>
    %1160 = arith.subf %1158, %1159 : vector<8x256xf32>
    %1161 = arith.mulf %1160, %1100 : vector<8x256xf32>
    %cst_325 = arith.constant -5.000000e-01 : f32
    %1162 = vector.broadcast %cst_325 : f32 to vector<8x256xf32>
    %1163 = arith.subf %1162, %1158 : vector<8x256xf32>
    %1164 = arith.mulf %1163, %1107 : vector<8x256xf32>
    %1165 = arith.addf %1161, %1164 : vector<8x256xf32>
    %1166 = vector.broadcast %28 : f32 to vector<8x256xf32>
    %1167 = arith.mulf %1166, %1165 : vector<8x256xf32>
    %1168 = arith.addf %951, %1167 : vector<8x256xf32>
    %cst_326 = arith.constant -1.500000e+00 : f32
    %1169 = vector.broadcast %cst_326 : f32 to vector<8x256xf32>
    %1170 = arith.subf %1158, %1169 : vector<8x256xf32>
    %1171 = arith.mulf %1170, %1107 : vector<8x256xf32>
    %cst_327 = arith.constant -0.166666657 : f32
    %1172 = vector.broadcast %cst_327 : f32 to vector<8x256xf32>
    %1173 = arith.subf %1172, %1158 : vector<8x256xf32>
    %1174 = arith.mulf %1173, %1114 : vector<8x256xf32>
    %1175 = arith.addf %1171, %1174 : vector<8x256xf32>
    %1176 = vector.broadcast %29 : f32 to vector<8x256xf32>
    %1177 = arith.mulf %1176, %1175 : vector<8x256xf32>
    %1178 = arith.addf %1168, %1177 : vector<8x256xf32>
    %cst_328 = arith.constant -1.16666663 : f32
    %1179 = vector.broadcast %cst_328 : f32 to vector<8x256xf32>
    %1180 = arith.subf %1158, %1179 : vector<8x256xf32>
    %1181 = arith.mulf %1180, %1114 : vector<8x256xf32>
    %cst_329 = arith.constant 0.166666701 : f32
    %1182 = vector.broadcast %cst_329 : f32 to vector<8x256xf32>
    %1183 = arith.subf %1182, %1158 : vector<8x256xf32>
    %1184 = arith.mulf %1183, %1121 : vector<8x256xf32>
    %1185 = arith.addf %1181, %1184 : vector<8x256xf32>
    %1186 = vector.broadcast %30 : f32 to vector<8x256xf32>
    %1187 = arith.mulf %1186, %1185 : vector<8x256xf32>
    %1188 = arith.addf %1178, %1187 : vector<8x256xf32>
    %cst_330 = arith.constant -0.833333313 : f32
    %1189 = vector.broadcast %cst_330 : f32 to vector<8x256xf32>
    %1190 = arith.subf %1158, %1189 : vector<8x256xf32>
    %1191 = arith.mulf %1190, %1121 : vector<8x256xf32>
    %cst_331 = arith.constant 5.000000e-01 : f32
    %1192 = vector.broadcast %cst_331 : f32 to vector<8x256xf32>
    %1193 = arith.subf %1192, %1158 : vector<8x256xf32>
    %1194 = arith.mulf %1193, %1128 : vector<8x256xf32>
    %1195 = arith.addf %1191, %1194 : vector<8x256xf32>
    %1196 = vector.broadcast %31 : f32 to vector<8x256xf32>
    %1197 = arith.mulf %1196, %1195 : vector<8x256xf32>
    %1198 = arith.addf %1188, %1197 : vector<8x256xf32>
    %cst_332 = arith.constant -5.000000e-01 : f32
    %1199 = vector.broadcast %cst_332 : f32 to vector<8x256xf32>
    %1200 = arith.subf %1158, %1199 : vector<8x256xf32>
    %1201 = arith.mulf %1200, %1128 : vector<8x256xf32>
    %cst_333 = arith.constant 0.833333313 : f32
    %1202 = vector.broadcast %cst_333 : f32 to vector<8x256xf32>
    %1203 = arith.subf %1202, %1158 : vector<8x256xf32>
    %1204 = arith.mulf %1203, %1135 : vector<8x256xf32>
    %1205 = arith.addf %1201, %1204 : vector<8x256xf32>
    %1206 = vector.broadcast %32 : f32 to vector<8x256xf32>
    %1207 = arith.mulf %1206, %1205 : vector<8x256xf32>
    %1208 = arith.addf %1198, %1207 : vector<8x256xf32>
    %cst_334 = arith.constant -0.166666657 : f32
    %1209 = vector.broadcast %cst_334 : f32 to vector<8x256xf32>
    %1210 = arith.subf %1158, %1209 : vector<8x256xf32>
    %1211 = arith.mulf %1210, %1135 : vector<8x256xf32>
    %cst_335 = arith.constant 1.16666675 : f32
    %1212 = vector.broadcast %cst_335 : f32 to vector<8x256xf32>
    %1213 = arith.subf %1212, %1158 : vector<8x256xf32>
    %1214 = arith.mulf %1213, %1142 : vector<8x256xf32>
    %1215 = arith.addf %1211, %1214 : vector<8x256xf32>
    %1216 = vector.broadcast %33 : f32 to vector<8x256xf32>
    %1217 = arith.mulf %1216, %1215 : vector<8x256xf32>
    %1218 = arith.addf %1208, %1217 : vector<8x256xf32>
    %cst_336 = arith.constant 0.166666701 : f32
    %1219 = vector.broadcast %cst_336 : f32 to vector<8x256xf32>
    %1220 = arith.subf %1158, %1219 : vector<8x256xf32>
    %1221 = arith.mulf %1220, %1142 : vector<8x256xf32>
    %cst_337 = arith.constant 1.500000e+00 : f32
    %1222 = vector.broadcast %cst_337 : f32 to vector<8x256xf32>
    %1223 = arith.subf %1222, %1158 : vector<8x256xf32>
    %1224 = arith.mulf %1223, %1149 : vector<8x256xf32>
    %1225 = arith.addf %1221, %1224 : vector<8x256xf32>
    %1226 = vector.broadcast %34 : f32 to vector<8x256xf32>
    %1227 = arith.mulf %1226, %1225 : vector<8x256xf32>
    %1228 = arith.addf %1218, %1227 : vector<8x256xf32>
    %cst_338 = arith.constant 5.000000e-01 : f32
    %1229 = vector.broadcast %cst_338 : f32 to vector<8x256xf32>
    %1230 = arith.subf %1158, %1229 : vector<8x256xf32>
    %1231 = arith.mulf %1230, %1149 : vector<8x256xf32>
    %cst_339 = arith.constant 1.83333337 : f32
    %1232 = vector.broadcast %cst_339 : f32 to vector<8x256xf32>
    %1233 = arith.subf %1232, %1158 : vector<8x256xf32>
    %1234 = arith.mulf %1233, %1156 : vector<8x256xf32>
    %1235 = arith.addf %1231, %1234 : vector<8x256xf32>
    %1236 = vector.broadcast %35 : f32 to vector<8x256xf32>
    %1237 = arith.mulf %1236, %1235 : vector<8x256xf32>
    %1238 = arith.addf %1228, %1237 : vector<8x256xf32>
    %c0_340 = arith.constant 0 : index
    %1239 = arith.index_cast %37 : i32 to index
    %1240 = vector.load %arg4[%c0_340, %1239] : memref<8x256xf32, #tpu.memory_space<vmem>>, vector<8x256xf32>
    tpu.vector_store %arg4[%c0_340, %1239], %1238 {strides = array<i32>} : memref<8x256xf32, #tpu.memory_space<vmem>>, vector<8x256xf32>,
    %c1_i32 = arith.constant 1 : i32
    return
  }
  func.func @transform_0(%arg0: i32, %arg1: memref<4xf32, #tpu.memory_space<smem>>, %arg2: memref<32xf32, #tpu.memory_space<smem>>) -> (i32, i32) {
    %c0_i32 = arith.constant 0 : i32
    %c0_i32_0 = arith.constant 0 : i32
    return %c0_i32, %arg0 : i32, i32
  }
  func.func @transform_1(%arg0: i32, %arg1: memref<4xf32, #tpu.memory_space<smem>>, %arg2: memref<32xf32, #tpu.memory_space<smem>>) -> (i32, i32) {
    %c0_i32 = arith.constant 0 : i32
    %c0_i32_0 = arith.constant 0 : i32
    return %c0_i32, %arg0 : i32, i32
  }
}

</mosaic_0001>

<bundles_post_ra>
// kernel: kan_convolution_forward.1
= control target key start
LH: loop header
LB: loop body
LE: loop exit
PB: predicated region body
PF: predicated region fallthrough
CT: control target
= control target key end

     0   :  { %s4275_s0 = inlined_call_operand.vmem [shape: f32[4], index: 0, kind: input, shape index: {}]   ;;  %s4276_s2 = inlined_call_operand.vmem [shape: f32[32,256], index: 2, kind: input, shape index: {}]   ;;  %s4277_s3 = inlined_call_operand.vmem [shape: f32[8,256], index: 3, kind: output, shape index: {}]   ;;  %s4278_s1 = inlined_call_operand.vmem [shape: f32[32], index: 1, kind: input, shape index: {}]  }
   0x1   :  { %s8_s14 = sshll.u32 %s4275_s0, 4  ;;  %s12_s17 = sshll.u32 %s4278_s1, 4  ;;  %s9_s14 = int_to_ptr.vmem [resolvable:$true] %s8_s14  ;;  %s13_s17 = int_to_ptr.vmem [resolvable:$true] %s12_s17 }
   0x2   :  { %s2200_s18 = scalar_lea.vmem %s9_s14, 16  ;;  %p2205_p1 = scmp.lt.s32.totalorder %s9_s14, %s9_s14 }
   0x3   :  { %p2201_p0 = scmp.ne.s32.totalorder %s9_s14, %s2200_s18  ;;  %p2206_p2 = scmp.lt.s32.totalorder %s2200_s18, %s2200_s18 }
   0x5   :  { %p2207_p3 = por %p2206_p2, %p2205_p1 }
   0x7   :  { %p2208_p4 = pnand %p2207_p3, %p2201_p0 }
   0x9   :  { %2211 = shalt.err (!%p2208_p4)  }
   0xa   :  { %s2226_s19 = smov [#allocation3]   ;;  %s2212_s20 = scalar_lea.vmem %s13_s17, 16 }
   0xb   :  { %11 = dma.vmem_to_smem %s9_s14, 16, %s2226_s19, [#allocation2] }
   0xc   :  { %p2213_p5 = scmp.ne.s32.totalorder %s13_s17, %s2212_s20  ;;  %p2217_p6 = scmp.lt.s32.totalorder %s13_s17, %s13_s17 }
   0xd   :  { %p2218_p7 = scmp.lt.s32.totalorder %s2212_s20, %s2212_s20 }
   0xf   :  { %p2219_p8 = por %p2218_p7, %p2217_p6 }
  0x11   :  { %p2220_p9 = pnand %p2219_p8, %p2213_p5 }
  0x13   :  { %2223 = shalt.err (!%p2220_p9)  }
  0x14   :  { %s2227_s0 = smov [#allocation4]  }
  0x15   :  { %15 = dma.vmem_to_smem %s13_s17, 16, %s2227_s0, [#allocation2] }
  0x16   :  { %2224 = dma.done.wait [#allocation2], 32 }
  0x17   :  { %2225 = vsyncadd [#allocation2], 4294967264 }
  0x18   :  { %17 = sfence }
  0x19   :  { %v2259_v0 = vld [vmem:[%s4276_s2] sm:$0xff]  ;;  %v2264_v1 = vld [vmem:[%s4276_s2 + $0x8] sm:$0xff]  ;;  %s2268_s24 = sld [smem:[#allocation3]]  ;;  %s2272_s26 = sld [smem:[#allocation4 + $0x1]]  ;;  %vm2228_vm8 = vmmov 1   ;;  %v2229_v22 = vmov 0.0  }
  0x1a   :  { %v58_v2 = vmul.f32 0.5, %v2259_v0  ;;  %v59_v3 = vmul.f32 0.5, %v2264_v1  ;;  %s2270_s25 = sld [smem:[#allocation4]]  ;;  %s2274_s27 = sld [smem:[#allocation4 + $0x2]]  ;;  %vm73_vm0 = vcmp.ge.f32.partialorder %v2259_v0, -2.2 }
  0x1b   :  { %s2276_s28 = sld [smem:[#allocation4 + $0x3]]  ;;  %s2278_s29 = sld [smem:[#allocation4 + $0x4]]  ;;  %vm75_vm1 = vcmp.ge.f32.partialorder %v2259_v0, -1.8  ;;  %vm74_vm2 = vcmp.ge.f32.partialorder %v2264_v1, -2.2 }
  0x1c   :  { %2184 = vtanh.f32 %v58_v2  ;;  %s2280_s30 = sld [smem:[#allocation4 + $0x5]]  ;;  %s2282_s4 = sld [smem:[#allocation4 + $0x6]]  ;;  %vm76_vm3 = vcmp.ge.f32.partialorder %v2264_v1, -1.8  ;;  %vm77_vm4 = vcmp.ge.f32.partialorder %v2259_v0, -1.4  ;;  %vm97_vm9 = vmxor %vm75_vm1, %vm2228_vm8 }
  0x1d   :  { %2186 = vtanh.f32 %v59_v3  ;;  %vm78_vm5 = vcmp.ge.f32.partialorder %v2264_v1, -1.4  ;;  %vm79_vm6 = vcmp.ge.f32.partialorder %v2259_v0, -1.0  ;;  %vm80_vm7 = vcmp.ge.f32.partialorder %v2264_v1, -1.0  ;;  %vm98_vm11 = vmxor %vm76_vm3, %vm2228_vm8  ;;  %s2748_s5 = sld [smem:[#allocation4 + $0x7]]  ;;  %s2780_s10 = sld [smem:[#allocation3 + $0x1]] }
  0x1e   :  { %vm81_vm10 = vcmp.ge.f32.partialorder %v2259_v0, -0.6  ;;  %vm82_vm12 = vcmp.ge.f32.partialorder %v2264_v1, -0.6  ;;  %vm99_vm13 = vmand %vm73_vm0, %vm97_vm9  ;;  %v2324_v25 = vmul.f32 2.5, %v2259_v0  ;;  %v2331_v26 = vmul.f32 2.5, %v2264_v1 }
  0x1f   :  { %v68_v8 = vstv %s2268_s24  ;;  %v406_v13 = vstv %s2272_s26  ;;  %vm100_vm14 = vmand %vm74_vm2, %vm98_vm11  ;;  %v1876_v23 = vsel %vm99_vm13, 1.0, %v2229_v22  ;;  %vm83_vm0 = vcmp.ge.f32.partialorder %v2259_v0, -0.19999999  ;;  %s2790_s11 = sld [smem:[#allocation4 + $0x8]]  ;;  %s2795_s12 = sld [smem:[#allocation4 + $0x9]] }
  0x20   :  { %v391_v11 = vstv %s2270_s25  ;;  %v421_v15 = vstv %s2274_s27  ;;  %v1877_v24 = vsel %vm100_vm14, 1.0, %v2229_v22  ;;  %vm105_vm15 = vmxor %vm77_vm4, %vm2228_vm8  ;;  %v2334_v27 = vmul.f32 1.25, %v2259_v0  ;;  %s2813_s13 = sld [smem:[#allocation4 + $0xa]]  ;;  %s3205_s14 = sld [smem:[#allocation4 + $0xb]] }
  0x21   :  { %v436_v16 = vstv %s2276_s28  ;;  %v451_v18 = vstv %s2278_s29  ;;  %vm106_vm2 = vmxor %vm78_vm5, %vm2228_vm8  ;;  %v2337_v28 = vmul.f32 1.25, %v2264_v1  ;;  %v2340_v29 = vmul.f32 0.8333333, %v2259_v0  ;;  %s3217_s15 = sld [smem:[#allocation4 + $0xc]]  ;;  %s3234_s16 = sld [smem:[#allocation4 + $0xd]] }
  0x22   :  { %v466_v19 = vstv %s2280_s30  ;;  %v481_v20 = vstv %s2282_s4  ;;  %vm84_vm9 = vcmp.ge.f32.partialorder %v2264_v1, -0.19999999  ;;  %vm107_vm11 = vmand %vm75_vm1, %vm105_vm15  ;;  %v1898_v30 = vadd.f32 5.5, %v2324_v25  ;;  %s3253_s17 = sld [smem:[#allocation4 + $0xe]]  ;;  %s3264_s18 = sld [smem:[#allocation4 + $0xf]] }
  0x23   :  { %v191_v31 = vsub.f32 -3.5, %v2324_v25  ;;  %v1900_v32 = vadd.f32 4.5, %v2324_v25  ;;  %v201_v33 = vsub.f32 -2.5, %v2324_v25  ;;  %vm108_vm13 = vmand %vm76_vm3, %vm106_vm2  ;;  %v1878_v34 = vsel %vm107_vm11, 1.0, %v2229_v22  ;;  %s3294_s21 = sld [smem:[#allocation3 + $0x2]]  ;;  %s3299_s22 = sld [smem:[#allocation4 + $0x10]] }
  0x24   :  { %v1899_v35 = vadd.f32 5.5, %v2331_v26  ;;  %v192_v36 = vsub.f32 -3.5, %v2331_v26  ;;  %v1901_v37 = vadd.f32 4.5, %v2331_v26  ;;  %v1879_v38 = vsel %vm108_vm13, 1.0, %v2229_v22  ;;  %vm113_vm1 = vmxor %vm79_vm6, %vm2228_vm8  ;;  %s3301_s23 = sld [smem:[#allocation4 + $0x11]]  ;;  %s3682_s24 = sld [smem:[#allocation4 + $0x12]] }
  0x25   :  { %v189_v39 = vmul.f32 %v1898_v30, %v1876_v23  ;;  %v193_v40 = vmul.f32 %v1878_v34, %v191_v31  ;;  %v199_v41 = vmul.f32 %v1900_v32, %v1878_v34  ;;  %vm85_vm14 = vcmp.ge.f32.partialorder %v2259_v0, 0.20000005  ;;  %vm114_vm3 = vmxor %vm80_vm7, %vm2228_vm8  ;;  %s3704_s25 = sld [smem:[#allocation4 + $0x13]]  ;;  %s3718_s26 = sld [smem:[#allocation4 + $0x14]] }
  0x26   :  { %v2185_v4 = vpop.eup %2184  ;;  %v190_v42 = vmul.f32 %v1899_v35, %v1877_v24  ;;  %v194_v43 = vmul.f32 %v1879_v38, %v192_v36  ;;  %v200_v44 = vmul.f32 %v1901_v37, %v1879_v38  ;;  %v202_v45 = vsub.f32 -2.5, %v2331_v26  ;;  %vm115_vm2 = vmand %vm77_vm4, %vm113_vm1  ;;  %s3734_s27 = sld [smem:[#allocation4 + $0x15]]  ;;  %s3748_s28 = sld [smem:[#allocation4 + $0x16]] }
  0x27   :  { %v2187_v5 = vpop.eup %2186  ;;  %v62_v6 = vmul.f32 0.5, %v2185_v4  ;;  %vm86_vm15 = vcmp.ge.f32.partialorder %v2264_v1, 0.20000005  ;;  %v2367_v46 = vadd.f32 %v193_v40, %v189_v39  ;;  %v1902_v47 = vadd.f32 3.5, %v2324_v25  ;;  %vm116_vm11 = vmand %vm78_vm5, %vm114_vm3  ;;  %s3760_s29 = sld [smem:[#allocation4 + $0x17]]  ;;  %s3790_s7 = sld [smem:[#allocation3 + $0x3]] }
  0x28   :  { %v63_v7 = vmul.f32 0.5, %v2187_v5  ;;  %v1903_v48 = vadd.f32 3.5, %v2331_v26  ;;  %v211_v49 = vsub.f32 -1.5, %v2324_v25  ;;  %v1880_v50 = vsel %vm115_vm2, 1.0, %v2229_v22  ;;  %vm121_vm4 = vmxor %vm81_vm10, %vm2228_vm8  ;;  %s3792_s8 = sld [smem:[#allocation4 + $0x18]]  ;;  %s3799_s9 = sld [smem:[#allocation4 + $0x1a]] }
  0x29   :  { %v64_v9 = vadd.f32 0.5, %v62_v6  ;;  %v2375_v51 = vadd.f32 %v194_v43, %v190_v42  ;;  %v212_v52 = vsub.f32 -1.5, %v2331_v26  ;;  %v1904_v53 = vadd.f32 2.5, %v2324_v25  ;;  %vm122_vm13 = vmxor %vm82_vm12, %vm2228_vm8 }
  0x2a   :  { %v65_v10 = vadd.f32 0.5, %v63_v7  ;;  %v1881_v54 = vsel %vm116_vm11, 1.0, %v2229_v22  ;;  %v203_v55 = vmul.f32 %v1880_v50, %v201_v33  ;;  %v209_v56 = vmul.f32 %v1902_v47, %v1880_v50  ;;  %vm123_vm3 = vmand %vm79_vm6, %vm121_vm4 }
  0x2b   :  { %v66_v12 = vmul.f32 %v64_v9, %v2259_v0  ;;  %v1905_v57 = vadd.f32 2.5, %v2331_v26  ;;  %vm87_vm5 = vcmp.ge.f32.partialorder %v2259_v0, 0.6  ;;  %v204_v58 = vmul.f32 %v1881_v54, %v202_v45  ;;  %vm124_vm2 = vmand %vm80_vm7, %vm122_vm13 }
  0x2c   :  { %v67_v14 = vmul.f32 %v65_v10, %v2264_v1  ;;  %v210_v59 = vmul.f32 %v1903_v48, %v1881_v54  ;;  %v221_v60 = vsub.f32 -0.49999997, %v2324_v25  ;;  %v222_v61 = vsub.f32 -0.49999997, %v2331_v26  ;;  %vm129_vm6 = vmxor %vm83_vm0, %vm2228_vm8 }
  0x2d   :  { %v2309_v17 = vmul.f32 %v68_v8, %v66_v12  ;;  %vm88_vm1 = vcmp.ge.f32.partialorder %v2264_v1, 0.6  ;;  %v2393_v62 = vadd.f32 %v203_v55, %v199_v41  ;;  %v1906_v63 = vadd.f32 1.5, %v2324_v25  ;;  %vm130_vm11 = vmxor %vm84_vm9, %vm2228_vm8 }
  0x2e   :  { %v2316_v21 = vmul.f32 %v68_v8, %v67_v14  ;;  %v1907_v2 = vadd.f32 1.5, %v2331_v26  ;;  %v231_v3 = vsub.f32 0.5000001, %v2324_v25  ;;  %v1882_v4 = vsel %vm123_vm3, 1.0, %v2229_v22  ;;  %vm131_vm13 = vmand %vm81_vm10, %vm129_vm6 }
  0x2f   :  { %v2401_v5 = vadd.f32 %v204_v58, %v200_v44  ;;  %v232_v6 = vsub.f32 0.5000001, %v2331_v26  ;;  %v1908_v7 = vadd.f32 0.49999997, %v2324_v25  ;;  %v1883_v8 = vsel %vm124_vm2, 1.0, %v2229_v22  ;;  %vm132_vm3 = vmand %vm82_vm12, %vm130_vm11 }
  0x30   :  { %v213_v9 = vmul.f32 %v1882_v4, %v211_v49  ;;  %v219_v10 = vmul.f32 %v1904_v53, %v1882_v4  ;;  %v1909_v12 = vadd.f32 0.49999997, %v2331_v26  ;;  %vm89_vm7 = vcmp.ge.f32.partialorder %v2259_v0, 1.0  ;;  %vm137_vm10 = vmxor %vm85_vm14, %vm2228_vm8 }
  0x31   :  { %v214_v14 = vmul.f32 %v1883_v8, %v212_v52  ;;  %v220_v23 = vmul.f32 %v1905_v57, %v1883_v8  ;;  %v241_v24 = vsub.f32 1.5, %v2324_v25  ;;  %v242_v30 = vsub.f32 1.5, %v2331_v26  ;;  %vm138_vm2 = vmxor %vm86_vm15, %vm2228_vm8 }
  0x32   :  { %vm90_vm4 = vcmp.ge.f32.partialorder %v2264_v1, 1.0  ;;  %v2419_v31 = vadd.f32 %v213_v9, %v209_v56  ;;  %v1910_v32 = vadd.f32 -0.5000001, %v2324_v25  ;;  %v1911_v33 = vadd.f32 -0.5000001, %v2331_v26  ;;  %vm139_vm11 = vmand %vm83_vm0, %vm137_vm10 }
  0x33   :  { %v251_v34 = vsub.f32 2.5, %v2324_v25  ;;  %v1884_v35 = vsel %vm131_vm13, 1.0, %v2229_v22  ;;  %v2427_v36 = vadd.f32 %v214_v14, %v210_v59  ;;  %v252_v37 = vsub.f32 2.5, %v2331_v26  ;;  %vm140_vm13 = vmand %vm84_vm9, %vm138_vm2 }
  0x34   :  { %v2431_v38 = vadd.f32 -1.5, %v2324_v25  ;;  %v1885_v39 = vsel %vm132_vm3, 1.0, %v2229_v22  ;;  %v223_v40 = vmul.f32 %v1884_v35, %v221_v60  ;;  %v229_v41 = vmul.f32 %v1906_v63, %v1884_v35  ;;  %vm145_vm0 = vmxor %vm87_vm5, %vm2228_vm8 }
  0x35   :  { %v2438_v42 = vadd.f32 -1.5, %v2331_v26  ;;  %vm91_vm12 = vcmp.ge.f32.partialorder %v2259_v0, 1.4000001  ;;  %v224_v43 = vmul.f32 %v1885_v39, %v222_v61  ;;  %v230_v44 = vmul.f32 %v1907_v2, %v1885_v39  ;;  %vm146_vm3 = vmxor %vm88_vm1, %vm2228_vm8 }
  0x36   :  { %v261_v45 = vsub.f32 3.5000002, %v2324_v25  ;;  %v262_v47 = vsub.f32 3.5000002, %v2331_v26  ;;  %vm92_vm6 = vcmp.ge.f32.partialorder %v2264_v1, 1.4000001  ;;  %v2449_v48 = vadd.f32 %v223_v40, %v219_v10  ;;  %vm147_vm2 = vmand %vm85_vm14, %vm145_vm0 }
  0x37   :  { %v2452_v49 = vadd.f32 -2.5, %v2324_v25  ;;  %v2455_v50 = vadd.f32 -2.5, %v2331_v26  ;;  %v271_v52 = vsub.f32 4.5, %v2324_v25  ;;  %v1886_v53 = vsel %vm139_vm11, 1.0, %v2229_v22  ;;  %vm148_vm11 = vmand %vm86_vm15, %vm146_vm3 }
  0x38   :  { %v2461_v54 = vadd.f32 %v224_v43, %v220_v23  ;;  %v272_v55 = vsub.f32 4.5, %v2331_v26  ;;  %v2465_v56 = vadd.f32 -3.5000002, %v2324_v25  ;;  %v1887_v57 = vsel %vm140_vm13, 1.0, %v2229_v22  ;;  %vm153_vm14 = vmxor %vm89_vm7, %vm2228_vm8 }
  0x39   :  { %v233_v58 = vmul.f32 %v1886_v53, %v231_v3  ;;  %v239_v59 = vmul.f32 %v1908_v7, %v1886_v53  ;;  %v2472_v60 = vadd.f32 -3.5000002, %v2331_v26  ;;  %vm93_vm9 = vcmp.ge.f32.partialorder %v2259_v0, 1.8  ;;  %vm154_vm13 = vmxor %vm90_vm4, %vm2228_vm8 }
  0x3a   :  { %v234_v61 = vmul.f32 %v1887_v57, %v232_v6  ;;  %v240_v63 = vmul.f32 %v1909_v12, %v1887_v57  ;;  %v281_v2 = vsub.f32 5.5, %v2324_v25  ;;  %v282_v4 = vsub.f32 5.5, %v2331_v26  ;;  %vm155_vm3 = vmand %vm87_vm5, %vm153_vm14 }
  0x3b   :  { %vm94_vm10 = vcmp.ge.f32.partialorder %v2264_v1, 1.8  ;;  %v2483_v3 = vadd.f32 %v233_v58, %v229_v41  ;;  %v1918_v7 = vadd.f32 2.75, %v2334_v27  ;;  %v1919_v8 = vadd.f32 2.75, %v2337_v28  ;;  %vm161_vm5 = vmxor %vm91_vm12, %vm2228_vm8 }
  0x3c   :  { %v293_v9 = vsub.f32 -1.25, %v2334_v27  ;;  %v1888_v6 = vsel %vm147_vm2, 1.0, %v2229_v22  ;;  %v2491_v10 = vadd.f32 %v234_v61, %v230_v44  ;;  %v294_v12 = vsub.f32 -1.25, %v2337_v28  ;;  %vm156_vm2 = vmand %vm88_vm1, %vm154_vm13 }
  0x3d   :  { %v1920_v14 = vadd.f32 2.25, %v2334_v27  ;;  %v1889_v23 = vsel %vm148_vm11, 1.0, %v2229_v22  ;;  %v243_v35 = vmul.f32 %v1888_v6, %v241_v24  ;;  %v249_v39 = vmul.f32 %v1910_v32, %v1888_v6  ;;  %vm162_vm1 = vmxor %vm92_vm6, %vm2228_vm8 }
  0x3e   :  { %v291_v40 = vmul.f32 %v1918_v7, %v2367_v46  ;;  %vm95_vm15 = vcmp.ge.f32.partialorder %v2259_v0, 2.2  ;;  %v244_v41 = vmul.f32 %v1889_v23, %v242_v30  ;;  %v250_v43 = vmul.f32 %v1911_v33, %v1889_v23  ;;  %vm163_vm11 = vmand %vm89_vm7, %vm161_vm5 }
  0x3f   :  { %v292_v44 = vmul.f32 %v1919_v8, %v2375_v51  ;;  %v295_v53 = vmul.f32 %v293_v9, %v2393_v62  ;;  %vm96_vm0 = vcmp.ge.f32.partialorder %v2264_v1, 2.2  ;;  %v2511_v46 = vadd.f32 %v243_v35, %v239_v59  ;;  %vm164_vm14 = vmand %vm90_vm4, %vm162_vm1 }
  0x40   :  { %v296_v24 = vmul.f32 %v294_v12, %v2401_v5  ;;  %v1921_v32 = vadd.f32 2.25, %v2337_v28  ;;  %v301_v57 = vmul.f32 %v1920_v14, %v2393_v62  ;;  %v1890_v51 = vsel %vm155_vm3, 1.0, %v2229_v22  ;;  %vm169_vm7 = vmxor %vm93_vm9, %vm2228_vm8 }
  0x41   :  { %v2519_v30 = vadd.f32 %v244_v41, %v240_v63  ;;  %v2521_v33 = vadd.f32 %v295_v53, %v291_v40  ;;  %v303_v58 = vsub.f32 -0.75, %v2334_v27  ;;  %v1891_v59 = vsel %vm156_vm2, 1.0, %v2229_v22  ;;  %vm170_vm4 = vmxor %vm94_vm10, %vm2228_vm8 }
  0x42   :  { %v253_v62 = vmul.f32 %v1890_v51, %v251_v34  ;;  %v259_v61 = vmul.f32 %v2431_v38, %v1890_v51  ;;  %v2531_v7 = vadd.f32 %v296_v24, %v292_v44  ;;  %v254_v63 = vmul.f32 %v1891_v59, %v252_v37  ;;  %vm171_vm13 = vmand %vm91_vm12, %vm169_vm7 }
  0x43   :  { %v260_v8 = vmul.f32 %v2438_v42, %v1891_v59  ;;  %v302_v9 = vmul.f32 %v1921_v32, %v2401_v5  ;;  %v304_v6 = vsub.f32 -0.75, %v2337_v28  ;;  %v305_v38 = vmul.f32 %v303_v58, %v2419_v31  ;;  %vm172_vm3 = vmand %vm92_vm6, %vm170_vm4 }
  0x44   :  { %v2543_v34 = vadd.f32 %v253_v62, %v249_v39  ;;  %v1922_v12 = vadd.f32 1.75, %v2334_v27  ;;  %v1923_v14 = vadd.f32 1.75, %v2337_v28  ;;  %v1892_v37 = vsel %vm163_vm11, 1.0, %v2229_v22  ;;  %vm177_vm12 = vmxor %vm95_vm15, %vm2228_vm8 }
  0x45   :  { %v2551_v42 = vadd.f32 %v254_v63, %v250_v43  ;;  %v306_v5 = vmul.f32 %v304_v6, %v2427_v36  ;;  %v313_v23 = vsub.f32 -0.24999999, %v2334_v27  ;;  %v1893_v35 = vsel %vm164_vm14, 1.0, %v2229_v22  ;;  %vm178_vm6 = vmxor %vm96_vm0, %vm2228_vm8 }
  0x46   :  { %v263_v39 = vmul.f32 %v1892_v37, %v261_v45  ;;  %v269_v40 = vmul.f32 %v2452_v49, %v1892_v37  ;;  %v2562_v41 = vadd.f32 %v305_v38, %v301_v57  ;;  %v264_v43 = vmul.f32 %v1893_v35, %v262_v47  ;;  %vm179_vm15 = vmand %vm93_vm9, %vm177_vm12 }
  0x47   :  { %v270_v44 = vmul.f32 %v2455_v50, %v1893_v35  ;;  %v2570_v53 = vadd.f32 %v306_v5, %v302_v9  ;;  %v311_v24 = vmul.f32 %v1922_v12, %v2419_v31  ;;  %v312_v49 = vmul.f32 %v1923_v14, %v2427_v36  ;;  %vm180_vm0 = vmand %vm94_vm10, %vm178_vm6 }
  0x48   :  { %v2575_v45 = vadd.f32 %v263_v39, %v259_v61  ;;  %v314_v32 = vsub.f32 -0.24999999, %v2337_v28  ;;  %v315_v57 = vmul.f32 %v313_v23, %v2449_v48  ;;  %v1894_v47 = vsel %vm171_vm13, 1.0, %v2229_v22 }
  0x49   :  { %v2583_v50 = vadd.f32 %v264_v43, %v260_v8  ;;  %v1924_v31 = vadd.f32 1.25, %v2334_v27  ;;  %v1925_v51 = vadd.f32 1.25, %v2337_v28  ;;  %v1895_v58 = vsel %vm172_vm3, 1.0, %v2229_v22 }
  0x4a   :  { %v273_v36 = vmul.f32 %v1894_v47, %v271_v52  ;;  %v279_v59 = vmul.f32 %v2465_v56, %v1894_v47  ;;  %v316_v62 = vmul.f32 %v314_v32, %v2461_v54  ;;  %v274_v61 = vmul.f32 %v1895_v58, %v272_v55 }
  0x4b   :  { %v280_v63 = vmul.f32 %v2472_v60, %v1895_v58  ;;  %v2601_v8 = vadd.f32 %v315_v57, %v311_v24  ;;  %v321_v9 = vmul.f32 %v1924_v31, %v2449_v48  ;;  %v322_v6 = vmul.f32 %v1925_v51, %v2461_v54 }
  0x4c   :  { %v275_v52 = vadd.f32 %v273_v36, %v269_v40  ;;  %v2606_v56 = vadd.f32 %v316_v62, %v312_v49  ;;  %v323_v38 = vsub.f32 0.25000006, %v2334_v27  ;;  %v1896_v55 = vsel %vm179_vm15, 1.0, %v2229_v22 }
  0x4d   :  { %v276_v60 = vadd.f32 %v274_v61, %v270_v44  ;;  %v324_v12 = vsub.f32 0.25000006, %v2337_v28  ;;  %v1926_v48 = vadd.f32 0.75, %v2334_v27  ;;  %v1897_v0 = vsel %vm180_vm0, 1.0, %v2229_v22 }
  0x4e   :  { %v283_v14 = vmul.f32 %v1896_v55, %v281_v2  ;;  %v325_v37 = vmul.f32 %v323_v38, %v2483_v3  ;;  %v1927_v54 = vadd.f32 0.75, %v2337_v28  ;;  %v284_v5 = vmul.f32 %v1897_v0, %v282_v4 }
  0x4f   :  { %v326_v23 = vmul.f32 %v324_v12, %v2491_v10  ;;  %v331_v35 = vmul.f32 %v1926_v48, %v2483_v3  ;;  %v333_v39 = vsub.f32 0.75, %v2334_v27  ;;  %v334_v25 = vsub.f32 0.75, %v2337_v28 }
  0x50   :  { %v285_v40 = vadd.f32 %v283_v14, %v279_v59  ;;  %v2625_v43 = vadd.f32 %v325_v37, %v321_v9  ;;  %v332_v44 = vmul.f32 %v1927_v54, %v2491_v10  ;;  %v286_v2 = vadd.f32 %v284_v5, %v280_v63 }
  0x51   :  { %v2629_v24 = vadd.f32 %v326_v23, %v322_v6  ;;  %v335_v49 = vmul.f32 %v333_v39, %v2511_v46  ;;  %v1928_v26 = vadd.f32 0.24999999, %v2334_v27  ;;  %v336_v4 = vmul.f32 %v334_v25, %v2519_v30 }
  0x52   :  { %v1929_v3 = vadd.f32 0.24999999, %v2337_v28  ;;  %v343_v32 = vsub.f32 1.25, %v2334_v27  ;;  %v344_v57 = vsub.f32 1.25, %v2337_v28  ;;  %v1930_v31 = vadd.f32 -0.25000006, %v2334_v27 }
  0x53   :  { %v2637_v47 = vadd.f32 %v335_v49, %v331_v35  ;;  %v341_v10 = vmul.f32 %v1928_v26, %v2511_v46  ;;  %v1931_v51 = vadd.f32 -0.25000006, %v2337_v28  ;;  %v2642_v58 = vadd.f32 %v336_v4, %v332_v44 }
  0x54   :  { %v342_v36 = vmul.f32 %v1929_v3, %v2519_v30  ;;  %v345_v59 = vmul.f32 %v343_v32, %v2543_v34  ;;  %v346_v62 = vmul.f32 %v344_v57, %v2551_v42  ;;  %v351_v61 = vmul.f32 %v1930_v31, %v2543_v34 }
  0x55   :  { %v352_v63 = vmul.f32 %v1931_v51, %v2551_v42  ;;  %v353_v9 = vsub.f32 1.7500001, %v2334_v27  ;;  %v354_v46 = vsub.f32 1.7500001, %v2337_v28  ;;  %v1932_v55 = vadd.f32 -0.75, %v2334_v27 }
  0x56   :  { %v2651_v6 = vadd.f32 %v345_v59, %v341_v10  ;;  %v2653_v38 = vadd.f32 %v346_v62, %v342_v36  ;;  %v1933_v30 = vadd.f32 -0.75, %v2337_v28  ;;  %v363_v34 = vsub.f32 2.25, %v2334_v27 }
  0x57   :  { %v355_v12 = vmul.f32 %v353_v9, %v2575_v45  ;;  %v356_v48 = vmul.f32 %v354_v46, %v2583_v50  ;;  %v364_v42 = vsub.f32 2.25, %v2337_v28  ;;  %v361_v0 = vmul.f32 %v1932_v55, %v2575_v45 }
  0x58   :  { %v362_v14 = vmul.f32 %v1933_v30, %v2583_v50  ;;  %v1934_v37 = vadd.f32 -1.25, %v2334_v27  ;;  %v1935_v54 = vadd.f32 -1.25, %v2337_v28  ;;  %v365_v35 = vmul.f32 %v363_v34, %v275_v52 }
  0x59   :  { %v2665_v5 = vadd.f32 %v355_v12, %v351_v61  ;;  %v2667_v23 = vadd.f32 %v356_v48, %v352_v63  ;;  %v366_v39 = vmul.f32 %v364_v42, %v276_v60  ;;  %v373_v49 = vsub.f32 2.75, %v2334_v27 }
  0x5a   :  { %v371_v44 = vmul.f32 %v1934_v37, %v275_v52  ;;  %v372_v25 = vmul.f32 %v1935_v54, %v276_v60  ;;  %v374_v26 = vsub.f32 2.75, %v2337_v28  ;;  %v2671_v4 = vadd.f32 %v365_v35, %v361_v0 }
  0x5b   :  { %v2673_v45 = vadd.f32 %v366_v39, %v362_v14  ;;  %v2676_v50 = vmul.f32 0.8333333, %v2264_v1  ;;  %v1936_v3 = vadd.f32 1.8333334, %v2340_v29  ;;  %v375_v32 = vmul.f32 %v373_v49, %v285_v40 }
  0x5c   :  { %v376_v57 = vmul.f32 %v374_v26, %v286_v2  ;;  %v385_v10 = vsub.f32 -0.5, %v2340_v29  ;;  %v1938_v52 = vadd.f32 1.5, %v2340_v29  ;;  %v400_v62 = vsub.f32 -0.16666666, %v2340_v29 }
  0x5d   :  { %v1937_v60 = vadd.f32 1.8333334, %v2676_v50  ;;  %v383_v27 = vmul.f32 %v1936_v3, %v2521_v33  ;;  %v386_v28 = vsub.f32 -0.5, %v2676_v50  ;;  %v1939_v31 = vadd.f32 1.5, %v2676_v50 }
  0x5e   :  { %v2685_v51 = vadd.f32 %v375_v32, %v371_v44  ;;  %v2687_v1 = vadd.f32 %v376_v57, %v372_v25  ;;  %v387_v40 = vmul.f32 %v385_v10, %v2562_v41  ;;  %v398_v2 = vmul.f32 %v1938_v52, %v2562_v41 }
  0x5f   :  { %v384_v36 = vmul.f32 %v1937_v60, %v2531_v7  ;;  %v388_v59 = vmul.f32 %v386_v28, %v2570_v53  ;;  %v399_v33 = vmul.f32 %v1939_v31, %v2570_v53  ;;  %v401_v63 = vsub.f32 -0.16666666, %v2676_v50 }
  0x60   :  { %v389_v61 = vadd.f32 %v387_v40, %v383_v27  ;;  %v1940_v9 = vadd.f32 1.1666666, %v2340_v29  ;;  %v1941_v46 = vadd.f32 1.1666666, %v2676_v50  ;;  %v402_v30 = vmul.f32 %v400_v62, %v2601_v8 }
  0x61   :  { %v390_v55 = vadd.f32 %v388_v59, %v384_v36  ;;  %v415_v7 = vsub.f32 0.1666667, %v2340_v29  ;;  %v416_v41 = vsub.f32 0.1666667, %v2676_v50  ;;  %v403_v53 = vmul.f32 %v401_v63, %v2606_v56 }
  0x62   :  { %v392_v12 = vmul.f32 %v391_v11, %v389_v61  ;;  %v413_v48 = vmul.f32 %v1940_v9, %v2601_v8  ;;  %v414_v34 = vmul.f32 %v1941_v46, %v2606_v56  ;;  %v404_v0 = vadd.f32 %v402_v30, %v398_v2 }
  0x63   :  { %v393_v42 = vmul.f32 %v391_v11, %v390_v55  ;;  %v417_v14 = vmul.f32 %v415_v7, %v2625_v43  ;;  %v418_v37 = vmul.f32 %v416_v41, %v2629_v24  ;;  %v405_v35 = vadd.f32 %v403_v53, %v399_v33 }
  0x64   :  { %v394_v54 = vadd.f32 %v392_v12, %v2309_v17  ;;  %v1942_v39 = vadd.f32 0.8333333, %v2340_v29  ;;  %v1943_v44 = vadd.f32 0.8333333, %v2676_v50  ;;  %v407_v56 = vmul.f32 %v406_v13, %v404_v0 }
  0x65   :  { %v395_v8 = vadd.f32 %v393_v42, %v2316_v21  ;;  %v419_v25 = vadd.f32 %v417_v14, %v413_v48  ;;  %v420_v11 = vadd.f32 %v418_v37, %v414_v34  ;;  %v408_v49 = vmul.f32 %v406_v13, %v405_v35 }
  0x66   :  { %v428_v26 = vmul.f32 %v1942_v39, %v2625_v43  ;;  %v429_v3 = vmul.f32 %v1943_v44, %v2629_v24  ;;  %v430_v32 = vsub.f32 0.5, %v2340_v29  ;;  %v409_v17 = vadd.f32 %v407_v56, %v394_v54 }
  0x67   :  { %v422_v57 = vmul.f32 %v421_v15, %v419_v25  ;;  %v423_v10 = vmul.f32 %v421_v15, %v420_v11  ;;  %v431_v52 = vsub.f32 0.5, %v2676_v50  ;;  %v410_v21 = vadd.f32 %v408_v49, %v395_v8 }
  0x68   :  { %v432_v60 = vmul.f32 %v430_v32, %v2637_v47  ;;  %v1944_v27 = vadd.f32 0.5, %v2340_v29  ;;  %v1945_v13 = vadd.f32 0.5, %v2676_v50  ;;  %v445_v28 = vsub.f32 0.8333333, %v2340_v29 }
  0x69   :  { %v424_v43 = vadd.f32 %v422_v57, %v409_v17  ;;  %v433_v24 = vmul.f32 %v431_v52, %v2642_v58  ;;  %v446_v31 = vsub.f32 0.8333333, %v2676_v50  ;;  %v425_v40 = vadd.f32 %v423_v10, %v410_v21 }
  0x6a   :  { %v434_v15 = vadd.f32 %v432_v60, %v428_v26  ;;  %v443_v2 = vmul.f32 %v1944_v27, %v2637_v47  ;;  %v444_v36 = vmul.f32 %v1945_v13, %v2642_v58  ;;  %v447_v33 = vmul.f32 %v445_v28, %v2651_v6 }
  0x6b   :  { %v435_v59 = vadd.f32 %v433_v24, %v429_v3  ;;  %v448_v62 = vmul.f32 %v446_v31, %v2653_v38  ;;  %v1946_v61 = vadd.f32 0.16666666, %v2340_v29  ;;  %v1947_v9 = vadd.f32 0.16666666, %v2676_v50 }
  0x6c   :  { %v437_v63 = vmul.f32 %v436_v16, %v434_v15  ;;  %v460_v46 = vsub.f32 1.1666667, %v2340_v29  ;;  %v461_v55 = vsub.f32 1.1666667, %v2676_v50  ;;  %v449_v58 = vadd.f32 %v447_v33, %v443_v2 }
  0x6d   :  { %v438_v47 = vmul.f32 %v436_v16, %v435_v59  ;;  %v450_v30 = vadd.f32 %v448_v62, %v444_v36  ;;  %v458_v7 = vmul.f32 %v1946_v61, %v2651_v6  ;;  %v459_v12 = vmul.f32 %v1947_v9, %v2653_v38 }
  0x6e   :  { %v439_v41 = vadd.f32 %v437_v63, %v424_v43  ;;  %v462_v53 = vmul.f32 %v460_v46, %v2665_v5  ;;  %v463_v48 = vmul.f32 %v461_v55, %v2667_v23  ;;  %v452_v42 = vmul.f32 %v451_v18, %v449_v58 }
  0x6f   :  { %v440_v34 = vadd.f32 %v438_v47, %v425_v40  ;;  %v453_v16 = vmul.f32 %v451_v18, %v450_v30  ;;  %v1948_v0 = vadd.f32 -0.1666667, %v2340_v29  ;;  %v1949_v37 = vadd.f32 -0.1666667, %v2676_v50 }
  0x70   :  { %v464_v14 = vadd.f32 %v462_v53, %v458_v7  ;;  %v465_v6 = vadd.f32 %v463_v48, %v459_v12  ;;  %v475_v38 = vsub.f32 1.5, %v2340_v29  ;;  %v454_v54 = vadd.f32 %v452_v42, %v439_v41 }
  0x71   :  { %v455_v35 = vadd.f32 %v453_v16, %v440_v34  ;;  %v473_v39 = vmul.f32 %v1948_v0, %v2665_v5  ;;  %v476_v44 = vsub.f32 1.5, %v2676_v50  ;;  %v474_v18 = vmul.f32 %v1949_v37, %v2667_v23  ;;  %v2772_v5 = vld [vmem:[%s4276_s2 + $0x10] sm:$0xff] }
  0x72   :  { %v467_v8 = vmul.f32 %v466_v19, %v464_v14  ;;  %v468_v56 = vmul.f32 %v466_v19, %v465_v6  ;;  %v477_v25 = vmul.f32 %v475_v38, %v2671_v4  ;;  %v1950_v49 = vadd.f32 -0.5, %v2340_v29  ;;  %v2777_v19 = vld [vmem:[%s4276_s2 + $0x18] sm:$0xff] }
  0x73   :  { %v478_v11 = vmul.f32 %v476_v44, %v2673_v45  ;;  %v1951_v26 = vadd.f32 -0.5, %v2676_v50  ;;  %v490_v3 = vsub.f32 1.8333334, %v2340_v29  ;;  %v491_v17 = vsub.f32 1.8333334, %v2676_v50 }
  0x74   :  { %v469_v23 = vadd.f32 %v467_v8, %v454_v54  ;;  %v479_v32 = vadd.f32 %v477_v25, %v473_v39  ;;  %v488_v29 = vmul.f32 %v1950_v49, %v2671_v4  ;;  %v503_v27 = vmul.f32 0.5, %v2772_v5 }
  0x75   :  { %v480_v57 = vadd.f32 %v478_v11, %v474_v18  ;;  %v489_v10 = vmul.f32 %v1951_v26, %v2673_v45  ;;  %v492_v52 = vmul.f32 %v490_v3, %v2685_v51  ;;  %v493_v60 = vmul.f32 %v491_v17, %v2687_v1 }
  0x76   :  { %v482_v21 = vmul.f32 %v481_v20, %v479_v32  ;;  %v504_v13 = vmul.f32 0.5, %v2777_v19  ;;  %v470_v50 = vadd.f32 %v468_v56, %v455_v35  ;;  %v496_v28 = vstv %s2748_s5 }
  0x77   :  { %v483_v43 = vmul.f32 %v481_v20, %v480_v57  ;;  %v494_v24 = vadd.f32 %v492_v52, %v488_v29  ;;  %v495_v4 = vadd.f32 %v493_v60, %v489_v10  ;;  %2188 = vtanh.f32 %v503_v27 }
  0x78   :  { %vm518_vm9 = vcmp.ge.f32.partialorder %v2772_v5, -2.2  ;;  %vm520_vm10 = vcmp.ge.f32.partialorder %v2772_v5, -1.8  ;;  %2190 = vtanh.f32 %v504_v13  ;;  %vm519_vm2 = vcmp.ge.f32.partialorder %v2777_v19, -2.2 }
  0x79   :  { %vm521_vm5 = vcmp.ge.f32.partialorder %v2777_v19, -1.8  ;;  %vm542_vm1 = vmxor %vm520_vm10, %vm2228_vm8  ;;  %v484_v20 = vadd.f32 %v482_v21, %v469_v23  ;;  %v497_v45 = vmul.f32 %v496_v28, %v494_v24  ;;  %vm522_vm11 = vcmp.ge.f32.partialorder %v2772_v5, -1.4 }
  0x7a   :  { %vm543_vm14 = vmxor %vm521_vm5, %vm2228_vm8  ;;  %v485_v51 = vadd.f32 %v483_v43, %v470_v50  ;;  %v498_v1 = vmul.f32 %v496_v28, %v495_v4  ;;  %vm523_vm7 = vcmp.ge.f32.partialorder %v2777_v19, -1.4  ;;  %v513_v40 = vstv %s2780_s10  ;;  %s4188_s10 = sld [smem:[#allocation4 + $0x1b]] }
  0x7b   :  { %vm2809_vm4 = vmand %vm518_vm9, %vm542_vm1  ;;  %v2819_v15 = vadd.f32 %v497_v45, %v484_v20  ;;  %vm524_vm12 = vcmp.ge.f32.partialorder %v2772_v5, -1.0  ;;  %vm525_vm6 = vcmp.ge.f32.partialorder %v2777_v19, -1.0  ;;  %vm527_vm9 = vcmp.ge.f32.partialorder %v2777_v19, -0.6 }
  0x7c   :  { %vm545_vm13 = vmand %vm519_vm2, %vm543_vm14  ;;  %v2827_v2 = vadd.f32 %v498_v1, %v485_v51  ;;  %vm528_vm2 = vcmp.ge.f32.partialorder %v2772_v5, -0.19999999  ;;  %v1952_v36 = vsel %vm2809_vm4, 1.0, %v2229_v22  ;;  %v836_v33 = vstv %s2790_s11  ;;  %s4201_s11 = sld [smem:[#allocation4 + $0x1c]] }
  0x7d   :  { %vm550_vm3 = vmxor %vm522_vm11, %vm2228_vm8  ;;  %v1953_v59 = vsel %vm545_vm13, 1.0, %v2229_v22  ;;  %v851_v62 = vstv %s2795_s12  ;;  %v2848_v9 = vmul.f32 2.5, %v2772_v5  ;;  %v2851_v46 = vmul.f32 2.5, %v2777_v19  ;;  %s4222_s12 = sld [smem:[#allocation4 + $0x1d]] }
  0x7e   :  { %vm551_vm0 = vmxor %vm523_vm7, %vm2228_vm8  ;;  %v2858_v47 = vmul.f32 1.25, %v2772_v5  ;;  %v2861_v58 = vmul.f32 1.25, %v2777_v19  ;;  %v2864_v30 = vmul.f32 0.8333333, %v2772_v5  ;;  %v2867_v7 = vmul.f32 0.8333333, %v2777_v19 }
  0x7f   :  { %vm552_vm14 = vmand %vm520_vm10, %vm550_vm3  ;;  %vm530_vm10 = vcmp.ge.f32.partialorder %v2772_v5, 0.20000005  ;;  %vm531_vm4 = vcmp.ge.f32.partialorder %v2777_v19, 0.20000005  ;;  %v1974_v53 = vadd.f32 5.5, %v2848_v9  ;;  %v1975_v48 = vadd.f32 5.5, %v2851_v46 }
  0x80   :  { %vm553_vm15 = vmand %vm521_vm5, %vm551_vm0  ;;  %v1954_v61 = vsel %vm552_vm14, 1.0, %v2229_v22  ;;  %v636_v34 = vsub.f32 -3.5, %v2848_v9  ;;  %v637_v0 = vsub.f32 -3.5, %v2851_v46  ;;  %v1976_v14 = vadd.f32 4.5, %v2848_v9 }
  0x81   :  { %v1955_v63 = vsel %vm553_vm15, 1.0, %v2229_v22  ;;  %vm558_vm1 = vmxor %vm524_vm12, %vm2228_vm8  ;;  %v2189_v55 = vpop.eup %2188  ;;  %v866_v6 = vstv %s2813_s13  ;;  %v634_v54 = vmul.f32 %v1974_v53, %v1952_v36  ;;  %v635_v35 = vmul.f32 %v1975_v48, %v1953_v59  ;;  %s4236_s13 = sld [smem:[#allocation4 + $0x1e]] }
  0x82   :  { %vm559_vm5 = vmxor %vm525_vm6, %vm2228_vm8  ;;  %v2191_v41 = vpop.eup %2190  ;;  %v507_v12 = vmul.f32 0.5, %v2189_v55  ;;  %v638_v44 = vmul.f32 %v1954_v61, %v636_v34  ;;  %v639_v8 = vmul.f32 %v1955_v63, %v637_v0  ;;  %v1977_v56 = vadd.f32 4.5, %v2851_v46 }
  0x83   :  { %vm560_vm13 = vmand %vm522_vm11, %vm558_vm1  ;;  %v508_v42 = vmul.f32 0.5, %v2191_v41  ;;  %vm4283_vm11 = vcmp.ge.f32.partialorder %v2772_v5, -0.6  ;;  %vm533_vm1 = vcmp.ge.f32.partialorder %v2777_v19, 0.6  ;;  %v646_v11 = vsub.f32 -2.5, %v2848_v9 }
  0x84   :  { %vm2877_vm3 = vmand %vm523_vm7, %vm559_vm5  ;;  %v509_v37 = vadd.f32 0.5, %v507_v12  ;;  %v1956_v38 = vsel %vm560_vm13, 1.0, %v2229_v22  ;;  %vm532_vm7 = vcmp.ge.f32.partialorder %v2772_v5, 0.6  ;;  %v647_v49 = vsub.f32 -2.5, %v2851_v46 }
  0x85   :  { %vm566_vm15 = vmxor %vm4283_vm11, %vm2228_vm8  ;;  %v510_v39 = vadd.f32 0.5, %v508_v42  ;;  %v1957_v25 = vsel %vm2877_vm3, 1.0, %v2229_v22  ;;  %v2906_v23 = vadd.f32 %v638_v44, %v634_v54  ;;  %v644_v32 = vmul.f32 %v1976_v14, %v1954_v61 }
  0x86   :  { %vm567_vm0 = vmxor %vm527_vm9, %vm2228_vm8  ;;  %v511_v18 = vmul.f32 %v509_v37, %v2772_v5  ;;  %v2914_v29 = vadd.f32 %v639_v8, %v635_v35  ;;  %v648_v10 = vmul.f32 %v1956_v38, %v646_v11  ;;  %vm4284_vm13 = vcmp.ge.f32.partialorder %v2777_v19, -0.19999999 }
  0x87   :  { %vm568_vm14 = vmand %vm524_vm12, %vm566_vm15  ;;  %v512_v26 = vmul.f32 %v510_v39, %v2777_v19  ;;  %v645_v21 = vmul.f32 %v1977_v56, %v1955_v63  ;;  %v1978_v60 = vadd.f32 3.5, %v2848_v9  ;;  %v1979_v27 = vadd.f32 3.5, %v2851_v46 }
  0x88   :  { %vm569_vm5 = vmand %vm525_vm6, %vm567_vm0  ;;  %v1958_v3 = vsel %vm568_vm14, 1.0, %v2229_v22  ;;  %v514_v17 = vmul.f32 %v513_v40, %v511_v18  ;;  %vm534_vm6 = vcmp.ge.f32.partialorder %v2772_v5, 1.0  ;;  %vm535_vm11 = vcmp.ge.f32.partialorder %v2777_v19, 1.0 }
  0x89   :  { %v1959_v57 = vsel %vm569_vm5, 1.0, %v2229_v22  ;;  %vm574_vm12 = vmxor %vm528_vm2, %vm2228_vm8  ;;  %v515_v52 = vmul.f32 %v513_v40, %v512_v26  ;;  %vm4285_vm15 = vcmp.ge.f32.partialorder %v2772_v5, -0.6  ;;  %v649_v50 = vmul.f32 %v1957_v25, %v647_v49 }
  0x8a   :  { %vm575_vm3 = vmxor %vm4284_vm13, %vm2228_vm8  ;;  %v2925_v13 = vadd.f32 %v514_v17, %v2819_v15  ;;  %v656_v43 = vsub.f32 -1.5, %v2848_v9  ;;  %v657_v24 = vsub.f32 -1.5, %v2851_v46  ;;  %v2938_v20 = vadd.f32 %v648_v10, %v644_v32 }
  0x8b   :  { %vm576_vm0 = vmand %vm4285_vm15, %vm574_vm12  ;;  %v2933_v28 = vadd.f32 %v515_v52, %v2827_v2  ;;  %v654_v45 = vmul.f32 %v1978_v60, %v1956_v38  ;;  %v655_v1 = vmul.f32 %v1979_v27, %v1957_v25  ;;  %vm536_vm12 = vcmp.ge.f32.partialorder %v2772_v5, 1.4000001 }
  0x8c   :  { %vm577_vm14 = vmand %vm527_vm9, %vm575_vm3  ;;  %v1960_v4 = vsel %vm576_vm0, 1.0, %v2229_v22  ;;  %v658_v31 = vmul.f32 %v1958_v3, %v656_v43  ;;  %v659_v40 = vmul.f32 %v1959_v57, %v657_v24  ;;  %v1980_v15 = vadd.f32 2.5, %v2848_v9 }
  0x8d   :  { %v1961_v51 = vsel %vm577_vm14, 1.0, %v2229_v22  ;;  %vm582_vm5 = vmxor %vm530_vm10, %vm2228_vm8  ;;  %v1981_v2 = vadd.f32 2.5, %v2851_v46  ;;  %v666_v36 = vsub.f32 -0.49999997, %v2848_v9  ;;  %v667_v59 = vsub.f32 -0.49999997, %v2851_v46 }
  0x8e   :  { %vm583_vm9 = vmxor %vm531_vm4, %vm2228_vm8  ;;  %vm537_vm13 = vcmp.ge.f32.partialorder %v2777_v19, 1.4000001  ;;  %v2955_v61 = vadd.f32 %v649_v50, %v645_v21  ;;  %v2957_v63 = vadd.f32 %v658_v31, %v654_v45  ;;  %v1982_v55 = vadd.f32 1.5, %v2848_v9 }
  0x8f   :  { %vm584_vm3 = vmand %vm528_vm2, %vm582_vm5  ;;  %v1983_v41 = vadd.f32 1.5, %v2851_v46  ;;  %vm4286_vm15 = vcmp.ge.f32.partialorder %v2777_v19, -0.19999999  ;;  %v2964_v53 = vadd.f32 %v659_v40, %v655_v1  ;;  %v664_v48 = vmul.f32 %v1980_v15, %v1958_v3 }
  0x90   :  { %vm585_vm0 = vmand %vm4286_vm15, %vm583_vm9  ;;  %v1962_v12 = vsel %vm584_vm3, 1.0, %v2229_v22  ;;  %v668_v34 = vmul.f32 %v1960_v4, %v666_v36  ;;  %v665_v16 = vmul.f32 %v1981_v2, %v1959_v57  ;;  %v669_v0 = vmul.f32 %v1961_v51, %v667_v59 }
  0x91   :  { %v1963_v42 = vsel %vm585_vm0, 1.0, %v2229_v22  ;;  %vm590_vm2 = vmxor %vm532_vm7, %vm2228_vm8  ;;  %v674_v14 = vmul.f32 %v1982_v55, %v1960_v4  ;;  %vm538_vm14 = vcmp.ge.f32.partialorder %v2772_v5, 1.8  ;;  %v675_v37 = vmul.f32 %v1983_v41, %v1961_v51 }
  0x92   :  { %vm591_vm5 = vmxor %vm533_vm1, %vm2228_vm8  ;;  %v676_v38 = vsub.f32 0.5000001, %v2848_v9  ;;  %v677_v54 = vsub.f32 0.5000001, %v2851_v46  ;;  %v1984_v35 = vadd.f32 0.49999997, %v2848_v9  ;;  %v2980_v39 = vadd.f32 %v668_v34, %v664_v48 }
  0x93   :  { %vm539_vm9 = vcmp.ge.f32.partialorder %v2777_v19, 1.8  ;;  %vm592_vm3 = vmand %vm530_vm10, %vm590_vm2  ;;  %v1985_v44 = vadd.f32 0.49999997, %v2851_v46  ;;  %v686_v8 = vsub.f32 1.5, %v2848_v9  ;;  %v687_v56 = vsub.f32 1.5, %v2851_v46 }
  0x94   :  { %vm593_vm15 = vmand %vm531_vm4, %vm591_vm5  ;;  %v1964_v18 = vsel %vm592_vm3, 1.0, %v2229_v22  ;;  %v678_v25 = vmul.f32 %v1962_v12, %v676_v38  ;;  %v679_v11 = vmul.f32 %v1963_v42, %v677_v54  ;;  %v684_v49 = vmul.f32 %v1984_v35, %v1962_v12 }
  0x95   :  { %v1965_v26 = vsel %vm593_vm15, 1.0, %v2229_v22  ;;  %vm598_vm10 = vmxor %vm534_vm6, %vm2228_vm8  ;;  %v2992_v3 = vadd.f32 %v669_v0, %v665_v16  ;;  %v688_v32 = vmul.f32 %v1964_v18, %v686_v8  ;;  %v1986_v17 = vadd.f32 -0.5000001, %v2848_v9 }
  0x96   :  { %vm540_vm0 = vcmp.ge.f32.partialorder %v2772_v5, 2.2  ;;  %vm599_vm4 = vmxor %vm535_vm11, %vm2228_vm8  ;;  %v2999_v57 = vadd.f32 %v678_v25, %v674_v14  ;;  %v685_v10 = vmul.f32 %v1985_v44, %v1963_v42  ;;  %v689_v52 = vmul.f32 %v1965_v26, %v687_v56 }
  0x97   :  { %v1987_v21 = vadd.f32 -0.5000001, %v2851_v46  ;;  %vm541_vm2 = vcmp.ge.f32.partialorder %v2777_v19, 2.2  ;;  %vm600_vm5 = vmand %vm532_vm7, %vm598_vm10  ;;  %v3005_v60 = vadd.f32 %v679_v11, %v675_v37  ;;  %v694_v27 = vmul.f32 %v1986_v17, %v1964_v18 }
  0x98   :  { %v696_v50 = vsub.f32 2.5, %v2848_v9  ;;  %v697_v43 = vsub.f32 2.5, %v2851_v46  ;;  %vm601_vm3 = vmand %vm533_vm1, %vm599_vm4  ;;  %v1966_v24 = vsel %vm600_vm5, 1.0, %v2229_v22  ;;  %v3012_v4 = vadd.f32 %v688_v32, %v684_v49 }
  0x99   :  { %v695_v45 = vmul.f32 %v1987_v21, %v1965_v26  ;;  %v1988_v51 = vadd.f32 -1.5, %v2848_v9  ;;  %v1967_v1 = vsel %vm601_vm3, 1.0, %v2229_v22  ;;  %vm606_vm7 = vmxor %vm536_vm12, %vm2228_vm8  ;;  %v1989_v40 = vadd.f32 -1.5, %v2851_v46 }
  0x9a   :  { %v698_v31 = vmul.f32 %v1966_v24, %v696_v50  ;;  %v706_v15 = vsub.f32 3.5000002, %v2848_v9  ;;  %vm607_vm1 = vmxor %vm537_vm13, %vm2228_vm8  ;;  %v3024_v2 = vadd.f32 %v689_v52, %v685_v10  ;;  %v699_v36 = vmul.f32 %v1967_v1, %v697_v43 }
  0x9b   :  { %v707_v59 = vsub.f32 3.5000002, %v2851_v46  ;;  %v1990_v55 = vadd.f32 -2.5, %v2848_v9  ;;  %vm608_vm15 = vmand %vm534_vm6, %vm606_vm7  ;;  %v704_v12 = vmul.f32 %v1988_v51, %v1966_v24  ;;  %v705_v48 = vmul.f32 %v1989_v40, %v1967_v1 }
  0x9c   :  { %v3030_v41 = vadd.f32 %v698_v31, %v694_v27  ;;  %v1991_v34 = vadd.f32 -2.5, %v2851_v46  ;;  %vm609_vm10 = vmand %vm535_vm11, %vm607_vm1  ;;  %v1968_v42 = vsel %vm608_vm15, 1.0, %v2229_v22  ;;  %v3036_v16 = vadd.f32 %v699_v36, %v695_v45 }
  0x9d   :  { %v716_v0 = vsub.f32 4.5, %v2848_v9  ;;  %v717_v14 = vsub.f32 4.5, %v2851_v46  ;;  %v1969_v37 = vsel %vm609_vm10, 1.0, %v2229_v22  ;;  %vm614_vm6 = vmxor %vm538_vm14, %vm2228_vm8  ;;  %v708_v38 = vmul.f32 %v1968_v42, %v706_v15 }
  0x9e   :  { %v714_v54 = vmul.f32 %v1990_v55, %v1968_v42  ;;  %v1992_v35 = vadd.f32 -3.5000002, %v2848_v9  ;;  %vm615_vm11 = vmxor %vm539_vm9, %vm2228_vm8  ;;  %v709_v44 = vmul.f32 %v1969_v37, %v707_v59  ;;  %v715_v8 = vmul.f32 %v1991_v34, %v1969_v37 }
  0x9f   :  { %v1993_v56 = vadd.f32 -3.5000002, %v2851_v46  ;;  %v726_v18 = vsub.f32 5.5, %v2848_v9  ;;  %vm616_vm4 = vmand %vm536_vm12, %vm614_vm6  ;;  %v727_v25 = vsub.f32 5.5, %v2851_v46  ;;  %v1994_v11 = vadd.f32 2.75, %v2858_v47 }
  0xa0   :  { %v1995_v49 = vadd.f32 2.75, %v2861_v58  ;;  %v738_v26 = vsub.f32 -1.25, %v2858_v47  ;;  %vm617_vm5 = vmand %vm537_vm13, %vm615_vm11  ;;  %v1970_v32 = vsel %vm616_vm4, 1.0, %v2229_v22  ;;  %v3059_v17 = vadd.f32 %v708_v38, %v704_v12 }
  0xa1   :  { %v739_v9 = vsub.f32 -1.25, %v2861_v58  ;;  %v1996_v10 = vadd.f32 2.25, %v2858_v47  ;;  %v1971_v52 = vsel %vm617_vm5, 1.0, %v2229_v22  ;;  %vm622_vm12 = vmxor %vm540_vm0, %vm2228_vm8  ;;  %v3067_v46 = vadd.f32 %v709_v44, %v705_v48 }
  0xa2   :  { %v718_v21 = vmul.f32 %v1970_v32, %v716_v0  ;;  %v736_v27 = vmul.f32 %v1994_v11, %v2906_v23  ;;  %vm623_vm13 = vmxor %vm541_vm2, %vm2228_vm8  ;;  %v719_v50 = vmul.f32 %v1971_v52, %v717_v14  ;;  %v724_v43 = vmul.f32 %v1992_v35, %v1970_v32 }
  0xa3   :  { %v737_v24 = vmul.f32 %v1995_v49, %v2914_v29  ;;  %v740_v45 = vmul.f32 %v738_v26, %v2938_v20  ;;  %vm624_vm3 = vmand %vm538_vm14, %vm622_vm12  ;;  %v725_v1 = vmul.f32 %v1993_v56, %v1971_v52  ;;  %v741_v31 = vmul.f32 %v739_v9, %v2955_v61 }
  0xa4   :  { %v3077_v51 = vadd.f32 %v718_v21, %v714_v54  ;;  %v1997_v23 = vadd.f32 2.25, %v2861_v58  ;;  %vm625_vm0 = vmand %vm539_vm9, %vm623_vm13  ;;  %v1972_v40 = vsel %vm624_vm3, 1.0, %v2229_v22  ;;  %v3084_v15 = vadd.f32 %v719_v50, %v715_v8 }
  0xa5   :  { %v746_v29 = vmul.f32 %v1996_v10, %v2938_v20  ;;  %v748_v36 = vsub.f32 -0.75, %v2858_v47  ;;  %v1973_v5 = vsel %vm625_vm0, 1.0, %v2229_v22  ;;  %v728_v59 = vmul.f32 %v1972_v40, %v726_v18 }
  0xa6   :  { %v3089_v55 = vadd.f32 %v740_v45, %v736_v27  ;;  %v3091_v12 = vadd.f32 %v741_v31, %v737_v24  ;;  %v729_v48 = vmul.f32 %v1973_v5, %v727_v25  ;;  %v749_v34 = vsub.f32 -0.75, %v2861_v58 }
  0xa7   :  { %v750_v19 = vmul.f32 %v748_v36, %v2957_v63  ;;  %v1998_v42 = vadd.f32 1.75, %v2858_v47  ;;  %v747_v0 = vmul.f32 %v1997_v23, %v2955_v61  ;;  %v1999_v20 = vadd.f32 1.75, %v2861_v58 }
  0xa8   :  { %v758_v14 = vsub.f32 -0.24999999, %v2858_v47  ;;  %v759_v37 = vsub.f32 -0.24999999, %v2861_v58  ;;  %v3100_v38 = vadd.f32 %v728_v59, %v724_v43  ;;  %v3102_v54 = vadd.f32 %v729_v48, %v725_v1 }
  0xa9   :  { %v751_v35 = vmul.f32 %v749_v34, %v2964_v53  ;;  %v756_v44 = vmul.f32 %v1998_v42, %v2957_v63  ;;  %v3106_v8 = vadd.f32 %v750_v19, %v746_v29  ;;  %v757_v56 = vmul.f32 %v1999_v20, %v2964_v53 }
  0xaa   :  { %v760_v61 = vmul.f32 %v758_v14, %v2980_v39  ;;  %v2000_v18 = vadd.f32 1.25, %v2858_v47  ;;  %v761_v25 = vmul.f32 %v759_v37, %v2992_v3  ;;  %v2001_v11 = vadd.f32 1.25, %v2861_v58 }
  0xab   :  { %v768_v49 = vsub.f32 0.25000006, %v2858_v47  ;;  %v769_v26 = vsub.f32 0.25000006, %v2861_v58  ;;  %v3115_v32 = vadd.f32 %v751_v35, %v747_v0  ;;  %v2002_v53 = vadd.f32 0.75, %v2858_v47 }
  0xac   :  { %v3117_v9 = vadd.f32 %v760_v61, %v756_v44  ;;  %v766_v63 = vmul.f32 %v2000_v18, %v2980_v39  ;;  %v767_v10 = vmul.f32 %v2001_v11, %v2992_v3  ;;  %v2003_v27 = vadd.f32 0.75, %v2861_v58 }
  0xad   :  { %v770_v52 = vmul.f32 %v768_v49, %v2999_v57  ;;  %v771_v21 = vmul.f32 %v769_v26, %v3005_v60  ;;  %v776_v50 = vmul.f32 %v2002_v53, %v2999_v57  ;;  %v778_v43 = vsub.f32 0.75, %v2858_v47 }
  0xae   :  { %v779_v24 = vsub.f32 0.75, %v2861_v58  ;;  %v2004_v45 = vadd.f32 0.24999999, %v2858_v47  ;;  %v3129_v1 = vadd.f32 %v761_v25, %v757_v56  ;;  %v777_v3 = vmul.f32 %v2003_v27, %v3005_v60 }
  0xaf   :  { %v3131_v39 = vadd.f32 %v770_v52, %v766_v63  ;;  %v2005_v31 = vadd.f32 0.24999999, %v2861_v58  ;;  %v3135_v23 = vadd.f32 %v771_v21, %v767_v10  ;;  %v780_v40 = vmul.f32 %v778_v43, %v3012_v4 }
  0xb0   :  { %v781_v57 = vmul.f32 %v779_v24, %v3024_v2  ;;  %v788_v29 = vsub.f32 1.25, %v2858_v47  ;;  %v786_v36 = vmul.f32 %v2004_v45, %v3012_v4  ;;  %v789_v5 = vsub.f32 1.25, %v2861_v58 }
  0xb1   :  { %v2006_v59 = vadd.f32 -0.25000006, %v2858_v47  ;;  %v2007_v48 = vadd.f32 -0.25000006, %v2861_v58  ;;  %v3144_v34 = vadd.f32 %v780_v40, %v776_v50  ;;  %v787_v60 = vmul.f32 %v2005_v31, %v3024_v2 }
  0xb2   :  { %v790_v19 = vmul.f32 %v788_v29, %v3030_v41  ;;  %v798_v42 = vsub.f32 1.7500001, %v2858_v47  ;;  %v3149_v0 = vadd.f32 %v781_v57, %v777_v3  ;;  %v791_v20 = vmul.f32 %v789_v5, %v3036_v16 }
  0xb3   :  { %v796_v4 = vmul.f32 %v2006_v59, %v3030_v41  ;;  %v799_v14 = vsub.f32 1.7500001, %v2861_v58  ;;  %v797_v37 = vmul.f32 %v2007_v48, %v3036_v16  ;;  %v2008_v44 = vadd.f32 -0.75, %v2858_v47 }
  0xb4   :  { %v800_v35 = vmul.f32 %v798_v42, %v3059_v17  ;;  %v2009_v2 = vadd.f32 -0.75, %v2861_v58  ;;  %v3158_v56 = vadd.f32 %v790_v19, %v786_v36  ;;  %v808_v18 = vsub.f32 2.25, %v2858_v47 }
  0xb5   :  { %v801_v61 = vmul.f32 %v799_v14, %v3067_v46  ;;  %v809_v25 = vsub.f32 2.25, %v2861_v58  ;;  %v3163_v11 = vadd.f32 %v791_v20, %v787_v60  ;;  %v806_v41 = vmul.f32 %v2008_v44, %v3059_v17 }
  0xb6   :  { %v807_v16 = vmul.f32 %v2009_v2, %v3067_v46  ;;  %v2010_v49 = vadd.f32 -1.25, %v2858_v47  ;;  %v3168_v26 = vadd.f32 %v800_v35, %v796_v4  ;;  %v810_v63 = vmul.f32 %v808_v18, %v3077_v51 }
  0xb7   :  { %v811_v53 = vmul.f32 %v809_v25, %v3084_v15  ;;  %v2011_v10 = vadd.f32 -1.25, %v2861_v58  ;;  %v818_v21 = vsub.f32 2.75, %v2858_v47  ;;  %v819_v27 = vsub.f32 2.75, %v2861_v58 }
  0xb8   :  { %v816_v52 = vmul.f32 %v2010_v49, %v3077_v51  ;;  %v2012_v17 = vadd.f32 1.8333334, %v2864_v30  ;;  %v3177_v50 = vadd.f32 %v801_v61, %v797_v37  ;;  %v3179_v46 = vadd.f32 %v810_v63, %v806_v41 }
  0xb9   :  { %v3181_v43 = vadd.f32 %v811_v53, %v807_v16  ;;  %v2013_v24 = vadd.f32 1.8333334, %v2867_v7  ;;  %v3185_v45 = vmul.f32 %v2011_v10, %v3084_v15  ;;  %v820_v3 = vmul.f32 %v818_v21, %v3100_v38 }
  0xba   :  { %v828_v51 = vmul.f32 %v2012_v17, %v3089_v55  ;;  %v830_v47 = vsub.f32 -0.5, %v2864_v30  ;;  %v831_v31 = vsub.f32 -0.5, %v2867_v7  ;;  %v2014_v40 = vadd.f32 1.5, %v2864_v30 }
  0xbb   :  { %v829_v58 = vmul.f32 %v2013_v24, %v3091_v12  ;;  %v2015_v57 = vadd.f32 1.5, %v2867_v7  ;;  %v3195_v29 = vmul.f32 %v819_v27, %v3102_v54  ;;  %v3197_v36 = vadd.f32 %v820_v3, %v816_v52 }
  0xbc   :  { %v832_v15 = vmul.f32 %v830_v47, %v3106_v8  ;;  %v845_v55 = vsub.f32 -0.16666666, %v2864_v30  ;;  %v833_v38 = vmul.f32 %v831_v31, %v3115_v32  ;;  %v843_v12 = vmul.f32 %v2014_v40, %v3106_v8 }
  0xbd   :  { %v844_v5 = vmul.f32 %v2015_v57, %v3115_v32  ;;  %v846_v59 = vsub.f32 -0.16666666, %v2867_v7  ;;  %v2016_v60 = vadd.f32 1.1666666, %v2864_v30  ;;  %v2017_v19 = vadd.f32 1.1666666, %v2867_v7 }
  0xbe   :  { %v834_v54 = vadd.f32 %v832_v15, %v828_v51  ;;  %v847_v48 = vmul.f32 %v845_v55, %v3117_v9  ;;  %v835_v42 = vadd.f32 %v833_v38, %v829_v58  ;;  %v860_v8 = vsub.f32 0.1666667, %v2864_v30 }
  0xbf   :  { %v848_v20 = vmul.f32 %v846_v59, %v3129_v1  ;;  %v861_v32 = vsub.f32 0.1666667, %v2867_v7  ;;  %v858_v37 = vmul.f32 %v2016_v60, %v3117_v9  ;;  %v859_v35 = vmul.f32 %v2017_v19, %v3129_v1 }
  0xc0   :  { %v837_v4 = vmul.f32 %v836_v33, %v834_v54  ;;  %v849_v14 = vadd.f32 %v847_v48, %v843_v12  ;;  %v838_v44 = vmul.f32 %v836_v33, %v835_v42  ;;  %v862_v61 = vmul.f32 %v860_v8, %v3131_v39 }
  0xc1   :  { %v850_v2 = vadd.f32 %v848_v20, %v844_v5  ;;  %v863_v18 = vmul.f32 %v861_v32, %v3135_v23  ;;  %v2018_v16 = vadd.f32 0.8333333, %v2864_v30  ;;  %v2019_v9 = vadd.f32 0.8333333, %v2867_v7 }
  0xc2   :  { %v839_v25 = vadd.f32 %v837_v4, %v2925_v13  ;;  %v852_v41 = vmul.f32 %v851_v62, %v849_v14  ;;  %v840_v1 = vadd.f32 %v838_v44, %v2933_v28  ;;  %v864_v49 = vadd.f32 %v862_v61, %v858_v37 }
  0xc3   :  { %v853_v33 = vmul.f32 %v851_v62, %v850_v2  ;;  %v865_v63 = vadd.f32 %v863_v18, %v859_v35  ;;  %v873_v10 = vmul.f32 %v2018_v16, %v3131_v39  ;;  %v874_v52 = vmul.f32 %v2019_v9, %v3135_v23 }
  0xc4   :  { %v854_v53 = vadd.f32 %v852_v41, %v839_v25  ;;  %v875_v13 = vsub.f32 0.5, %v2864_v30  ;;  %v867_v27 = vmul.f32 %v866_v6, %v864_v49  ;;  %v876_v28 = vsub.f32 0.5, %v2867_v7 }
  0xc5   :  { %v855_v21 = vadd.f32 %v853_v33, %v840_v1  ;;  %v868_v17 = vmul.f32 %v866_v6, %v865_v63  ;;  %v881_v24 = vstv %s3205_s14  ;;  %v2020_v3 = vadd.f32 0.5, %v2864_v30  ;;  %s4248_s14 = sld [smem:[#allocation4 + $0x1f]] }
  0xc6   :  { %v877_v62 = vmul.f32 %v875_v13, %v3144_v34  ;;  %v2021_v39 = vadd.f32 0.5, %v2867_v7  ;;  %v869_v23 = vadd.f32 %v867_v27, %v854_v53  ;;  %v878_v47 = vmul.f32 %v876_v28, %v3149_v0 }
  0xc7   :  { %v870_v51 = vadd.f32 %v868_v17, %v855_v21  ;;  %v890_v58 = vsub.f32 0.8333333, %v2864_v30  ;;  %v888_v40 = vmul.f32 %v2020_v3, %v3144_v34  ;;  %v891_v57 = vsub.f32 0.8333333, %v2867_v7  ;;  %v3283_v21 = vld [vmem:[%s4276_s2 + $0x20] sm:$0xff]  ;;  %v3289_v17 = vld [vmem:[%s4276_s2 + $0x28] sm:$0xff] }
  0xc8   :  { %v879_v31 = vadd.f32 %v877_v62, %v873_v10  ;;  %v889_v6 = vmul.f32 %v2021_v39, %v3149_v0  ;;  %v880_v15 = vadd.f32 %v878_v47, %v874_v52  ;;  %v896_v38 = vstv %s3217_s15 }
  0xc9   :  { %v892_v55 = vmul.f32 %v890_v58, %v3158_v56  ;;  %v2022_v12 = vadd.f32 0.16666666, %v2864_v30  ;;  %v893_v59 = vmul.f32 %v891_v57, %v3163_v11  ;;  %v2023_v54 = vadd.f32 0.16666666, %v2867_v7 }
  0xca   :  { %v882_v5 = vmul.f32 %v881_v24, %v879_v31  ;;  %v905_v34 = vsub.f32 1.1666667, %v2864_v30  ;;  %v883_v48 = vmul.f32 %v881_v24, %v880_v15  ;;  %v906_v19 = vsub.f32 1.1666667, %v2867_v7 }
  0xcb   :  { %v894_v0 = vadd.f32 %v892_v55, %v888_v40  ;;  %v903_v60 = vmul.f32 %v2022_v12, %v3158_v56  ;;  %v895_v20 = vadd.f32 %v893_v59, %v889_v6  ;;  %v904_v8 = vmul.f32 %v2023_v54, %v3163_v11 }
  0xcc   :  { %v884_v42 = vadd.f32 %v882_v5, %v869_v23  ;;  %v907_v32 = vmul.f32 %v905_v34, %v3168_v26  ;;  %v885_v4 = vadd.f32 %v883_v48, %v870_v51  ;;  %v908_v37 = vmul.f32 %v906_v19, %v3177_v50 }
  0xcd   :  { %v897_v14 = vmul.f32 %v896_v38, %v894_v0  ;;  %v911_v35 = vstv %s3234_s16  ;;  %v898_v44 = vmul.f32 %v896_v38, %v895_v20  ;;  %v2024_v56 = vadd.f32 -0.1666667, %v2864_v30 }
  0xce   :  { %v909_v2 = vadd.f32 %v907_v32, %v903_v60  ;;  %v2025_v61 = vadd.f32 -0.1666667, %v2867_v7  ;;  %v823_v18 = vadd.f32 %v3195_v29, %v3185_v45  ;;  %v910_v11 = vadd.f32 %v908_v37, %v904_v8 }
  0xcf   :  { %v920_v25 = vsub.f32 1.5, %v2864_v30  ;;  %v921_v41 = vsub.f32 1.5, %v2867_v7  ;;  %v899_v16 = vadd.f32 %v897_v14, %v884_v42  ;;  %v918_v1 = vmul.f32 %v2024_v56, %v3168_v26 }
  0xd0   :  { %v912_v9 = vmul.f32 %v911_v35, %v909_v2  ;;  %v919_v33 = vmul.f32 %v2025_v61, %v3177_v50  ;;  %v900_v49 = vadd.f32 %v898_v44, %v885_v4  ;;  %v913_v63 = vmul.f32 %v911_v35, %v910_v11 }
  0xd1   :  { %v922_v53 = vmul.f32 %v920_v25, %v3179_v46  ;;  %v923_v10 = vmul.f32 %v921_v41, %v3181_v43  ;;  %v926_v52 = vstv %s3253_s17  ;;  %v2026_v45 = vadd.f32 -0.5, %v2864_v30 }
  0xd2   :  { %v2027_v29 = vadd.f32 -0.5, %v2867_v7  ;;  %v935_v13 = vsub.f32 1.8333334, %v2864_v30  ;;  %v936_v27 = vsub.f32 1.8333334, %v2867_v7  ;;  %v914_v28 = vadd.f32 %v912_v9, %v899_v16 }
  0xd3   :  { %v924_v26 = vadd.f32 %v922_v53, %v918_v1  ;;  %v925_v50 = vadd.f32 %v923_v10, %v919_v33  ;;  %v933_v62 = vmul.f32 %v2026_v45, %v3179_v46  ;;  %v915_v3 = vadd.f32 %v913_v63, %v900_v49 }
  0xd4   :  { %v934_v30 = vmul.f32 %v2027_v29, %v3181_v43  ;;  %v937_v24 = vmul.f32 %v935_v13, %v3197_v36  ;;  %v938_v23 = vmul.f32 %v936_v27, %v823_v18  ;;  %v948_v51 = vmul.f32 0.5, %v3283_v21 }
  0xd5   :  { %v927_v39 = vmul.f32 %v926_v52, %v924_v26  ;;  %v928_v7 = vmul.f32 %v926_v52, %v925_v50  ;;  %v941_v58 = vstv %s3264_s18  ;;  %v949_v31 = vmul.f32 0.5, %v3289_v17 }
  0xd6   :  { %v939_v47 = vadd.f32 %v937_v24, %v933_v62  ;;  %v940_v46 = vadd.f32 %v938_v23, %v934_v30  ;;  %2192 = vtanh.f32 %v948_v51  ;;  %vm963_vm14 = vcmp.ge.f32.partialorder %v3283_v21, -2.2 }
  0xd7   :  { %2194 = vtanh.f32 %v949_v31  ;;  %vm965_vm9 = vcmp.ge.f32.partialorder %v3283_v21, -1.8  ;;  %v929_v43 = vadd.f32 %v927_v39, %v914_v28  ;;  %vm964_vm2 = vcmp.ge.f32.partialorder %v3289_v17, -2.2 }
  0xd8   :  { %v942_v36 = vmul.f32 %v941_v58, %v939_v47  ;;  %vm966_vm7 = vcmp.ge.f32.partialorder %v3289_v17, -1.8  ;;  %vm987_vm1 = vmxor %vm965_vm9, %vm2228_vm8  ;;  %v930_v40 = vadd.f32 %v928_v7, %v915_v3  ;;  %v943_v6 = vmul.f32 %v941_v58, %v940_v46 }
  0xd9   :  { %vm967_vm15 = vcmp.ge.f32.partialorder %v3283_v21, -1.4  ;;  %vm988_vm10 = vmxor %vm966_vm7, %vm2228_vm8  ;;  %vm968_vm6 = vcmp.ge.f32.partialorder %v3289_v17, -1.4  ;;  %v958_v55 = vstv %s3294_s21  ;;  %vm969_vm5 = vcmp.ge.f32.partialorder %v3283_v21, -1.0 }
  0xda   :  { %vm989_vm11 = vmand %vm963_vm14, %vm987_vm1  ;;  %v3319_v15 = vadd.f32 %v942_v36, %v929_v43  ;;  %vm970_vm12 = vcmp.ge.f32.partialorder %v3289_v17, -1.0  ;;  %v3327_v38 = vadd.f32 %v943_v6, %v930_v40  ;;  %vm971_vm3 = vcmp.ge.f32.partialorder %v3283_v21, -0.6 }
  0xdb   :  { %vm3315_vm4 = vmand %vm964_vm2, %vm988_vm10  ;;  %vm972_vm0 = vcmp.ge.f32.partialorder %v3289_v17, -0.6  ;;  %vm974_vm1 = vcmp.ge.f32.partialorder %v3289_v17, -0.19999999  ;;  %v2028_v12 = vsel %vm989_vm11, 1.0, %v2229_v22  ;;  %v1281_v5 = vstv %s3299_s22 }
  0xdc   :  { %vm995_vm13 = vmxor %vm967_vm15, %vm2228_vm8  ;;  %v1296_v59 = vstv %s3301_s23  ;;  %v2029_v54 = vsel %vm3315_vm4, 1.0, %v2229_v22  ;;  %v3348_v48 = vmul.f32 2.5, %v3283_v21  ;;  %v3351_v0 = vmul.f32 2.5, %v3289_v17 }
  0xdd   :  { %vm996_vm2 = vmxor %vm968_vm6, %vm2228_vm8  ;;  %v3358_v42 = vmul.f32 1.25, %v3283_v21  ;;  %v3361_v20 = vmul.f32 1.25, %v3289_v17  ;;  %v3364_v8 = vmul.f32 0.8333333, %v3283_v21  ;;  %vm976_vm4 = vcmp.ge.f32.partialorder %v3289_v17, 0.20000005 }
  0xde   :  { %vm997_vm10 = vmand %vm965_vm9, %vm995_vm13  ;;  %v2050_v14 = vadd.f32 5.5, %v3348_v48  ;;  %v2051_v37 = vadd.f32 5.5, %v3351_v0  ;;  %v1081_v35 = vsub.f32 -3.5, %v3348_v48  ;;  %v1082_v2 = vsub.f32 -3.5, %v3351_v0 }
  0xdf   :  { %vm998_vm14 = vmand %vm966_vm7, %vm996_vm2  ;;  %v2030_v34 = vsel %vm997_vm10, 1.0, %v2229_v22  ;;  %vm975_vm7 = vcmp.ge.f32.partialorder %v3283_v21, 0.20000005  ;;  %v2052_v56 = vadd.f32 4.5, %v3348_v48  ;;  %v2053_v61 = vadd.f32 4.5, %v3351_v0 }
  0xe0   :  { %v2193_v60 = vpop.eup %2192  ;;  %v2031_v19 = vsel %vm998_vm14, 1.0, %v2229_v22  ;;  %vm1003_vm9 = vmxor %vm969_vm5, %vm2228_vm8  ;;  %v1079_v11 = vmul.f32 %v2050_v14, %v2028_v12  ;;  %v1080_v25 = vmul.f32 %v2051_v37, %v2029_v54  ;;  %v3382_v41 = vmul.f32 0.8333333, %v3289_v17 }
  0xe1   :  { %v2195_v32 = vpop.eup %2194  ;;  %v952_v4 = vmul.f32 0.5, %v2193_v60  ;;  %vm1004_vm11 = vmxor %vm970_vm12, %vm2228_vm8  ;;  %v1083_v1 = vmul.f32 %v2030_v34, %v1081_v35  ;;  %v1084_v33 = vmul.f32 %v2031_v19, %v1082_v2  ;;  %vm977_vm2 = vcmp.ge.f32.partialorder %v3283_v21, 0.6 }
  0xe2   :  { %v953_v44 = vmul.f32 0.5, %v2195_v32  ;;  %vm1005_vm13 = vmand %vm967_vm15, %vm1003_vm9  ;;  %v1089_v53 = vmul.f32 %v2052_v56, %v2030_v34  ;;  %v1091_v10 = vsub.f32 -2.5, %v3348_v48  ;;  %vm978_vm10 = vcmp.ge.f32.partialorder %v3289_v17, 0.6 }
  0xe3   :  { %v954_v18 = vadd.f32 0.5, %v952_v4  ;;  %vm1006_vm14 = vmand %vm968_vm6, %vm1004_vm11  ;;  %v2032_v9 = vsel %vm1005_vm13, 1.0, %v2229_v22  ;;  %v3399_v45 = vadd.f32 %v1083_v1, %v1079_v11  ;;  %v1090_v29 = vmul.f32 %v2053_v61, %v2031_v19 }
  0xe4   :  { %v955_v16 = vadd.f32 0.5, %v953_v44  ;;  %vm1011_vm15 = vmxor %vm971_vm3, %vm2228_vm8  ;;  %v2033_v63 = vsel %vm1006_vm14, 1.0, %v2229_v22  ;;  %v1092_v13 = vsub.f32 -2.5, %v3351_v0  ;;  %v3406_v50 = vadd.f32 %v1084_v33, %v1080_v25 }
  0xe5   :  { %v956_v49 = vmul.f32 %v954_v18, %v3283_v21  ;;  %vm1012_vm6 = vmxor %vm972_vm0, %vm2228_vm8  ;;  %v1093_v27 = vmul.f32 %v2032_v9, %v1091_v10  ;;  %v2054_v28 = vadd.f32 3.5, %v3348_v48  ;;  %v2055_v3 = vadd.f32 3.5, %v3351_v0 }
  0xe6   :  { %v957_v52 = vmul.f32 %v955_v16, %v3289_v17  ;;  %vm1013_vm9 = vmand %vm969_vm5, %vm1011_vm15  ;;  %vm4289_vm5 = vcmp.ge.f32.partialorder %v3283_v21, -0.19999999  ;;  %v1094_v23 = vmul.f32 %v2033_v63, %v1092_v13  ;;  %v1101_v7 = vsub.f32 -1.5, %v3348_v48 }
  0xe7   :  { %v959_v26 = vmul.f32 %v958_v55, %v956_v49  ;;  %vm1014_vm11 = vmand %vm970_vm12, %vm1012_vm6  ;;  %v2034_v30 = vsel %vm1013_vm9, 1.0, %v2229_v22  ;;  %vm979_vm12 = vcmp.ge.f32.partialorder %v3283_v21, 1.0  ;;  %v1099_v51 = vmul.f32 %v2054_v28, %v2032_v9 }
  0xe8   :  { %v960_v62 = vmul.f32 %v958_v55, %v957_v52  ;;  %v2035_v24 = vsel %vm1014_vm11, 1.0, %v2229_v22  ;;  %vm1019_vm13 = vmxor %vm4289_vm5, %vm2228_vm8  ;;  %vm980_vm15 = vcmp.ge.f32.partialorder %v3289_v17, 1.0  ;;  %v3431_v58 = vadd.f32 %v1093_v27, %v1089_v53 }
  0xe9   :  { %v3418_v39 = vadd.f32 %v959_v26, %v3319_v15  ;;  %vm1020_vm14 = vmxor %vm974_vm1, %vm2228_vm8  ;;  %v1100_v31 = vmul.f32 %v2055_v3, %v2033_v63  ;;  %v1102_v46 = vsub.f32 -1.5, %v3351_v0  ;;  %v1103_v36 = vmul.f32 %v2034_v30, %v1101_v7 }
  0xea   :  { %v3426_v47 = vadd.f32 %v960_v62, %v3327_v38  ;;  %vm1021_vm6 = vmand %vm971_vm3, %vm1019_vm13  ;;  %v2056_v40 = vadd.f32 2.5, %v3348_v48  ;;  %v2057_v6 = vadd.f32 2.5, %v3351_v0  ;;  %v1111_v55 = vsub.f32 -0.49999997, %v3348_v48 }
  0xeb   :  { %vm1022_vm9 = vmand %vm972_vm0, %vm1020_vm14  ;;  %v2036_v43 = vsel %vm1021_vm6, 1.0, %v2229_v22  ;;  %v1104_v15 = vmul.f32 %v2035_v24, %v1102_v46  ;;  %v1112_v38 = vsub.f32 -0.49999997, %v3351_v0  ;;  %vm981_vm0 = vcmp.ge.f32.partialorder %v3283_v21, 1.4000001 }
  0xec   :  { %v2037_v57 = vsel %vm1022_vm9, 1.0, %v2229_v22  ;;  %vm1027_vm3 = vmxor %vm975_vm7, %vm2228_vm8  ;;  %v3449_v12 = vadd.f32 %v1094_v23, %v1090_v29  ;;  %v3451_v54 = vadd.f32 %v1103_v36, %v1099_v51  ;;  %v1109_v34 = vmul.f32 %v2056_v40, %v2034_v30 }
  0xed   :  { %vm1028_vm11 = vmxor %vm976_vm4, %vm2228_vm8  ;;  %v2058_v60 = vadd.f32 1.5, %v3348_v48  ;;  %vm982_vm5 = vcmp.ge.f32.partialorder %v3289_v17, 1.4000001  ;;  %vm4290_vm13 = vcmp.ge.f32.partialorder %v3283_v21, -0.19999999  ;;  %v1110_v19 = vmul.f32 %v2057_v6, %v2035_v24 }
  0xee   :  { %vm1029_vm14 = vmand %vm4290_vm13, %vm1027_vm3  ;;  %v1113_v32 = vmul.f32 %v2036_v43, %v1111_v55  ;;  %v1114_v4 = vmul.f32 %v2037_v57, %v1112_v38  ;;  %v2059_v14 = vadd.f32 1.5, %v3351_v0  ;;  %v1121_v44 = vsub.f32 0.5000001, %v3348_v48 }
  0xef   :  { %vm1030_vm6 = vmand %vm974_vm1, %vm1028_vm11  ;;  %v2038_v37 = vsel %vm1029_vm14, 1.0, %v2229_v22  ;;  %v1119_v35 = vmul.f32 %v2058_v60, %v2036_v43  ;;  %v1122_v2 = vsub.f32 0.5000001, %v3351_v0  ;;  %v3467_v61 = vadd.f32 %v1104_v15, %v1100_v31 }
  0xf0   :  { %v2039_v56 = vsel %vm1030_vm6, 1.0, %v2229_v22  ;;  %vm1035_vm9 = vmxor %vm977_vm2, %vm2228_vm8  ;;  %v3469_v18 = vadd.f32 %v1113_v32, %v1109_v34  ;;  %v1120_v11 = vmul.f32 %v2059_v14, %v2037_v57  ;;  %vm983_vm1 = vcmp.ge.f32.partialorder %v3283_v21, 1.8 }
  0xf1   :  { %vm1036_vm3 = vmxor %vm978_vm10, %vm2228_vm8  ;;  %v1123_v25 = vmul.f32 %v2038_v37, %v1121_v44  ;;  %v1124_v16 = vmul.f32 %v2039_v56, %v1122_v2  ;;  %v2060_v9 = vadd.f32 0.49999997, %v3348_v48  ;;  %v2061_v1 = vadd.f32 0.49999997, %v3351_v0 }
  0xf2   :  { %vm984_vm11 = vcmp.ge.f32.partialorder %v3289_v17, 1.8  ;;  %vm1037_vm13 = vmand %vm975_vm7, %vm1035_vm9  ;;  %v1131_v33 = vsub.f32 1.5, %v3348_v48  ;;  %v1132_v49 = vsub.f32 1.5, %v3351_v0  ;;  %v2062_v63 = vadd.f32 -0.5000001, %v3348_v48 }
  0xf3   :  { %v2063_v53 = vadd.f32 -0.5000001, %v3351_v0  ;;  %vm1038_vm14 = vmand %vm976_vm4, %vm1036_vm3  ;;  %v2040_v10 = vsel %vm1037_vm13, 1.0, %v2229_v22  ;;  %v3487_v52 = vadd.f32 %v1114_v4, %v1110_v19  ;;  %v3489_v29 = vadd.f32 %v1123_v25, %v1119_v35 }
  0xf4   :  { %v1129_v13 = vmul.f32 %v2060_v9, %v2038_v37  ;;  %v2041_v26 = vsel %vm1038_vm14, 1.0, %v2229_v22  ;;  %vm1043_vm7 = vmxor %vm979_vm12, %vm2228_vm8  ;;  %v3495_v27 = vadd.f32 %v1124_v16, %v1120_v11  ;;  %v1130_v28 = vmul.f32 %v2061_v1, %v2039_v56 }
  0xf5   :  { %v1133_v62 = vmul.f32 %v2040_v10, %v1131_v33  ;;  %vm985_vm6 = vcmp.ge.f32.partialorder %v3283_v21, 2.2  ;;  %vm1044_vm4 = vmxor %vm980_vm15, %vm2228_vm8  ;;  %v1134_v30 = vmul.f32 %v2041_v26, %v1132_v49  ;;  %v1139_v24 = vmul.f32 %v2062_v63, %v2040_v10 }
  0xf6   :  { %v1141_v3 = vsub.f32 2.5, %v3348_v48  ;;  %v1142_v23 = vsub.f32 2.5, %v3351_v0  ;;  %vm986_vm9 = vcmp.ge.f32.partialorder %v3289_v17, 2.2  ;;  %vm1045_vm3 = vmand %vm977_vm2, %vm1043_vm7  ;;  %v1140_v7 = vmul.f32 %v2063_v53, %v2041_v26 }
  0xf7   :  { %v3506_v51 = vadd.f32 %v1133_v62, %v1129_v13  ;;  %v2064_v31 = vadd.f32 -1.5, %v3348_v48  ;;  %v2065_v46 = vadd.f32 -1.5, %v3351_v0  ;;  %vm1046_vm13 = vmand %vm978_vm10, %vm1044_vm4  ;;  %v2042_v43 = vsel %vm1045_vm3, 1.0, %v2229_v22 }
  0xf8   :  { %v3513_v36 = vadd.f32 %v1134_v30, %v1130_v28  ;;  %v1151_v40 = vsub.f32 3.5000002, %v3348_v48  ;;  %v1152_v6 = vsub.f32 3.5000002, %v3351_v0  ;;  %v2043_v57 = vsel %vm1046_vm13, 1.0, %v2229_v22  ;;  %vm1051_vm2 = vmxor %vm981_vm0, %vm2228_vm8 }
  0xf9   :  { %v1143_v15 = vmul.f32 %v2042_v43, %v1141_v3  ;;  %v1149_v55 = vmul.f32 %v2064_v31, %v2042_v43  ;;  %v2066_v38 = vadd.f32 -2.5, %v3348_v48  ;;  %vm1052_vm10 = vmxor %vm982_vm5, %vm2228_vm8  ;;  %v1144_v34 = vmul.f32 %v2043_v57, %v1142_v23 }
  0xfa   :  { %v1150_v60 = vmul.f32 %v2065_v46, %v2043_v57  ;;  %v2067_v19 = vadd.f32 -2.5, %v3351_v0  ;;  %v1161_v32 = vsub.f32 4.5, %v3348_v48  ;;  %vm1053_vm14 = vmand %vm979_vm12, %vm1051_vm2  ;;  %v1162_v14 = vsub.f32 4.5, %v3351_v0 }
  0xfb   :  { %v3529_v4 = vadd.f32 %v1143_v15, %v1139_v24  ;;  %v2068_v37 = vadd.f32 -3.5000002, %v3348_v48  ;;  %v2069_v35 = vadd.f32 -3.5000002, %v3351_v0  ;;  %vm1054_vm7 = vmand %vm980_vm15, %vm1052_vm10  ;;  %v2044_v44 = vsel %vm1053_vm14, 1.0, %v2229_v22 }
  0xfc   :  { %v3537_v2 = vadd.f32 %v1144_v34, %v1140_v7  ;;  %v1171_v56 = vsub.f32 5.5, %v3348_v48  ;;  %v2070_v11 = vadd.f32 2.75, %v3358_v42  ;;  %v2045_v25 = vsel %vm1054_vm7, 1.0, %v2229_v22  ;;  %vm1059_vm12 = vmxor %vm983_vm1, %vm2228_vm8 }
  0xfd   :  { %v1153_v16 = vmul.f32 %v2044_v44, %v1151_v40  ;;  %v1172_v9 = vsub.f32 5.5, %v3351_v0  ;;  %v2071_v1 = vadd.f32 2.75, %v3361_v20  ;;  %vm1060_vm15 = vmxor %vm984_vm11, %vm2228_vm8  ;;  %v1154_v33 = vmul.f32 %v2045_v25, %v1152_v6 }
  0xfe   :  { %v1159_v49 = vmul.f32 %v2066_v38, %v2044_v44  ;;  %v1181_v48 = vmul.f32 %v2070_v11, %v3399_v45  ;;  %v1183_v63 = vsub.f32 -1.25, %v3358_v42  ;;  %vm1061_vm4 = vmand %vm981_vm0, %vm1059_vm12  ;;  %v1160_v53 = vmul.f32 %v2067_v19, %v2045_v25 }
  0xff   :  { %v1182_v10 = vmul.f32 %v2071_v1, %v3406_v50  ;;  %v1184_v0 = vsub.f32 -1.25, %v3361_v20  ;;  %v2072_v13 = vadd.f32 2.25, %v3358_v42  ;;  %vm1062_vm3 = vmand %vm982_vm5, %vm1060_vm15  ;;  %v2046_v26 = vsel %vm1061_vm4, 1.0, %v2229_v22 }
 0x100   :  { %v3560_v28 = vadd.f32 %v1153_v16, %v1149_v55  ;;  %v1185_v45 = vmul.f32 %v1183_v63, %v3431_v58  ;;  %v2073_v62 = vadd.f32 2.25, %v3361_v20  ;;  %v2047_v30 = vsel %vm1062_vm3, 1.0, %v2229_v22  ;;  %vm1067_vm0 = vmxor %vm985_vm6, %vm2228_vm8 }
 0x101   :  { %v3568_v50 = vadd.f32 %v1154_v33, %v1150_v60  ;;  %v1163_v24 = vmul.f32 %v2046_v26, %v1161_v32  ;;  %v1186_v3 = vmul.f32 %v1184_v0, %v3449_v12  ;;  %vm1068_vm5 = vmxor %vm986_vm9, %vm2228_vm8  ;;  %v1164_v23 = vmul.f32 %v2047_v30, %v1162_v14 }
 0x102   :  { %v1169_v7 = vmul.f32 %v2068_v37, %v2046_v26  ;;  %v1170_v31 = vmul.f32 %v2069_v35, %v2047_v30  ;;  %v3574_v46 = vadd.f32 %v1185_v45, %v1181_v48  ;;  %vm1069_vm13 = vmand %vm983_vm1, %vm1067_vm0  ;;  %v1191_v6 = vmul.f32 %v2072_v13, %v3431_v58 }
 0x103   :  { %v3578_v43 = vadd.f32 %v1163_v24, %v1159_v49  ;;  %v3580_v40 = vadd.f32 %v1186_v3, %v1182_v10  ;;  %v1193_v57 = vsub.f32 -0.75, %v3358_v42  ;;  %vm1070_vm6 = vmand %vm984_vm11, %vm1068_vm5  ;;  %v2048_v15 = vsel %vm1069_vm13, 1.0, %v2229_v22 }
 0x104   :  { %v1192_v55 = vmul.f32 %v2073_v62, %v3449_v12  ;;  %v1194_v38 = vsub.f32 -0.75, %v3361_v20  ;;  %v2074_v21 = vadd.f32 1.75, %v3358_v42  ;;  %v2049_v34 = vsel %vm1070_vm6, 1.0, %v2229_v22 }
 0x105   :  { %v1173_v60 = vmul.f32 %v2048_v15, %v1171_v56  ;;  %v1195_v19 = vmul.f32 %v1193_v57, %v3451_v54  ;;  %v2075_v58 = vadd.f32 1.75, %v3361_v20  ;;  %v3593_v32 = vadd.f32 %v1164_v23, %v1160_v53 }
 0x106   :  { %v1174_v14 = vmul.f32 %v2049_v34, %v1172_v9  ;;  %v1196_v17 = vmul.f32 %v1194_v38, %v3467_v61  ;;  %v1203_v37 = vsub.f32 -0.24999999, %v3358_v42  ;;  %v1201_v44 = vmul.f32 %v2074_v21, %v3451_v54 }
 0x107   :  { %v3597_v35 = vadd.f32 %v1173_v60, %v1169_v7  ;;  %v3599_v12 = vadd.f32 %v1195_v19, %v1191_v6  ;;  %v1204_v11 = vsub.f32 -0.24999999, %v3361_v20  ;;  %v1202_v25 = vmul.f32 %v2075_v58, %v3467_v61 }
 0x108   :  { %v3603_v56 = vadd.f32 %v1174_v14, %v1170_v31  ;;  %v1205_v16 = vmul.f32 %v1203_v37, %v3469_v18  ;;  %v2076_v9 = vadd.f32 1.25, %v3358_v42  ;;  %v2077_v33 = vadd.f32 1.25, %v3361_v20 }
 0x109   :  { %v1206_v1 = vmul.f32 %v1204_v11, %v3487_v52  ;;  %v1213_v49 = vsub.f32 0.25000006, %v3358_v42  ;;  %v1214_v48 = vsub.f32 0.25000006, %v3361_v20  ;;  %v3612_v63 = vadd.f32 %v1196_v17, %v1192_v55 }
 0x10a   :  { %v1211_v54 = vmul.f32 %v2076_v9, %v3469_v18  ;;  %v2078_v53 = vadd.f32 0.75, %v3358_v42  ;;  %v2079_v61 = vadd.f32 0.75, %v3361_v20  ;;  %v3617_v10 = vadd.f32 %v1205_v16, %v1201_v44 }
 0x10b   :  { %v1212_v0 = vmul.f32 %v2077_v33, %v3487_v52  ;;  %v1215_v13 = vmul.f32 %v1213_v49, %v3489_v29  ;;  %v1216_v26 = vmul.f32 %v1214_v48, %v3495_v27  ;;  %v1223_v30 = vsub.f32 0.75, %v3358_v42 }
 0x10c   :  { %v1221_v45 = vmul.f32 %v2078_v53, %v3489_v29  ;;  %v1222_v62 = vmul.f32 %v2079_v61, %v3495_v27  ;;  %v1224_v18 = vsub.f32 0.75, %v3361_v20  ;;  %v3626_v24 = vadd.f32 %v1206_v1, %v1202_v25 }
 0x10d   :  { %v3628_v3 = vadd.f32 %v1215_v13, %v1211_v54  ;;  %v2080_v23 = vadd.f32 0.24999999, %v3358_v42  ;;  %v2081_v52 = vadd.f32 0.24999999, %v3361_v20  ;;  %v1225_v7 = vmul.f32 %v1223_v30, %v3506_v51 }
 0x10e   :  { %v1226_v31 = vmul.f32 %v1224_v18, %v3513_v36  ;;  %v1233_v29 = vsub.f32 1.25, %v3358_v42  ;;  %v1234_v27 = vsub.f32 1.25, %v3361_v20  ;;  %v3636_v6 = vadd.f32 %v1216_v26, %v1212_v0 }
 0x10f   :  { %v1231_v57 = vmul.f32 %v2080_v23, %v3506_v51  ;;  %v2082_v15 = vadd.f32 -0.25000006, %v3358_v42  ;;  %v2083_v55 = vadd.f32 -0.25000006, %v3361_v20  ;;  %v3641_v38 = vadd.f32 %v1225_v7, %v1221_v45 }
 0x110   :  { %v3643_v21 = vadd.f32 %v1226_v31, %v1222_v62  ;;  %v1232_v34 = vmul.f32 %v2081_v52, %v3513_v36  ;;  %v1235_v60 = vmul.f32 %v1233_v29, %v3529_v4  ;;  %v1236_v19 = vmul.f32 %v1234_v27, %v3537_v2 }
 0x111   :  { %v1241_v58 = vmul.f32 %v2082_v15, %v3529_v4  ;;  %v1243_v14 = vsub.f32 1.7500001, %v3358_v42  ;;  %v1244_v51 = vsub.f32 1.7500001, %v3361_v20  ;;  %v1242_v37 = vmul.f32 %v2083_v55, %v3537_v2 }
 0x112   :  { %v3651_v17 = vadd.f32 %v1235_v60, %v1231_v57  ;;  %v2084_v44 = vadd.f32 -0.75, %v3358_v42  ;;  %v2085_v11 = vadd.f32 -0.75, %v3361_v20  ;;  %v1253_v16 = vsub.f32 2.25, %v3358_v42 }
 0x113   :  { %v1245_v36 = vmul.f32 %v1243_v14, %v3560_v28  ;;  %v1246_v25 = vmul.f32 %v1244_v51, %v3568_v50  ;;  %v1254_v4 = vsub.f32 2.25, %v3361_v20  ;;  %v2086_v33 = vadd.f32 -1.25, %v3358_v42 }
 0x114   :  { %v1251_v9 = vmul.f32 %v2084_v44, %v3560_v28  ;;  %v1252_v1 = vmul.f32 %v2085_v11, %v3568_v50  ;;  %v2087_v2 = vadd.f32 -1.25, %v3361_v20  ;;  %v3664_v49 = vadd.f32 %v1236_v19, %v1232_v34 }
 0x115   :  { %v3666_v48 = vadd.f32 %v1245_v36, %v1241_v58  ;;  %v1255_v54 = vmul.f32 %v1253_v16, %v3578_v43  ;;  %v1256_v53 = vmul.f32 %v1254_v4, %v3593_v32  ;;  %v3670_v61 = vadd.f32 %v1246_v25, %v1242_v37 }
 0x116   :  { %v1261_v0 = vmul.f32 %v2086_v33, %v3578_v43  ;;  %v1263_v28 = vsub.f32 2.75, %v3358_v42  ;;  %v1264_v50 = vsub.f32 2.75, %v3361_v20  ;;  %v3678_v26 = vmul.f32 %v2087_v2, %v3593_v32 }
 0x117   :  { %v3675_v13 = vadd.f32 %v1255_v54, %v1251_v9  ;;  %v2088_v45 = vadd.f32 1.8333334, %v3364_v8  ;;  %v2089_v62 = vadd.f32 1.8333334, %v3382_v41  ;;  %v3684_v30 = vadd.f32 %v1256_v53, %v1252_v1 }
 0x118   :  { %v1265_v18 = vmul.f32 %v1263_v28, %v3597_v35  ;;  %v1275_v43 = vsub.f32 -0.5, %v3364_v8  ;;  %v1276_v42 = vsub.f32 -0.5, %v3382_v41  ;;  %v2090_v32 = vadd.f32 1.5, %v3364_v8 }
 0x119   :  { %v1273_v20 = vmul.f32 %v2088_v45, %v3574_v46  ;;  %v1274_v23 = vmul.f32 %v2089_v62, %v3580_v40  ;;  %v2091_v52 = vadd.f32 1.5, %v3382_v41  ;;  %v3694_v7 = vmul.f32 %v1264_v50, %v3603_v56 }
 0x11a   :  { %v3696_v31 = vadd.f32 %v1265_v18, %v1261_v0  ;;  %v1277_v35 = vmul.f32 %v1275_v43, %v3599_v12  ;;  %v1278_v29 = vmul.f32 %v1276_v42, %v3612_v63  ;;  %v1288_v27 = vmul.f32 %v2090_v32, %v3599_v12 }
 0x11b   :  { %v1289_v46 = vmul.f32 %v2091_v52, %v3612_v63  ;;  %v1290_v40 = vsub.f32 -0.16666666, %v3364_v8  ;;  %v1291_v57 = vsub.f32 -0.16666666, %v3382_v41  ;;  %v2092_v55 = vadd.f32 1.1666666, %v3364_v8 }
 0x11c   :  { %v1279_v56 = vadd.f32 %v1277_v35, %v1273_v20  ;;  %v1280_v15 = vadd.f32 %v1278_v29, %v1274_v23  ;;  %v2093_v34 = vadd.f32 1.1666666, %v3382_v41  ;;  %v1305_v12 = vsub.f32 0.1666667, %v3364_v8 }
 0x11d   :  { %v1292_v60 = vmul.f32 %v1290_v40, %v3617_v10  ;;  %v1293_v19 = vmul.f32 %v1291_v57, %v3626_v24  ;;  %v1306_v63 = vsub.f32 0.1666667, %v3382_v41  ;;  %v1303_v51 = vmul.f32 %v2092_v55, %v3617_v10 }
 0x11e   :  { %v1282_v58 = vmul.f32 %v1281_v5, %v1279_v56  ;;  %v1283_v14 = vmul.f32 %v1281_v5, %v1280_v15  ;;  %v1304_v37 = vmul.f32 %v2093_v34, %v3626_v24  ;;  %v1307_v36 = vmul.f32 %v1305_v12, %v3628_v3 }
 0x11f   :  { %v1294_v44 = vadd.f32 %v1292_v60, %v1288_v27  ;;  %v1295_v11 = vadd.f32 %v1293_v19, %v1289_v46  ;;  %v1308_v25 = vmul.f32 %v1306_v63, %v3636_v6  ;;  %v1311_v9 = vstv %s3682_s24 }
 0x120   :  { %v1284_v16 = vadd.f32 %v1282_v58, %v3418_v39  ;;  %v1285_v4 = vadd.f32 %v1283_v14, %v3426_v47  ;;  %v2094_v1 = vadd.f32 0.8333333, %v3364_v8  ;;  %v1309_v24 = vadd.f32 %v1307_v36, %v1303_v51 }
 0x121   :  { %v1297_v5 = vmul.f32 %v1296_v59, %v1294_v44  ;;  %v1298_v10 = vmul.f32 %v1296_v59, %v1295_v11  ;;  %v1310_v33 = vadd.f32 %v1308_v25, %v1304_v37  ;;  %v2095_v2 = vadd.f32 0.8333333, %v3382_v41 }
 0x122   :  { %v1318_v54 = vmul.f32 %v2094_v1, %v3628_v3  ;;  %v1320_v53 = vsub.f32 0.5, %v3364_v8  ;;  %v1321_v39 = vsub.f32 0.5, %v3382_v41  ;;  %v1312_v28 = vmul.f32 %v1311_v9, %v1309_v24 }
 0x123   :  { %v1299_v47 = vadd.f32 %v1297_v5, %v1284_v16  ;;  %v1300_v0 = vadd.f32 %v1298_v10, %v1285_v4  ;;  %v1313_v50 = vmul.f32 %v1311_v9, %v1310_v33  ;;  %v1319_v45 = vmul.f32 %v2095_v2, %v3636_v6 }
 0x124   :  { %v1322_v59 = vmul.f32 %v1320_v53, %v3641_v38  ;;  %v1323_v62 = vmul.f32 %v1321_v39, %v3643_v21  ;;  %v1326_v18 = vstv %s3704_s25  ;;  %v2096_v42 = vadd.f32 0.5, %v3364_v8 }
 0x125   :  { %v1314_v43 = vadd.f32 %v1312_v28, %v1299_v47  ;;  %v1315_v3 = vadd.f32 %v1313_v50, %v1300_v0  ;;  %v2097_v20 = vadd.f32 0.5, %v3382_v41  ;;  %v1335_v52 = vsub.f32 0.8333333, %v3364_v8  ;;  %v3784_v50 = vld [vmem:[%s4276_s2 + $0x38] sm:$0xff] }
 0x126   :  { %v1324_v23 = vadd.f32 %v1322_v59, %v1318_v54  ;;  %v1325_v32 = vadd.f32 %v1323_v62, %v1319_v45  ;;  %v1336_v35 = vsub.f32 0.8333333, %v3382_v41  ;;  %v1333_v29 = vmul.f32 %v2096_v42, %v3641_v38 }
 0x127   :  { %v1334_v6 = vmul.f32 %v2097_v20, %v3643_v21  ;;  %v1341_v27 = vstv %s3718_s26  ;;  %v2098_v46 = vadd.f32 0.16666666, %v3364_v8  ;;  %v1337_v56 = vmul.f32 %v1335_v52, %v3651_v17 }
 0x128   :  { %v1327_v40 = vmul.f32 %v1326_v18, %v1324_v23  ;;  %v1328_v57 = vmul.f32 %v1326_v18, %v1325_v32  ;;  %v1338_v15 = vmul.f32 %v1336_v35, %v3664_v49  ;;  %v2099_v55 = vadd.f32 0.16666666, %v3382_v41 }
 0x129   :  { %v1348_v34 = vmul.f32 %v2098_v46, %v3651_v17  ;;  %v1350_v38 = vsub.f32 1.1666667, %v3364_v8  ;;  %v1351_v21 = vsub.f32 1.1666667, %v3382_v41  ;;  %v1339_v12 = vadd.f32 %v1337_v56, %v1333_v29 }
 0x12a   :  { %v1329_v60 = vadd.f32 %v1327_v40, %v1314_v43  ;;  %v1330_v19 = vadd.f32 %v1328_v57, %v1315_v3  ;;  %v1340_v63 = vadd.f32 %v1338_v15, %v1334_v6  ;;  %v1349_v58 = vmul.f32 %v2099_v55, %v3664_v49 }
 0x12b   :  { %v1352_v14 = vmul.f32 %v1350_v38, %v3666_v48  ;;  %v1353_v51 = vmul.f32 %v1351_v21, %v3670_v61  ;;  %v1356_v37 = vstv %s3734_s27  ;;  %v1342_v44 = vmul.f32 %v1341_v27, %v1339_v12 }
 0x12c   :  { %v1343_v17 = vmul.f32 %v1341_v27, %v1340_v63  ;;  %v2100_v11 = vadd.f32 -0.1666667, %v3364_v8  ;;  %v2101_v36 = vadd.f32 -0.1666667, %v3382_v41  ;;  %v1365_v4 = vsub.f32 1.5, %v3364_v8 }
 0x12d   :  { %v1354_v25 = vadd.f32 %v1352_v14, %v1348_v34  ;;  %v1355_v16 = vadd.f32 %v1353_v51, %v1349_v58  ;;  %v1366_v49 = vsub.f32 1.5, %v3382_v41  ;;  %v1268_v9 = vadd.f32 %v3694_v7, %v3678_v26  ;;  %v3779_v26 = vld [vmem:[%s4276_s2 + $0x30] sm:$0xff]  ;;  %s3797_s2 = sld [smem:[#allocation4 + $0x19]] }
 0x12e   :  { %v1344_v1 = vadd.f32 %v1342_v44, %v1329_v60  ;;  %v1363_v5 = vmul.f32 %v2100_v11, %v3666_v48  ;;  %v1364_v10 = vmul.f32 %v2101_v36, %v3670_v61  ;;  %v1345_v24 = vadd.f32 %v1343_v17, %v1330_v19 }
 0x12f   :  { %v1357_v33 = vmul.f32 %v1356_v37, %v1354_v25  ;;  %v1367_v2 = vmul.f32 %v1365_v4, %v3675_v13  ;;  %v1368_v54 = vmul.f32 %v1366_v49, %v3684_v30  ;;  %v1371_v53 = vstv %s3748_s28 }
 0x130   :  { %v2102_v39 = vadd.f32 -0.5, %v3364_v8  ;;  %v2103_v47 = vadd.f32 -0.5, %v3382_v41  ;;  %v1380_v0 = vsub.f32 1.8333334, %v3364_v8  ;;  %v1358_v48 = vmul.f32 %v1356_v37, %v1355_v16 }
 0x131   :  { %v1359_v61 = vadd.f32 %v1357_v33, %v1344_v1  ;;  %v1369_v7 = vadd.f32 %v1367_v2, %v1363_v5  ;;  %v1370_v28 = vadd.f32 %v1368_v54, %v1364_v10  ;;  %v1381_v8 = vsub.f32 1.8333334, %v3382_v41 }
 0x132   :  { %v1378_v45 = vmul.f32 %v2102_v39, %v3675_v13  ;;  %v1379_v59 = vmul.f32 %v2103_v47, %v3684_v30  ;;  %v1382_v62 = vmul.f32 %v1380_v0, %v3696_v31  ;;  %v1393_v43 = vmul.f32 0.5, %v3779_v26 }
 0x133   :  { %v1372_v18 = vmul.f32 %v1371_v53, %v1369_v7  ;;  %v1383_v3 = vmul.f32 %v1381_v8, %v1268_v9  ;;  %v1386_v20 = vstv %s3760_s29  ;;  %v1394_v23 = vmul.f32 0.5, %v3784_v50 }
 0x134   :  { %v1384_v42 = vadd.f32 %v1382_v62, %v1378_v45  ;;  %v1360_v13 = vadd.f32 %v1358_v48, %v1345_v24  ;;  %v1373_v30 = vmul.f32 %v1371_v53, %v1370_v28  ;;  %2196 = vtanh.f32 %v1393_v43 }
 0x135   :  { %v1374_v41 = vadd.f32 %v1372_v18, %v1359_v61  ;;  %v1385_v31 = vadd.f32 %v1383_v3, %v1379_v59  ;;  %2198 = vtanh.f32 %v1394_v23  ;;  %vm1408_vm1 = vcmp.ge.f32.partialorder %v3779_v26, -2.2 }
 0x136   :  { %v1387_v32 = vmul.f32 %v1386_v20, %v1384_v42  ;;  %vm1410_vm11 = vcmp.ge.f32.partialorder %v3779_v26, -1.8  ;;  %vm1411_vm9 = vcmp.ge.f32.partialorder %v3784_v50, -1.8  ;;  %vm1409_vm2 = vcmp.ge.f32.partialorder %v3784_v50, -2.2 }
 0x137   :  { %vm1432_vm10 = vmxor %vm1410_vm11, %vm2228_vm8  ;;  %v1375_v52 = vadd.f32 %v1373_v30, %v1360_v13  ;;  %v1388_v35 = vmul.f32 %v1386_v20, %v1385_v31  ;;  %vm1412_vm14 = vcmp.ge.f32.partialorder %v3779_v26, -1.4  ;;  %vm1413_vm12 = vcmp.ge.f32.partialorder %v3784_v50, -1.4 }
 0x138   :  { %vm1433_vm7 = vmxor %vm1411_vm9, %vm2228_vm8  ;;  %v3813_v29 = vadd.f32 %v1387_v32, %v1374_v41  ;;  %v1403_v6 = vstv %s3790_s7  ;;  %v1726_v27 = vstv %s3792_s8  ;;  %vm1414_vm3 = vcmp.ge.f32.partialorder %v3779_v26, -1.0 }
 0x139   :  { %vm1434_vm15 = vmand %vm1408_vm1, %vm1432_vm10  ;;  %vm1415_vm0 = vcmp.ge.f32.partialorder %v3784_v50, -1.0  ;;  %vm1416_vm5 = vcmp.ge.f32.partialorder %v3779_v26, -0.6  ;;  %vm1417_vm13 = vcmp.ge.f32.partialorder %v3784_v50, -0.6  ;;  %v3824_v46 = vadd.f32 %v1388_v35, %v1375_v52 }
 0x13a   :  { %vm1435_vm4 = vmand %vm1409_vm2, %vm1433_vm7  ;;  %vm1418_vm1 = vcmp.ge.f32.partialorder %v3779_v26, -0.19999999  ;;  %v2104_v40 = vsel %vm1434_vm15, 1.0, %v2229_v22  ;;  %v1741_v57 = vstv %s3797_s2  ;;  %vm1419_vm10 = vcmp.ge.f32.partialorder %v3784_v50, -0.19999999 }
 0x13b   :  { %vm1440_vm6 = vmxor %vm1412_vm14, %vm2228_vm8  ;;  %v2105_v56 = vsel %vm1435_vm4, 1.0, %v2229_v22  ;;  %v3837_v15 = vmul.f32 2.5, %v3779_v26  ;;  %v3840_v55 = vmul.f32 2.5, %v3784_v50  ;;  %v1756_v34 = vstv %s3799_s9 }
 0x13c   :  { %vm1441_vm2 = vmxor %vm1413_vm12, %vm2228_vm8  ;;  %v3847_v60 = vmul.f32 1.25, %v3779_v26  ;;  %v3850_v19 = vmul.f32 1.25, %v3784_v50  ;;  %v3853_v12 = vmul.f32 0.8333333, %v3779_v26 }
 0x13d   :  { %vm1442_vm7 = vmand %vm1410_vm11, %vm1440_vm6  ;;  %v2126_v51 = vadd.f32 5.5, %v3837_v15  ;;  %v2127_v37 = vadd.f32 5.5, %v3840_v55  ;;  %v1526_v17 = vsub.f32 -3.5, %v3837_v15  ;;  %v1527_v11 = vsub.f32 -3.5, %v3840_v55 }
 0x13e   :  { %v2197_v38 = vpop.eup %2196  ;;  %vm1443_vm15 = vmand %vm1411_vm9, %vm1441_vm2  ;;  %v2106_v21 = vsel %vm1442_vm7, 1.0, %v2229_v22  ;;  %vm1420_vm9 = vcmp.ge.f32.partialorder %v3779_v26, 0.20000005  ;;  %v2128_v36 = vadd.f32 4.5, %v3837_v15  ;;  %vm1421_vm6 = vcmp.ge.f32.partialorder %v3784_v50, 0.20000005 }
 0x13f   :  { %v2199_v63 = vpop.eup %2198  ;;  %v1397_v58 = vmul.f32 0.5, %v2197_v38  ;;  %v2107_v14 = vsel %vm1443_vm15, 1.0, %v2229_v22  ;;  %vm1448_vm11 = vmxor %vm1414_vm3, %vm2228_vm8  ;;  %v1524_v16 = vmul.f32 %v2126_v51, %v2104_v40  ;;  %v1525_v4 = vmul.f32 %v2127_v37, %v2105_v56 }
 0x140   :  { %v1398_v44 = vmul.f32 0.5, %v2199_v63  ;;  %vm1449_vm4 = vmxor %vm1415_vm0, %vm2228_vm8  ;;  %v2129_v49 = vadd.f32 4.5, %v3840_v55  ;;  %v1528_v5 = vmul.f32 %v2106_v21, %v1526_v17  ;;  %v1529_v10 = vmul.f32 %v2107_v14, %v1527_v11 }
 0x141   :  { %v1399_v25 = vadd.f32 0.5, %v1397_v58  ;;  %vm1450_vm2 = vmand %vm1412_vm14, %vm1448_vm11  ;;  %v1534_v2 = vmul.f32 %v2128_v36, %v2106_v21  ;;  %vm1422_vm15 = vcmp.ge.f32.partialorder %v3779_v26, 0.6  ;;  %v1536_v0 = vsub.f32 -2.5, %v3837_v15 }
 0x142   :  { %v1400_v9 = vadd.f32 0.5, %v1398_v44  ;;  %vm1451_vm7 = vmand %vm1413_vm12, %vm1449_vm4  ;;  %v2108_v1 = vsel %vm1450_vm2, 1.0, %v2229_v22  ;;  %v1535_v54 = vmul.f32 %v2129_v49, %v2107_v14  ;;  %v3885_v39 = vadd.f32 %v1528_v5, %v1524_v16 }
 0x143   :  { %v1401_v24 = vmul.f32 %v1399_v25, %v3779_v26  ;;  %v2109_v33 = vsel %vm1451_vm7, 1.0, %v2229_v22  ;;  %vm1456_vm14 = vmxor %vm1416_vm5, %vm2228_vm8  ;;  %v3887_v47 = vadd.f32 %v1529_v10, %v1525_v4  ;;  %vm1423_vm11 = vcmp.ge.f32.partialorder %v3784_v50, 0.6 }
 0x144   :  { %v1402_v53 = vmul.f32 %v1400_v9, %v3784_v50  ;;  %vm1457_vm12 = vmxor %vm1417_vm13, %vm2228_vm8  ;;  %v1537_v61 = vsub.f32 -2.5, %v3840_v55  ;;  %v2130_v7 = vadd.f32 3.5, %v3837_v15  ;;  %v2131_v28 = vadd.f32 3.5, %v3840_v55 }
 0x145   :  { %v1404_v48 = vmul.f32 %v1403_v6, %v1401_v24  ;;  %vm1458_vm4 = vmand %vm1414_vm3, %vm1456_vm14  ;;  %v1538_v8 = vmul.f32 %v2108_v1, %v1536_v0  ;;  %v1546_v62 = vsub.f32 -1.5, %v3837_v15  ;;  %v1547_v30 = vsub.f32 -1.5, %v3840_v55 }
 0x146   :  { %v1405_v45 = vmul.f32 %v1403_v6, %v1402_v53  ;;  %vm1459_vm2 = vmand %vm1415_vm0, %vm1457_vm12  ;;  %v2110_v59 = vsel %vm1458_vm4, 1.0, %v2229_v22  ;;  %v1539_v3 = vmul.f32 %v2109_v33, %v1537_v61  ;;  %v1544_v42 = vmul.f32 %v2130_v7, %v2108_v1 }
 0x147   :  { %v3905_v18 = vadd.f32 %v1404_v48, %v3813_v29  ;;  %v2111_v43 = vsel %vm1459_vm2, 1.0, %v2229_v22  ;;  %vm1464_vm3 = vmxor %vm1418_vm1, %vm2228_vm8  ;;  %vm1424_vm0 = vcmp.ge.f32.partialorder %v3779_v26, 1.0  ;;  %v3918_v23 = vadd.f32 %v1538_v8, %v1534_v2 }
 0x148   :  { %v3912_v20 = vadd.f32 %v1405_v45, %v3824_v46  ;;  %vm1465_vm7 = vmxor %vm1419_vm10, %vm2228_vm8  ;;  %v1545_v13 = vmul.f32 %v2131_v28, %v2109_v33  ;;  %vm1425_vm14 = vcmp.ge.f32.partialorder %v3784_v50, 1.0  ;;  %v3924_v41 = vadd.f32 %v1539_v3, %v1535_v54 }
 0x149   :  { %vm1466_vm12 = vmand %vm1416_vm5, %vm1464_vm3  ;;  %v1548_v31 = vmul.f32 %v2110_v59, %v1546_v62  ;;  %v2132_v32 = vadd.f32 2.5, %v3837_v15  ;;  %v2133_v52 = vadd.f32 2.5, %v3840_v55  ;;  %v1549_v29 = vmul.f32 %v2111_v43, %v1547_v30 }
 0x14a   :  { %vm1467_vm4 = vmand %vm1417_vm13, %vm1465_vm7  ;;  %v2112_v35 = vsel %vm1466_vm12, 1.0, %v2229_v22  ;;  %v1556_v6 = vsub.f32 -0.49999997, %v3837_v15  ;;  %v1557_v46 = vsub.f32 -0.49999997, %v3840_v55  ;;  %v2134_v51 = vadd.f32 1.5, %v3837_v15 }
 0x14b   :  { %v2113_v40 = vsel %vm1467_vm4, 1.0, %v2229_v22  ;;  %vm1472_vm5 = vmxor %vm1420_vm9, %vm2228_vm8  ;;  %v3937_v56 = vadd.f32 %v1548_v31, %v1544_v42  ;;  %v1554_v38 = vmul.f32 %v2132_v32, %v2110_v59  ;;  %v1555_v21 = vmul.f32 %v2133_v52, %v2111_v43 }
 0x14c   :  { %vm1426_vm2 = vcmp.ge.f32.partialorder %v3779_v26, 1.4000001  ;;  %vm1473_vm13 = vmxor %vm1421_vm6, %vm2228_vm8  ;;  %v3943_v63 = vadd.f32 %v1549_v29, %v1545_v13  ;;  %v1558_v58 = vmul.f32 %v2112_v35, %v1556_v6  ;;  %v1559_v14 = vmul.f32 %v2113_v40, %v1557_v46 }
 0x14d   :  { %vm1427_vm3 = vcmp.ge.f32.partialorder %v3784_v50, 1.4000001  ;;  %vm1474_vm7 = vmand %vm1418_vm1, %vm1472_vm5  ;;  %v2135_v37 = vadd.f32 1.5, %v3840_v55  ;;  %v1566_v44 = vsub.f32 0.5000001, %v3837_v15  ;;  %v1576_v11 = vsub.f32 1.5, %v3837_v15 }
 0x14e   :  { %v1567_v17 = vsub.f32 0.5000001, %v3840_v55  ;;  %vm1475_vm12 = vmand %vm1419_vm10, %vm1473_vm13  ;;  %v2114_v36 = vsel %vm1474_vm7, 1.0, %v2229_v22  ;;  %v3956_v25 = vadd.f32 %v1558_v58, %v1554_v38  ;;  %v3958_v16 = vadd.f32 %v1559_v14, %v1555_v21 }
 0x14f   :  { %v1564_v4 = vmul.f32 %v2134_v51, %v2112_v35  ;;  %v2115_v49 = vsel %vm1475_vm12, 1.0, %v2229_v22  ;;  %vm1480_vm1 = vmxor %vm1422_vm15, %vm2228_vm8  ;;  %v1565_v9 = vmul.f32 %v2135_v37, %v2113_v40  ;;  %v1568_v1 = vmul.f32 %v2114_v36, %v1566_v44 }
 0x150   :  { %v2136_v5 = vadd.f32 0.49999997, %v3837_v15  ;;  %vm1428_vm4 = vcmp.ge.f32.partialorder %v3779_v26, 1.8  ;;  %vm1481_vm10 = vmxor %vm1423_vm11, %vm2228_vm8  ;;  %v1569_v10 = vmul.f32 %v2115_v49, %v1567_v17  ;;  %v2137_v24 = vadd.f32 0.49999997, %v3840_v55 }
 0x151   :  { %v1577_v33 = vsub.f32 1.5, %v3840_v55  ;;  %v2138_v2 = vadd.f32 -0.5000001, %v3837_v15  ;;  %vm1429_vm5 = vcmp.ge.f32.partialorder %v3784_v50, 1.8  ;;  %vm1482_vm13 = vmand %vm1420_vm9, %vm1480_vm1  ;;  %v3975_v54 = vadd.f32 %v1568_v1, %v1564_v4 }
 0x152   :  { %v1574_v53 = vmul.f32 %v2136_v5, %v2114_v36  ;;  %v2139_v0 = vadd.f32 -0.5000001, %v3840_v55  ;;  %v1586_v48 = vsub.f32 2.5, %v3837_v15  ;;  %vm1483_vm7 = vmand %vm1421_vm6, %vm1481_vm10  ;;  %v2116_v61 = vsel %vm1482_vm13, 1.0, %v2229_v22 }
 0x153   :  { %v3982_v7 = vadd.f32 %v1569_v10, %v1565_v9  ;;  %v1575_v28 = vmul.f32 %v2137_v24, %v2115_v49  ;;  %v1587_v45 = vsub.f32 2.5, %v3840_v55  ;;  %v2117_v59 = vsel %vm1483_vm7, 1.0, %v2229_v22  ;;  %vm1488_vm9 = vmxor %vm1424_vm0, %vm2228_vm8 }
 0x154   :  { %v1578_v8 = vmul.f32 %v2116_v61, %v1576_v11  ;;  %v1584_v62 = vmul.f32 %v2138_v2, %v2116_v61  ;;  %v2140_v43 = vadd.f32 -1.5, %v3837_v15  ;;  %vm1430_vm12 = vcmp.ge.f32.partialorder %v3779_v26, 2.2  ;;  %vm1489_vm6 = vmxor %vm1425_vm14, %vm2228_vm8 }
 0x155   :  { %v1579_v3 = vmul.f32 %v2117_v59, %v1577_v33  ;;  %v1585_v42 = vmul.f32 %v2139_v0, %v2117_v59  ;;  %v2141_v13 = vadd.f32 -1.5, %v3840_v55  ;;  %v1596_v30 = vsub.f32 3.5000002, %v3837_v15  ;;  %vm1490_vm10 = vmand %vm1422_vm15, %vm1488_vm9 }
 0x156   :  { %vm1431_vm1 = vcmp.ge.f32.partialorder %v3784_v50, 2.2  ;;  %v3999_v31 = vadd.f32 %v1578_v8, %v1574_v53  ;;  %v1597_v32 = vsub.f32 3.5000002, %v3840_v55  ;;  %v2142_v52 = vadd.f32 -2.5, %v3837_v15  ;;  %vm1491_vm13 = vmand %vm1423_vm11, %vm1489_vm6 }
 0x157   :  { %v2143_v35 = vadd.f32 -2.5, %v3840_v55  ;;  %v2118_v29 = vsel %vm1490_vm10, 1.0, %v2229_v22  ;;  %v4007_v6 = vadd.f32 %v1579_v3, %v1575_v28  ;;  %v1606_v46 = vsub.f32 4.5, %v3837_v15  ;;  %vm1496_vm15 = vmxor %vm1426_vm2, %vm2228_vm8 }
 0x158   :  { %v1607_v40 = vsub.f32 4.5, %v3840_v55  ;;  %v2119_v38 = vsel %vm1491_vm13, 1.0, %v2229_v22  ;;  %v1588_v21 = vmul.f32 %v2118_v29, %v1586_v48  ;;  %v1594_v58 = vmul.f32 %v2140_v43, %v2118_v29  ;;  %vm1497_vm11 = vmxor %vm1427_vm3, %vm2228_vm8 }
 0x159   :  { %v2144_v14 = vadd.f32 -3.5000002, %v3837_v15  ;;  %v1589_v51 = vmul.f32 %v2119_v38, %v1587_v45  ;;  %v1595_v37 = vmul.f32 %v2141_v13, %v2119_v38  ;;  %v2145_v44 = vadd.f32 -3.5000002, %v3840_v55  ;;  %vm1498_vm7 = vmand %vm1424_vm0, %vm1496_vm15 }
 0x15a   :  { %v1616_v17 = vsub.f32 5.5, %v3837_v15  ;;  %v4023_v11 = vadd.f32 %v1588_v21, %v1584_v62  ;;  %v1617_v36 = vsub.f32 5.5, %v3840_v55  ;;  %v2146_v4 = vadd.f32 2.75, %v3847_v60  ;;  %vm1499_vm9 = vmand %vm1425_vm14, %vm1497_vm11 }
 0x15b   :  { %v2147_v49 = vadd.f32 2.75, %v3850_v19  ;;  %v2120_v9 = vsel %vm1498_vm7, 1.0, %v2229_v22  ;;  %v4031_v1 = vadd.f32 %v1589_v51, %v1585_v42  ;;  %v1628_v15 = vsub.f32 -1.25, %v3847_v60  ;;  %vm1504_vm0 = vmxor %vm1428_vm4, %vm2228_vm8 }
 0x15c   :  { %v1629_v5 = vsub.f32 -1.25, %v3850_v19  ;;  %v2121_v10 = vsel %vm1499_vm9, 1.0, %v2229_v22  ;;  %v1598_v55 = vmul.f32 %v2120_v9, %v1596_v30  ;;  %v1604_v24 = vmul.f32 %v2142_v52, %v2120_v9  ;;  %vm1505_vm14 = vmxor %vm1429_vm5, %vm2228_vm8 }
 0x15d   :  { %v1626_v33 = vmul.f32 %v2146_v4, %v3885_v39  ;;  %v1599_v2 = vmul.f32 %v2121_v10, %v1597_v32  ;;  %v1605_v53 = vmul.f32 %v2143_v35, %v2121_v10  ;;  %v1627_v0 = vmul.f32 %v2147_v49, %v3887_v47  ;;  %vm1506_vm6 = vmand %vm1426_vm2, %vm1504_vm0 }
 0x15e   :  { %v1630_v48 = vmul.f32 %v1628_v15, %v3918_v23  ;;  %v4047_v61 = vadd.f32 %v1598_v55, %v1594_v58  ;;  %v1631_v28 = vmul.f32 %v1629_v5, %v3924_v41  ;;  %v2148_v45 = vadd.f32 2.25, %v3847_v60  ;;  %vm1507_vm10 = vmand %vm1427_vm3, %vm1505_vm14 }
 0x15f   :  { %v2149_v39 = vadd.f32 2.25, %v3850_v19  ;;  %v2122_v59 = vsel %vm1506_vm6, 1.0, %v2229_v22  ;;  %v4055_v8 = vadd.f32 %v1599_v2, %v1595_v37  ;;  %v1638_v62 = vsub.f32 -0.75, %v3847_v60  ;;  %vm1512_vm2 = vmxor %vm1430_vm12, %vm2228_vm8 }
 0x160   :  { %v4057_v47 = vadd.f32 %v1630_v48, %v1626_v33  ;;  %v2123_v43 = vsel %vm1507_vm10, 1.0, %v2229_v22  ;;  %v1608_v3 = vmul.f32 %v2122_v59, %v1606_v46  ;;  %v1614_v42 = vmul.f32 %v2144_v14, %v2122_v59  ;;  %vm1513_vm3 = vmxor %vm1431_vm1, %vm2228_vm8 }
 0x161   :  { %v4064_v13 = vadd.f32 %v1631_v28, %v1627_v0  ;;  %v1609_v30 = vmul.f32 %v2123_v43, %v1607_v40  ;;  %v1615_v32 = vmul.f32 %v2145_v44, %v2123_v43  ;;  %v1636_v52 = vmul.f32 %v2148_v45, %v3918_v23  ;;  %vm1514_vm13 = vmand %vm1428_vm4, %vm1512_vm2 }
 0x162   :  { %v1637_v35 = vmul.f32 %v2149_v39, %v3924_v41  ;;  %v4073_v29 = vadd.f32 %v1608_v3, %v1604_v24  ;;  %v1639_v46 = vsub.f32 -0.75, %v3850_v19  ;;  %v1640_v38 = vmul.f32 %v1638_v62, %v3937_v56  ;;  %vm1515_vm8 = vmand %vm1429_vm5, %vm1513_vm3 }
 0x163   :  { %v2150_v21 = vadd.f32 1.75, %v3847_v60  ;;  %v2124_v40 = vsel %vm1514_vm13, 1.0, %v2229_v22  ;;  %v4081_v58 = vadd.f32 %v1609_v30, %v1605_v53  ;;  %v2151_v23 = vadd.f32 1.75, %v3850_v19 }
 0x164   :  { %v1648_v26 = vsub.f32 -0.24999999, %v3847_v60  ;;  %v2125_v41 = vsel %vm1515_vm8, 1.0, %v2229_v22  ;;  %v1618_v14 = vmul.f32 %v2124_v40, %v1616_v17  ;;  %v1641_v51 = vmul.f32 %v1639_v46, %v3943_v63 }
 0x165   :  { %v4087_v37 = vadd.f32 %v1640_v38, %v1636_v52  ;;  %v1619_v44 = vmul.f32 %v2125_v41, %v1617_v36  ;;  %v1646_v4 = vmul.f32 %v2150_v21, %v3937_v56  ;;  %v1647_v49 = vmul.f32 %v2151_v23, %v3943_v63 }
 0x166   :  { %v1649_v9 = vsub.f32 -0.24999999, %v3850_v19  ;;  %v4092_v15 = vadd.f32 %v1618_v14, %v1614_v42  ;;  %v4094_v5 = vadd.f32 %v1641_v51, %v1637_v35  ;;  %v1650_v10 = vmul.f32 %v1648_v26, %v3956_v25 }
 0x167   :  { %v2152_v22 = vadd.f32 1.25, %v3847_v60  ;;  %v1621_v17 = vadd.f32 %v1619_v44, %v1615_v32  ;;  %v2153_v24 = vadd.f32 1.25, %v3850_v19  ;;  %v1658_v36 = vsub.f32 0.25000006, %v3847_v60 }
 0x168   :  { %v1651_v55 = vmul.f32 %v1649_v9, %v3958_v16  ;;  %v4101_v56 = vadd.f32 %v1650_v10, %v1646_v4  ;;  %v1659_v33 = vsub.f32 0.25000006, %v3850_v19  ;;  %v2154_v2 = vadd.f32 0.75, %v3847_v60 }
 0x169   :  { %v1656_v63 = vmul.f32 %v2152_v22, %v3956_v25  ;;  %v1657_v0 = vmul.f32 %v2153_v24, %v3958_v16  ;;  %v1660_v48 = vmul.f32 %v1658_v36, %v3975_v54  ;;  %v2155_v28 = vadd.f32 0.75, %v3850_v19 }
 0x16a   :  { %v4106_v53 = vadd.f32 %v1651_v55, %v1647_v49  ;;  %v1661_v45 = vmul.f32 %v1659_v33, %v3982_v7  ;;  %v1666_v39 = vmul.f32 %v2154_v2, %v3975_v54  ;;  %v1668_v59 = vsub.f32 0.75, %v3847_v60 }
 0x16b   :  { %v1669_v25 = vsub.f32 0.75, %v3850_v19  ;;  %v4115_v62 = vadd.f32 %v1660_v48, %v1656_v63  ;;  %v1667_v43 = vmul.f32 %v2155_v28, %v3982_v7  ;;  %v2156_v3 = vadd.f32 0.24999999, %v3847_v60 }
 0x16c   :  { %v2157_v16 = vadd.f32 0.24999999, %v3850_v19  ;;  %v4120_v42 = vadd.f32 %v1661_v45, %v1657_v0  ;;  %v1670_v30 = vmul.f32 %v1668_v59, %v3999_v31  ;;  %v1678_v54 = vsub.f32 1.25, %v3847_v60 }
 0x16d   :  { %v1671_v32 = vmul.f32 %v1669_v25, %v4007_v6  ;;  %v1676_v52 = vmul.f32 %v2156_v3, %v3999_v31  ;;  %v1679_v46 = vsub.f32 1.25, %v3850_v19  ;;  %v2158_v7 = vadd.f32 -0.25000006, %v3847_v60 }
 0x16e   :  { %v1677_v35 = vmul.f32 %v2157_v16, %v4007_v6  ;;  %v4129_v38 = vadd.f32 %v1670_v30, %v1666_v39  ;;  %v1680_v40 = vmul.f32 %v1678_v54, %v4023_v11  ;;  %v2159_v23 = vadd.f32 -0.25000006, %v3850_v19 }
 0x16f   :  { %v4131_v21 = vadd.f32 %v1671_v32, %v1667_v43  ;;  %v1681_v26 = vmul.f32 %v1679_v46, %v4031_v1  ;;  %v1686_v41 = vmul.f32 %v2158_v7, %v4023_v11  ;;  %v1688_v31 = vsub.f32 1.7500001, %v3847_v60 }
 0x170   :  { %v1689_v6 = vsub.f32 1.7500001, %v3850_v19  ;;  %v4139_v14 = vadd.f32 %v1680_v40, %v1676_v52  ;;  %v1687_v51 = vmul.f32 %v2159_v23, %v4031_v1  ;;  %v2160_v44 = vadd.f32 -0.75, %v3847_v60 }
 0x171   :  { %v2161_v4 = vadd.f32 -0.75, %v3850_v19  ;;  %v4144_v49 = vadd.f32 %v1681_v26, %v1677_v35  ;;  %v1690_v9 = vmul.f32 %v1688_v31, %v4047_v61  ;;  %v1698_v11 = vsub.f32 2.25, %v3847_v60 }
 0x172   :  { %v1691_v10 = vmul.f32 %v1689_v6, %v4055_v8  ;;  %v1696_v22 = vmul.f32 %v2160_v44, %v4047_v61  ;;  %v1699_v24 = vsub.f32 2.25, %v3850_v19  ;;  %v2162_v1 = vadd.f32 -1.25, %v3847_v60 }
 0x173   :  { %v1697_v55 = vmul.f32 %v2161_v4, %v4055_v8  ;;  %v4153_v36 = vadd.f32 %v1690_v9, %v1686_v41  ;;  %v1700_v33 = vmul.f32 %v1698_v11, %v4073_v29  ;;  %v2163_v2 = vadd.f32 -1.25, %v3850_v19 }
 0x174   :  { %v4155_v63 = vadd.f32 %v1691_v10, %v1687_v51  ;;  %v1701_v0 = vmul.f32 %v1699_v24, %v4081_v58  ;;  %v1706_v48 = vmul.f32 %v2162_v1, %v4073_v29  ;;  %v1708_v61 = vsub.f32 2.75, %v3847_v60 }
 0x175   :  { %v1709_v8 = vsub.f32 2.75, %v3850_v19  ;;  %v4163_v28 = vadd.f32 %v1700_v33, %v1696_v22  ;;  %v1707_v45 = vmul.f32 %v2163_v2, %v4081_v58  ;;  %v4167_v39 = vmul.f32 0.8333333, %v3784_v50 }
 0x176   :  { %v2164_v59 = vadd.f32 1.8333334, %v3853_v12  ;;  %v4170_v25 = vadd.f32 %v1701_v0, %v1697_v55  ;;  %v1710_v43 = vmul.f32 %v1708_v61, %v4092_v15  ;;  %v1720_v29 = vsub.f32 -0.5, %v3853_v12 }
 0x177   :  { %v1711_v3 = vmul.f32 %v1709_v8, %v1621_v17  ;;  %v2165_v60 = vadd.f32 1.8333334, %v4167_v39  ;;  %v1721_v16 = vsub.f32 -0.5, %v4167_v39  ;;  %v2166_v58 = vadd.f32 1.5, %v3853_v12 }
 0x178   :  { %v1718_v19 = vmul.f32 %v2164_v59, %v4057_v47  ;;  %v4178_v30 = vadd.f32 %v1710_v43, %v1706_v48  ;;  %v1722_v32 = vmul.f32 %v1720_v29, %v4087_v37  ;;  %v2167_v15 = vadd.f32 1.5, %v4167_v39 }
 0x179   :  { %v4180_v50 = vadd.f32 %v1711_v3, %v1707_v45  ;;  %v1719_v17 = vmul.f32 %v2165_v60, %v4064_v13  ;;  %v1723_v54 = vmul.f32 %v1721_v16, %v4094_v5  ;;  %v1733_v52 = vmul.f32 %v2166_v58, %v4087_v37 }
 0x17a   :  { %v1735_v47 = vsub.f32 -0.16666666, %v3853_v12  ;;  %v1724_v35 = vadd.f32 %v1722_v32, %v1718_v19  ;;  %v1734_v46 = vmul.f32 %v2167_v15, %v4094_v5  ;;  %v1736_v7 = vsub.f32 -0.16666666, %v4167_v39 }
 0x17b   :  { %v2168_v40 = vadd.f32 1.1666666, %v3853_v12  ;;  %v1725_v23 = vadd.f32 %v1723_v54, %v1719_v17  ;;  %v2169_v13 = vadd.f32 1.1666666, %v4167_v39  ;;  %v1750_v37 = vsub.f32 0.1666667, %v3853_v12 }
 0x17c   :  { %v1737_v26 = vmul.f32 %v1735_v47, %v4101_v56  ;;  %v1727_v41 = vmul.f32 %v1726_v27, %v1724_v35  ;;  %v1738_v31 = vmul.f32 %v1736_v7, %v4106_v53  ;;  %v1751_v5 = vsub.f32 0.1666667, %v4167_v39 }
 0x17d   :  { %v1748_v6 = vmul.f32 %v2168_v40, %v4101_v56  ;;  %v1728_v51 = vmul.f32 %v1726_v27, %v1725_v23  ;;  %v1749_v4 = vmul.f32 %v2169_v13, %v4106_v53  ;;  %v1752_v9 = vmul.f32 %v1750_v37, %v4115_v62 }
 0x17e   :  { %v1739_v44 = vadd.f32 %v1737_v26, %v1733_v52  ;;  %v1729_v10 = vadd.f32 %v1727_v41, %v3905_v18  ;;  %v1740_v11 = vadd.f32 %v1738_v31, %v1734_v46  ;;  %v1753_v22 = vmul.f32 %v1751_v5, %v4120_v42 }
 0x17f   :  { %v2170_v56 = vadd.f32 0.8333333, %v3853_v12  ;;  %v1730_v55 = vadd.f32 %v1728_v51, %v3912_v20  ;;  %v1754_v27 = vadd.f32 %v1752_v9, %v1748_v6  ;;  %v2171_v1 = vadd.f32 0.8333333, %v4167_v39 }
 0x180   :  { %v1742_v24 = vmul.f32 %v1741_v57, %v1739_v44  ;;  %v1743_v53 = vmul.f32 %v1741_v57, %v1740_v11  ;;  %v1755_v33 = vadd.f32 %v1753_v22, %v1749_v4  ;;  %v1765_v18 = vsub.f32 0.5, %v3853_v12 }
 0x181   :  { %v1763_v2 = vmul.f32 %v2170_v56, %v4115_v62  ;;  %v1757_v48 = vmul.f32 %v1756_v34, %v1754_v27  ;;  %v1764_v61 = vmul.f32 %v2171_v1, %v4120_v42  ;;  %v1766_v20 = vsub.f32 0.5, %v4167_v39 }
 0x182   :  { %v1744_v0 = vadd.f32 %v1742_v24, %v1729_v10  ;;  %v1745_v8 = vadd.f32 %v1743_v53, %v1730_v55  ;;  %v1758_v45 = vmul.f32 %v1756_v34, %v1755_v33  ;;  %v1767_v57 = vmul.f32 %v1765_v18, %v4129_v38 }
 0x183   :  { %v1771_v59 = vstv %s4188_s10  ;;  %v1768_v62 = vmul.f32 %v1766_v20, %v4131_v21  ;;  %v2172_v3 = vadd.f32 0.5, %v3853_v12  ;;  %v2173_v29 = vadd.f32 0.5, %v4167_v39 }
 0x184   :  { %v1759_v43 = vadd.f32 %v1757_v48, %v1744_v0  ;;  %v1760_v60 = vadd.f32 %v1758_v45, %v1745_v8  ;;  %v1769_v42 = vadd.f32 %v1767_v57, %v1763_v2  ;;  %v1780_v19 = vsub.f32 0.8333333, %v3853_v12 }
 0x185   :  { %v1781_v16 = vsub.f32 0.8333333, %v4167_v39  ;;  %v1770_v58 = vadd.f32 %v1768_v62, %v1764_v61  ;;  %v1778_v32 = vmul.f32 %v2172_v3, %v4129_v38  ;;  %v1779_v34 = vmul.f32 %v2173_v29, %v4131_v21 }
 0x186   :  { %v1786_v15 = vstv %s4201_s11  ;;  %v1772_v17 = vmul.f32 %v1771_v59, %v1769_v42  ;;  %v1782_v54 = vmul.f32 %v1780_v19, %v4139_v14  ;;  %v2174_v47 = vadd.f32 0.16666666, %v3853_v12 }
 0x187   :  { %v1783_v52 = vmul.f32 %v1781_v16, %v4144_v49  ;;  %v1773_v35 = vmul.f32 %v1771_v59, %v1770_v58  ;;  %v2175_v46 = vadd.f32 0.16666666, %v4167_v39  ;;  %v1795_v7 = vsub.f32 1.1666667, %v3853_v12 }
 0x188   :  { %v1796_v38 = vsub.f32 1.1666667, %v4167_v39  ;;  %v1774_v40 = vadd.f32 %v1772_v17, %v1759_v43  ;;  %v1784_v21 = vadd.f32 %v1782_v54, %v1778_v32  ;;  %v1793_v26 = vmul.f32 %v2174_v47, %v4139_v14 }
 0x189   :  { %v1785_v23 = vadd.f32 %v1783_v52, %v1779_v34  ;;  %v1775_v13 = vadd.f32 %v1773_v35, %v1760_v60  ;;  %v1794_v37 = vmul.f32 %v2175_v46, %v4144_v49  ;;  %v1797_v41 = vmul.f32 %v1795_v7, %v4153_v36 }
 0x18a   :  { %v1798_v31 = vmul.f32 %v1796_v38, %v4155_v63  ;;  %v1787_v6 = vmul.f32 %v1786_v15, %v1784_v21  ;;  %v1801_v51 = vstv %s4222_s12  ;;  %v2176_v44 = vadd.f32 -0.1666667, %v3853_v12 }
 0x18b   :  { %v1788_v5 = vmul.f32 %v1786_v15, %v1785_v23  ;;  %v1799_v4 = vadd.f32 %v1797_v41, %v1793_v26  ;;  %v2177_v10 = vadd.f32 -0.1666667, %v4167_v39  ;;  %v1810_v14 = vsub.f32 1.5, %v3853_v12 }
 0x18c   :  { %v1800_v9 = vadd.f32 %v1798_v31, %v1794_v37  ;;  %v1789_v11 = vadd.f32 %v1787_v6, %v1774_v40  ;;  %v1808_v22 = vmul.f32 %v2176_v44, %v4153_v36  ;;  %v1811_v56 = vsub.f32 1.5, %v4167_v39 }
 0x18d   :  { %v1790_v49 = vadd.f32 %v1788_v5, %v1775_v13  ;;  %v1802_v55 = vmul.f32 %v1801_v51, %v1799_v4  ;;  %v1809_v27 = vmul.f32 %v2177_v10, %v4155_v63  ;;  %v1812_v1 = vmul.f32 %v1810_v14, %v4163_v28 }
 0x18e   :  { %v1803_v24 = vmul.f32 %v1801_v51, %v1800_v9  ;;  %v1813_v53 = vmul.f32 %v1811_v56, %v4170_v25  ;;  %v1816_v33 = vstv %s4236_s13  ;;  %v2178_v2 = vadd.f32 -0.5, %v3853_v12 }
 0x18f   :  { %v2179_v18 = vadd.f32 -0.5, %v4167_v39  ;;  %v1804_v0 = vadd.f32 %v1802_v55, %v1789_v11  ;;  %v1814_v61 = vadd.f32 %v1812_v1, %v1808_v22  ;;  %v1825_v36 = vsub.f32 1.8333334, %v3853_v12 }
 0x190   :  { %v1805_v48 = vadd.f32 %v1803_v24, %v1790_v49  ;;  %v1815_v20 = vadd.f32 %v1813_v53, %v1809_v27  ;;  %v1823_v8 = vmul.f32 %v2178_v2, %v4163_v28  ;;  %v1826_v45 = vsub.f32 1.8333334, %v4167_v39 }
 0x191   :  { %v1824_v63 = vmul.f32 %v2179_v18, %v4170_v25  ;;  %v1817_v57 = vmul.f32 %v1816_v33, %v1814_v61  ;;  %v1827_v59 = vmul.f32 %v1825_v36, %v4178_v30  ;;  %v1831_v3 = vstv %s4248_s14 }
 0x192   :  { %v1818_v43 = vmul.f32 %v1816_v33, %v1815_v20  ;;  %v1828_v62 = vmul.f32 %v1826_v45, %v4180_v50 }
 0x193   :  { %v1819_v29 = vadd.f32 %v1817_v57, %v1804_v0  ;;  %v1829_v60 = vadd.f32 %v1827_v59, %v1823_v8 }
 0x194   :  { %v1820_v42 = vadd.f32 %v1818_v43, %v1805_v48  ;;  %v1830_v19 = vadd.f32 %v1828_v62, %v1824_v63 }
 0x195   :  { %v1832_v16 = vmul.f32 %v1831_v3, %v1829_v60 }
 0x196   :  { %v1833_v12 = vmul.f32 %v1831_v3, %v1830_v19 }
 0x197   :  { %v1834_v58 = vadd.f32 %v1832_v16, %v1819_v29 }
 0x198   :  { %v1835_v32 = vadd.f32 %v1833_v12, %v1820_v42 }
 0x199   :  { %1836 = vst [vmem:[%s4277_s3] sm:$0xff] %v1834_v58 }
 0x19a   :  { %1837 = vst [vmem:[%s4277_s3 + $0x8] sm:$0xff] %v1835_v32 }

</bundles_post_ra>
